<compile_context>
chip_gen: v7x
topology: tpu7x:2x2x1
jax: 0.10.0
libtpu: 0.0.40
codegen_flags: <defaults>
</compile_context>

<pallas_src>
import functools

import jax
import jax.numpy as jnp
from jax import lax
from jax.experimental import pallas as pl
from jax.experimental.pallas import tpu as pltpu

KSIZE = 7
PAD = 3

_CSUB = 8                    # channels upcast to f32 per reduction stage
_MAX_UNROLL = 16             # stage-unroll limit before switching to fori_loop
_MATMUL_M_BYTES = 8 << 20    # use conv-as-matmul while (2*HW, HW) f32 fits this


# ----------------------------------------------------------------------------
# Shared in-kernel helpers
# ----------------------------------------------------------------------------
def _slice_channels(x_ref, lo, size):
    """x_ref[:, lo:lo+size, ...] for rank-3 (flat) or rank-4 (spatial) refs."""
    idx = (slice(None), pl.ds(lo, size)) + (slice(None),) * (len(x_ref.shape) - 2)
    return x_ref[idx]


def _fused_sum_max(x_ref):
    """Channel-sum and channel-max (axis 1) of the current block in ONE pass.

    At most _CSUB channels are upcast to f32 at a time so the live working set
    stays in a few vregs; both reductions share the same VMEM read.
    """
    tc = x_ref.shape[1]
    csub = tc
    if tc > _CSUB:
        csub = next(d for d in range(_CSUB, 0, -1) if tc % d == 0)
    nstages = tc // csub

    x0 = _slice_channels(x_ref, 0, csub).astype(jnp.float32)
    csum = jnp.sum(x0, axis=1)
    cmax = jnp.max(x0, axis=1)
    if nstages == 1:
        return csum, cmax

    if nstages <= _MAX_UNROLL or csub != _CSUB:
        for s in range(1, nstages):
            xs = _slice_channels(x_ref, s * csub, csub).astype(jnp.float32)
            csum = csum + jnp.sum(xs, axis=1)
            cmax = jnp.maximum(cmax, jnp.max(xs, axis=1))
        return csum, cmax

    def body(s, carry):
        acc_s, acc_m = carry
        lo = pl.multiple_of(s * csub, csub)
        xs = _slice_channels(x_ref, lo, csub).astype(jnp.float32)
        return acc_s + jnp.sum(xs, axis=1), jnp.maximum(acc_m, jnp.max(xs, axis=1))

    return lax.fori_loop(1, nstages, body, (csum, cmax))


def _accumulate(k, sum_ref, max_ref, csum, cmax):
    """Init at the first reduction step, accumulate afterwards."""
    @pl.when(k == 0)
    def _init():
        sum_ref[...] = csum
        max_ref[...] = cmax

    @pl.when(k > 0)
    def _acc():
        sum_ref[...] = sum_ref[...] + csum
        max_ref[...] = jnp.maximum(max_ref[...], cmax)


# ----------------------------------------------------------------------------
# Path A: lane-dense flat layout + conv-as-matmul (small H*W)
# ----------------------------------------------------------------------------
def _sa_matmul_kernel(m_ref, x_ref, o_ref, sum_ref, max_ref, *, inv_c):
    # m_ref:   VMEM (2*HW, HW) f32   -- Toeplitz conv matrix (resident)
    # x_ref:   VMEM (nb, tc, HW)     -- lane-dense channel chunk (native dtype)
    # o_ref:   VMEM (nb, 1, HW)      -- lane-dense output block (input dtype)
    # sum/max: VMEM (nb, HW) f32     -- running channel sum / max
    k = pl.program_id(1)
    csum, cmax = _fused_sum_max(x_ref)
    _accumulate(k, sum_ref, max_ref, csum, cmax)

    @pl.when(k == pl.num_programs(1) - 1)
    def _finalize():
        nb = sum_ref.shape[0]
        pooled = jnp.concatenate([sum_ref[...] * inv_c, max_ref[...]], axis=-1)
        if nb % 8:  # pad rows so the MXU sees a tile-aligned LHS
            pad_rows = 8 - (nb % 8)
            pooled = jnp.concatenate(
                [pooled, jnp.zeros((pad_rows, pooled.shape[1]), pooled.dtype)],
                axis=0)
        y = jnp.dot(pooled, m_ref[...],
                    precision=lax.Precision.HIGHEST,
                    preferred_element_type=jnp.float32)[:nb]
        o_ref[:, 0, :] = pl.reciprocal(1.0 + jnp.exp(-y),
                                       approx=False).astype(o_ref.dtype)


def _conv_matrix(conv_weight, H, W):
    """(2*H*W, H*W) f32 matrix M with  conv2d_same(cat([avg,max]), w).flatten()
    == concat([avg.flatten(), max.flatten()]) @ M   (row-major flattening).

    Weight-only preprocessing (data independent), built once in XLA so the
    kernel can run the 7x7 conv as one lane-dense MXU matmul.
    """
    HW = H * W
    i = jnp.arange(H).reshape(H, 1, 1, 1)
    j = jnp.arange(W).reshape(1, W, 1, 1)
    ky = jnp.arange(KSIZE).reshape(1, 1, KSIZE, 1)
    kx = jnp.arange(KSIZE).reshape(1, 1, 1, KSIZE)
    ii = i + ky - PAD
    jj = j + kx - PAD
    valid = ((ii >= 0) & (ii < H)) & ((jj >= 0) & (jj < W))          # (H,W,7,7)
    rows_sp = jnp.where(valid, ii * W + jj, 0)                       # (H,W,7,7)
    cols = jnp.broadcast_to(i * W + j, (H, W, KSIZE, KSIZE)).reshape(-1)
    w = conv_weight.astype(jnp.float32)
    m = jnp.zeros((2 * HW, HW), jnp.float32)
    for c in range(2):
        vals = jnp.where(valid,
                         jnp.broadcast_to(w[0, c], (H, W, KSIZE, KSIZE)), 0.0)
        rows = (c * HW + rows_sp).reshape(-1)
        m = m.at[rows, cols].add(vals.reshape(-1))
    return m


# ----------------------------------------------------------------------------
# Path B: spatial layout + pad-scratch band conv (large H*W fallback)
# ----------------------------------------------------------------------------
def _sa_spatial_kernel(w_ref, x_ref, o_ref, sum_ref, max_ref, pad_ref, *, inv_c):
    # w_ref:   SMEM (2*7*7,) f32        -- conv weight, flattened [in_c, ky, kx]
    # x_ref:   VMEM (nb, tc, H, W)      -- channel chunk of nb images
    # o_ref:   VMEM (nb, 1, H, W)       -- output block (input dtype)
    # sum/max: VMEM (nb, H, W) f32
    # pad_ref: VMEM (2, H+6, W+6) f32   -- zero-padded [avg, max] maps
    k = pl.program_id(1)
    nb = x_ref.shape[0]
    H, W = x_ref.shape[2], x_ref.shape[3]

    # Zero the pad scratch once per batch block (k==0); only its interior is
    # ever rewritten afterwards.  Safe under any grid->core assignment because
    # the reduction axis k is "arbitrary" (stays on one core per batch block).
    @pl.when(k == 0)
    def _zero_pad():
        pad_ref[...] = jnp.zeros_like(pad_ref)

    csum, cmax = _fused_sum_max(x_ref)
    _accumulate(k, sum_ref, max_ref, csum, cmax)

    @pl.when(k == pl.num_programs(1) - 1)
    def _finalize():
        for b in range(nb):
            pad_ref[0, PAD:PAD + H, PAD:PAD + W] = sum_ref[b] * inv_c
            pad_ref[1, PAD:PAD + H, PAD:PAD + W] = max_ref[b]
            acc = jnp.zeros((H, W), jnp.float32)
            for c in range(2):
                for ky in range(KSIZE):
                    band = pad_ref[c, ky:ky + H, :]          # one band load
                    for kx in range(KSIZE):
                        wt = w_ref[c * KSIZE * KSIZE + ky * KSIZE + kx]
                        acc = acc + wt * band[:, kx:kx + W]  # static lane shift
            y = pl.reciprocal(1.0 + jnp.exp(-acc), approx=False)
            o_ref[b, 0] = y.astype(o_ref.dtype)


# ----------------------------------------------------------------------------
# Wrapper: blocking heuristics + pallas_call
# ----------------------------------------------------------------------------
def _vmem_block_budget():
    """Target bytes for the double-buffered streaming x block, per chip gen."""
    try:
        cap = getattr(pltpu.get_tpu_info(), "vmem_capacity_bytes", None)
    except Exception:
        cap = None
    if cap is None:
        return 12 << 20                 # safe default on every generation
    if cap <= (64 << 20):               # v7x: 64 MiB physical -> blocks, not depth
        return 16 << 20
    return 20 << 20                     # v5e / v6e: 128 MiB physical


def _vmem_limit(est_bytes):
    """Scoped VMEM limit with headroom; stays under v7x's 64 MiB physical."""
    return int(min(56 << 20, max(24 << 20, est_bytes * 5 // 4)))


def _pick_blocking(N, C, HW, itemsize, budget, *, chan_mult8):
    """Pick (nb, tc) so the double-buffered x block fits `budget`, preferring
    whole-C blocks (single reduction step) and then larger batch blocks."""
    blk = lambda nb, tc: 2 * nb * tc * HW * itemsize
    tc = C
    if blk(1, C) > budget:
        cand = [d for d in range(C - 1, 0, -1)
                if C % d == 0 and (not chan_mult8 or d % 8 == 0)
                and blk(1, d) <= budget]
        if cand:
            tc = cand[0]
    nb = 1
    for d in range(N, 0, -1):
        if N % d == 0 and (blk(d, tc) <= budget or d == 1):
            nb = d
            break
    return nb, tc


def spatial_attention(x, conv_weight, *, c_chunk=None, force_spatial=False):
    """x: (N, C, H, W) float; conv_weight: (1, 2, 7, 7). Returns (N,1,H,W) in x.dtype."""
    N, C, H, W = x.shape
    HW = H * W
    itemsize = jnp.dtype(x.dtype).itemsize
    out_dtype = x.dtype
    inv_c = 1.0 / C

    use_matmul = (not force_spatial) and (2 * HW * HW * 4 <= _MATMUL_M_BYTES)
    budget = _vmem_block_budget()
    nb, tc = _pick_blocking(N, C, HW, itemsize, budget, chan_mult8=use_matmul)
    if c_chunk is not None:
        assert C % c_chunk == 0, "c_chunk must divide C"
        if use_matmul:
            assert c_chunk == C or c_chunk % 8 == 0, \
                "lane-dense x block needs a channel chunk that is C or a multiple of 8"
        tc = c_chunk
    grid = (N // nb, C // tc)

    if use_matmul:
        m = _conv_matrix(conv_weight, H, W)                 # (2*HW, HW) f32
        x_flat = x.reshape(N, C, HW)                        # lane-dense view (free)
        est = (2 * nb * tc * HW * itemsize + 2 * nb * HW * itemsize
               + 2 * (2 * HW) * HW * 4 + 2 * nb * HW * 4)
        out = pl.pallas_call(
            functools.partial(_sa_matmul_kernel, inv_c=inv_c),
            out_shape=jax.ShapeDtypeStruct((N, 1, HW), out_dtype),
            grid_spec=pltpu.PrefetchScalarGridSpec(
                num_scalar_prefetch=0,
                grid=grid,
                in_specs=[
                    pl.BlockSpec((2 * HW, HW), lambda n, k: (0, 0)),   # resident
                    pl.BlockSpec((nb, tc, HW), lambda n, k: (n, k, 0)),
                ],
                out_specs=pl.BlockSpec((nb, 1, HW), lambda n, k: (n, 0, 0)),
                scratch_shapes=[pltpu.VMEM((nb, HW), jnp.float32),
                                pltpu.VMEM((nb, HW), jnp.float32)],
            ),
            compiler_params=pltpu.CompilerParams(
                dimension_semantics=("parallel", "arbitrary"),
                vmem_limit_bytes=_vmem_limit(est)),
        )(m, x_flat)
        return out.reshape(N, 1, H, W)

    # Spatial fallback (large H*W: layout already lane-dense, Toeplitz too big).
    w_flat = conv_weight.reshape(-1).astype(jnp.float32)    # (98,)
    Hp, Wp = H + 2 * PAD, W + 2 * PAD
    est = (2 * nb * tc * HW * itemsize + 2 * nb * HW * itemsize
           + 2 * nb * HW * 4 + 2 * Hp * Wp * 4)
    return pl.pallas_call(
        functools.partial(_sa_spatial_kernel, inv_c=inv_c),
        out_shape=jax.ShapeDtypeStruct((N, 1, H, W), out_dtype),
        grid_spec=pltpu.PrefetchScalarGridSpec(
            num_scalar_prefetch=0,
            grid=grid,
            in_specs=[
                pl.BlockSpec(memory_space=pltpu.MemorySpace.SMEM),     # weights
                pl.BlockSpec((nb, tc, H, W), lambda n, k: (n, k, 0, 0)),
            ],
            out_specs=pl.BlockSpec((nb, 1, H, W), lambda n, k: (n, 0, 0, 0)),
            scratch_shapes=[pltpu.VMEM((nb, H, W), jnp.float32),
                            pltpu.VMEM((nb, H, W), jnp.float32),
                            pltpu.VMEM((2, Hp, Wp), jnp.float32)],
        ),
        compiler_params=pltpu.CompilerParams(
            dimension_semantics=("parallel", "arbitrary"),
            vmem_limit_bytes=_vmem_limit(est)),
    )(w_flat, x)


def spatial_attention_ref(x, conv_weight):
    """Pure-JAX reference mirroring the PyTorch forward (exact-f32 conv)."""
    avg = jnp.mean(x, axis=1, keepdims=True)
    mx = jnp.max(x, axis=1, keepdims=True)
    cat = jnp.concatenate([avg, mx], axis=1)                # (N,2,H,W)
    y = lax.conv_general_dilated(
        cat, conv_weight,
        window_strides=(1, 1), padding=((PAD, PAD), (PAD, PAD)),
        dimension_numbers=("NCHW", "OIHW", "NCHW"),
        precision=lax.Precision.HIGHEST)
    return jax.nn.sigmoid(y)


if __name__ == "__main__":
    key = jax.random.PRNGKey(0)
    k_x, k_w, k_c = jax.random.split(key, 3)

    N, C, H, W = 2, 4, 16, 16
    x = jax.random.normal(k_x, (N, C, H, W), dtype=jnp.float32)
    conv_weight = 0.05 * jax.random.normal(k_w, (1, 2, KSIZE, KSIZE),
                                           dtype=jnp.float32)
    ref = spatial_attention_ref(x, conv_weight)

    # 1) Lane-dense matmul path (single grid step for this shape), f32.
    out = jax.block_until_ready(spatial_attention(x, conv_weight))
    assert out.shape == (N, 1, H, W) and out.dtype == x.dtype
    assert jnp.allclose(out, ref, atol=5e-5, rtol=5e-5), "mismatch (matmul path)"

    # 2) Native bf16 input -> bf16 output, f32 accumulation inside the kernel.
    x_bf16 = x.astype(jnp.bfloat16)
    out_bf = jax.block_until_ready(spatial_attention(x_bf16, conv_weight))
    ref_bf = spatial_attention_ref(x_bf16.astype(jnp.float32), conv_weight)
    assert out_bf.dtype == jnp.bfloat16
    assert jnp.allclose(out_bf.astype(jnp.float32), ref_bf, atol=5e-3, rtol=5e-3), \
        "mismatch (bf16)"

    # 3) Channel-chunked reduction (exercises init + accumulate across k steps).
    C2 = 16
    x2 = jax.random.normal(k_c, (N, C2, H, W), dtype=jnp.float32)
    ref2 = spatial_attention_ref(x2, conv_weight)
    out2 = jax.block_until_ready(spatial_attention(x2, conv_weight, c_chunk=8))
    assert jnp.allclose(out2, ref2, atol=5e-5, rtol=5e-5), "mismatch (c_chunk=8)"

    # 4) Spatial (pad-scratch) fallback path used for large H*W — forced here.
    out3 = jax.block_until_ready(
        spatial_attention(x, conv_weight, force_spatial=True))
    assert jnp.allclose(out3, ref, atol=1e-5, rtol=1e-5), "mismatch (spatial path)"

    print("KERNEL_OK")
</pallas_src>

<mosaic_0001>
module attributes {stable_mosaic.version = 11 : i64} {
  func.func @_sa_matmul_kernel(%arg0: i32, %arg1: i32, %arg2: memref<512x256xf32, #tpu.memory_space<vmem>>, %arg3: memref<2x4x256xf32, #tpu.memory_space<vmem>>, %arg4: memref<2x1x256xf32, #tpu.memory_space<vmem>>, %arg5: memref<2x256xf32, #tpu.memory_space<vmem>>, %arg6: memref<2x256xf32, #tpu.memory_space<vmem>>) attributes {dimension_semantics = [#tpu.dimension_semantics<parallel>, #tpu.dimension_semantics<arbitrary>], iteration_bounds = array<i64: 1, 1>, scalar_prefetch = 0 : i64, scratch_operands = 2 : i64, tpu.core_type = #tpu.core_type<tc>, window_params = [{pipeline_mode = #tpu.pipeline_mode<synchronous>, transform_indices = @transform_0, window_bounds = array<i64: 512, 256>}, {transform_indices = @transform_1, window_bounds = array<i64: 2, 4, 256>}, {transform_indices = @transform_2, window_bounds = array<i64: 2, 1, 256>}]} {
    %c0 = arith.constant 0 : index
    %c0_0 = arith.constant 0 : index
    %c0_1 = arith.constant 0 : index
    %0 = vector.load %arg3[%c0, %c0_0, %c0_1] : memref<2x4x256xf32, #tpu.memory_space<vmem>>, vector<2x4x256xf32>
    %cst = arith.constant dense<0.000000e+00> : vector<2x256xf32>
    %1 = vector.multi_reduction <add>, %0, %cst [1] : vector<2x4x256xf32> to vector<2x256xf32>
    %cst_2 = arith.constant dense<0xFF800000> : vector<2x256xf32>
    %2 = vector.multi_reduction <maximumf>, %0, %cst_2 [1] : vector<2x4x256xf32> to vector<2x256xf32>
    %c0_i32 = arith.constant 0 : i32
    %3 = arith.cmpi eq, %arg1, %c0_i32 : i32
    %4 = arith.extui %3 : i1 to i32
    %c0_i32_3 = arith.constant 0 : i32
    %5 = arith.cmpi ne, %4, %c0_i32_3 : i32
    scf.if %5 {
      %c0_8 = arith.constant 0 : index
      %c0_9 = arith.constant 0 : index
      %12 = vector.load %arg5[%c0_8, %c0_9] : memref<2x256xf32, #tpu.memory_space<vmem>>, vector<2x256xf32>
      tpu.vector_store %arg5[%c0_8, %c0_9], %1 {strides = array<i32>} : memref<2x256xf32, #tpu.memory_space<vmem>>, vector<2x256xf32>,
      %c0_10 = arith.constant 0 : index
      %c0_11 = arith.constant 0 : index
      %13 = vector.load %arg6[%c0_10, %c0_11] : memref<2x256xf32, #tpu.memory_space<vmem>>, vector<2x256xf32>
      tpu.vector_store %arg6[%c0_10, %c0_11], %2 {strides = array<i32>} : memref<2x256xf32, #tpu.memory_space<vmem>>, vector<2x256xf32>,
    } else {
    }
    %c0_i32_4 = arith.constant 0 : i32
    %6 = arith.cmpi sgt, %arg1, %c0_i32_4 : i32
    %7 = arith.extui %6 : i1 to i32
    %c0_i32_5 = arith.constant 0 : i32
    %8 = arith.cmpi ne, %7, %c0_i32_5 : i32
    scf.if %8 {
      %c0_8 = arith.constant 0 : index
      %c0_9 = arith.constant 0 : index
      %12 = vector.load %arg5[%c0_8, %c0_9] : memref<2x256xf32, #tpu.memory_space<vmem>>, vector<2x256xf32>
      %13 = arith.addf %12, %1 : vector<2x256xf32>
      %c0_10 = arith.constant 0 : index
      %c0_11 = arith.constant 0 : index
      %14 = vector.load %arg5[%c0_10, %c0_11] : memref<2x256xf32, #tpu.memory_space<vmem>>, vector<2x256xf32>
      tpu.vector_store %arg5[%c0_10, %c0_11], %13 {strides = array<i32>} : memref<2x256xf32, #tpu.memory_space<vmem>>, vector<2x256xf32>,
      %c0_12 = arith.constant 0 : index
      %c0_13 = arith.constant 0 : index
      %15 = vector.load %arg6[%c0_12, %c0_13] : memref<2x256xf32, #tpu.memory_space<vmem>>, vector<2x256xf32>
      %16 = arith.maximumf %15, %2 : vector<2x256xf32>
      %c0_14 = arith.constant 0 : index
      %c0_15 = arith.constant 0 : index
      %17 = vector.load %arg6[%c0_14, %c0_15] : memref<2x256xf32, #tpu.memory_space<vmem>>, vector<2x256xf32>
      tpu.vector_store %arg6[%c0_14, %c0_15], %16 {strides = array<i32>} : memref<2x256xf32, #tpu.memory_space<vmem>>, vector<2x256xf32>,
    } else {
    }
    %c0_i32_6 = arith.constant 0 : i32
    %9 = arith.cmpi eq, %arg1, %c0_i32_6 : i32
    %10 = arith.extui %9 : i1 to i32
    %c0_i32_7 = arith.constant 0 : i32
    %11 = arith.cmpi ne, %10, %c0_i32_7 : i32
    scf.if %11 {
      %c0_8 = arith.constant 0 : index
      %c0_9 = arith.constant 0 : index
      %12 = vector.load %arg5[%c0_8, %c0_9] : memref<2x256xf32, #tpu.memory_space<vmem>>, vector<2x256xf32>
      %cst_10 = arith.constant 2.500000e-01 : f32
      %13 = vector.broadcast %cst_10 : f32 to vector<2x256xf32>
      %14 = arith.mulf %12, %13 : vector<2x256xf32>
      %c0_11 = arith.constant 0 : index
      %c0_12 = arith.constant 0 : index
      %15 = vector.load %arg6[%c0_11, %c0_12] : memref<2x256xf32, #tpu.memory_space<vmem>>, vector<2x256xf32>
      %16 = tpu.concatenate %14, %15 in 1 : vector<2x256xf32>, vector<2x256xf32> -> vector<2x512xf32>
      %cst_13 = arith.constant 0.000000e+00 : f32
      %17 = vector.broadcast %cst_13 : f32 to vector<6x512xf32>
      %18 = tpu.concatenate %16, %17 in 0 : vector<2x512xf32>, vector<6x512xf32> -> vector<8x512xf32>
      %c0_14 = arith.constant 0 : index
      %c0_15 = arith.constant 0 : index
      %19 = vector.load %arg2[%c0_14, %c0_15] : memref<512x256xf32, #tpu.memory_space<vmem>>, vector<512x256xf32>
      %cst_16 = arith.constant dense<0.000000e+00> : vector<8x256xf32>
      %20 = tpu.matmul %18, %19, %cst_16 {dimension_numbers = #tpu.dot_dimension_numbers<[1], [0], [0], [1], [0, 0, 1, 1], [], []>, precision = #tpu.contract_precision<fp32>} : vector<8x512xf32>, vector<512x256xf32>, vector<8x256xf32> -> vector<8x256xf32>
      %21 = vector.extract_strided_slice %20 {offsets = [0, 0], sizes = [2, 256], strides = [1, 1]} : vector<8x256xf32> to vector<2x256xf32>
      %cst_17 = arith.constant 0.000000e+00 : f32
      %22 = vector.broadcast %cst_17 : f32 to vector<2x256xf32>
      %23 = arith.subf %22, %21 : vector<2x256xf32>
      %24 = math.exp %23 : vector<2x256xf32>
      %cst_18 = arith.constant 1.000000e+00 : f32
      %25 = vector.broadcast %cst_18 : f32 to vector<2x256xf32>
      %26 = arith.addf %25, %24 : vector<2x256xf32>
      %27 = tpu.reciprocal %26 : vector<2x256xf32> -> vector<2x256xf32>
      %c0_19 = arith.constant 0 : index
      %c0_20 = arith.constant 0 : index
      %c0_21 = arith.constant 0 : index
      %28 = vector.load %arg4[%c0_19, %c0_20, %c0_21] : memref<2x1x256xf32, #tpu.memory_space<vmem>>, vector<2x1x256xf32>
      %29 = vector.shape_cast %28 : vector<2x1x256xf32> to vector<2x256xf32>
      %30 = vector.shape_cast %27 : vector<2x256xf32> to vector<2x1x256xf32>
      tpu.vector_store %arg4[%c0_19, %c0_20, %c0_21], %30 {strides = array<i32>} : memref<2x1x256xf32, #tpu.memory_space<vmem>>, vector<2x1x256xf32>,
    } else {
    }
    return
  }
  func.func @transform_0(%arg0: i32, %arg1: i32) -> (i32, i32) {
    %c0_i32 = arith.constant 0 : i32
    %c0_i32_0 = arith.constant 0 : i32
    %c0_i32_1 = arith.constant 0 : i32
    return %c0_i32, %c0_i32_0 : i32, i32
  }
  func.func @transform_1(%arg0: i32, %arg1: i32) -> (i32, i32, i32) {
    %c0_i32 = arith.constant 0 : i32
    %c0_i32_0 = arith.constant 0 : i32
    return %arg0, %arg1, %c0_i32 : i32, i32, i32
  }
  func.func @transform_2(%arg0: i32, %arg1: i32) -> (i32, i32, i32) {
    %c0_i32 = arith.constant 0 : i32
    %c0_i32_0 = arith.constant 0 : i32
    %c0_i32_1 = arith.constant 0 : i32
    return %arg0, %c0_i32, %c0_i32_0 : i32, i32, i32
  }
}

</mosaic_0001>

<bundles_post_ra>
// kernel: tpu_custom_call.1
= control target key start
LH: loop header
LB: loop body
LE: loop exit
PB: predicated region body
PF: predicated region fallthrough
CT: control target
= control target key end

     0   :  { %7 = vsyncpa [#allocation5], 0  ;;  %s5660_s0 = inlined_call_operand.hbm [shape: f32[512,256], index: 0, kind: input, shape index: {}]   ;;  %s5661_s1 = inlined_call_operand.hbm [shape: f32[2,4,256], index: 1, kind: input, shape index: {}]   ;;  %s5662_s2 = inlined_call_operand.hbm [shape: f32[2,1,256], index: 2, kind: output, shape index: {}]  }
   0x1   :  { %8 = vsyncpa [#allocation8], 0 }
   0x2   :  { %9 = vsyncpa [#allocation6], 0  ;;  %s3919_s9 = smov [#allocation4]   ;;  %s3847_s13 = scalar_lea.hbm %s5660_s0, 16384 }
   0x3   :  { %s15_s10 = sshll.u32 %s3919_s9, 4  ;;  %p3848_p0 = scmp.ne.s32.totalorder %s5660_s0, %s3847_s13  ;;  %s16_s10 = int_to_ptr.vmem [resolvable:$true] %s15_s10 }
   0x4   :  { %p3851_p1 = scmp.lt.u32.totalorder %s3847_s13, %s5660_s0 }
   0x6   :  { %p3853_p2 = pnand %p3851_p1, %p3848_p0 }
   0x8   :  { %3856 = shalt.err (!%p3853_p2)
}
   0x9   :  { %s3857_s18 = scalar_lea.vmem %s16_s10, 16384  ;;  %p3862_p4 = scmp.lt.s32.totalorder %s16_s10, %s16_s10 }
   0xa   :  { %p3858_p3 = scmp.ne.s32.totalorder %s16_s10, %s3857_s18  ;;  %p3863_p5 = scmp.lt.s32.totalorder %s3857_s18, %s3857_s18 }
   0xc   :  { %p3864_p6 = por %p3863_p5, %p3862_p4 }
   0xe   :  { %p3865_p7 = pnand %p3864_p6, %p3858_p3 }
  0x10   :  { %3868 = shalt.err (!%p3865_p7)
}
  0x11   :  { %s3920_s19 = smov 256   ;;  %s3921_s20 = smov 16  }
  0x12   :  { %21 = dma.hbm_to_vmem [thread:$0]  %s5660_s0, 16384, %s16_s10, [#allocation5], %s3920_s19, %s3920_s19, %s3921_s20  }
  0x13   :  { %s3922_s23 = smov [#allocation7]   ;;  %s3869_s27 = scalar_lea.hbm %s5661_s1, 256 }
  0x14   :  { %s27_s24 = sshll.u32 %s3922_s23, 4  ;;  %p3870_p8 = scmp.ne.s32.totalorder %s5661_s1, %s3869_s27  ;;  %s28_s24 = int_to_ptr.vmem [resolvable:$true] %s27_s24 }
  0x15   :  { %p3873_p9 = scmp.lt.u32.totalorder %s3869_s27, %s5661_s1 }
  0x17   :  { %p3875_p10 = pnand %p3873_p9, %p3870_p8 }
  0x19   :  { %3878 = shalt.err (!%p3875_p10)
}
  0x1a   :  { %s3879_s4 = scalar_lea.vmem %s28_s24, 256  ;;  %p3884_p12 = scmp.lt.s32.totalorder %s28_s24, %s28_s24 }
  0x1b   :  { %p3880_p11 = scmp.ne.s32.totalorder %s28_s24, %s3879_s4  ;;  %p3885_p13 = scmp.lt.s32.totalorder %s3879_s4, %s3879_s4 }
  0x1d   :  { %p3886_p0 = por %p3885_p13, %p3884_p12 }
  0x1f   :  { %p3887_p1 = pnand %p3886_p0, %p3880_p11 }
  0x21   :  { %3890 = shalt.err (!%p3887_p1)
}
  0x22   :  { %s3923_s0 = smov 128   ;;  %s3924_s5 = smov 8  }
  0x23   :  { %33 = dma.hbm_to_vmem [thread:$0]  %s5661_s1, 256, %s28_s24, [#allocation8], %s3923_s0, %s3923_s0, %s3924_s5  }
  0x24   :  { %3913 = dma.done.wait [#allocation5], 16384  }
  0x25   :  { %3914 = vsyncadd [#allocation5], 4294950912 }
  0x26   :  { %3915 = dma.done.wait [#allocation8], 256  }
  0x27   :  { %3916 = vsyncadd [#allocation8], 4294967040  ;;  %v3925_v0 = vmov 1983009808   ;;  %v5663_v2 = vlaneseq  ;;  %v279_v5 = vld [vmem:[#allocation4 + $0x8] sm:$0xff]  ;;  %v281_v6 = vld [vmem:[#allocation4 + $0x18] sm:$0xff] }
  0x28   :  { %v115_v1 = vunpack.c.l.s4 %v3925_v0  ;;  %v343_v7 = vld [vmem:[#allocation4 + $0x208] sm:$0xff]  ;;  %v406_v8 = vand.u32 4294901760, %v279_v5  ;;  %v410_v9 = vand.u32 4294901760, %v281_v6  ;;  %v345_v10 = vld [vmem:[#allocation4 + $0x218] sm:$0xff]  ;;  %v278_v12 = vld [vmem:[#allocation4] sm:$0xff]  ;;  %vm48_vm0 = vcmask 1043456  }
  0x29   :  { %v3970_v4 = vshrl.u32 %v5663_v2, 7  ;;  %v1690_v11 = vand.u32 4294901760, %v343_v7  ;;  %v280_v13 = vld [vmem:[#allocation4 + $0x10] sm:$0xff]  ;;  %v1694_v14 = vand.u32 4294901760, %v345_v10  ;;  %v408_v15 = vand.u32 4294901760, %v278_v12  ;;  %v342_v17 = vld [vmem:[#allocation4 + $0x200] sm:$0xff] }
  0x2a   :  { %v116_v3 = vunpack.c.0.s8 %v115_v1  ;;  %v412_v16 = vand.u32 4294901760, %v280_v13  ;;  %v344_v18 = vld [vmem:[#allocation4 + $0x210] sm:$0xff]  ;;  %v283_v19 = vld [vmem:[#allocation4 + $0x28] sm:$0xff]  ;;  %v3975_v21 = vpack.c.bf16 %v410_v9, %v406_v8  ;;  %v3977_v22 = vsub.f32 %v279_v5, %v406_v8  ;;  %v285_v25 = vld [vmem:[#allocation4 + $0x38] sm:$0xff]  ;;  %s3927_s1 = smov [#allocation9]  }
  0x2b   :  { %6179 = vst [vmem:[#allocation13_spill] sm:$0xff] %v3970_v4  ;;  %v3979_v23 = vsub.f32 %v281_v6, %v410_v9  ;;  %v3981_v24 = vsub.f32 %v343_v7, %v1690_v11  ;;  %v347_v26 = vld [vmem:[#allocation4 + $0x228] sm:$0xff]  ;;  %v349_v27 = vld [vmem:[#allocation4 + $0x238] sm:$0xff]  ;;  %v3983_v28 = vpack.c.bf16 %v1694_v14, %v1690_v11  ;;  %v3985_v29 = vsub.f32 %v345_v10, %v1694_v14  ;;  %v282_v32 = vld [vmem:[#allocation4 + $0x20] sm:$0xff]  ;;  %s3022_s8 = sshll.u32 %s3927_s1, 4  ;;  %s3023_s8 = int_to_ptr.vmem [resolvable:$true] %s3022_s8 }
  0x2c   :  { %v3973_v20 = vsub.s32 %v116_v3, %v3970_v4  ;;  %6180 = vst [vmem:[#allocation14_spill] sm:$0xff] %v3975_v21  ;;  %6181 = vst [vmem:[#allocation15_spill] sm:$0xff] %v3977_v22  ;;  %v3987_v30 = vpack.c.bf16 %v412_v16, %v408_v15  ;;  %v3989_v31 = vsub.f32 %v278_v12, %v408_v15  ;;  %3037 = vmatprep.subr.bf16.mxu1 %v3975_v21  ;;  %v284_v37 = vld [vmem:[#allocation4 + $0x30] sm:$0xff]  ;;  %v346_v42 = vld [vmem:[#allocation4 + $0x220] sm:$0xff]  ;;  %vm134_vm1 = vcmask 1041409   ;;  %s3891_s9 = scalar_lea.vmem %s3023_s8, 64  ;;  %p3896_p3 = scmp.lt.s32.totalorder %s3023_s8, %s3023_s8 }
  0x2d   :  { %6182 = vst [vmem:[#allocation16_spill] sm:$0xff] %v3979_v23  ;;  %6183 = vst [vmem:[#allocation17_spill] sm:$0xff] %v3981_v24  ;;  %v3992_v33 = vsub.f32 %v280_v13, %v412_v16  ;;  %v1692_v34 = vand.u32 4294901760, %v342_v17  ;;  %v1696_v35 = vand.u32 4294901760, %v344_v18  ;;  %v414_v36 = vand.u32 4294901760, %v283_v19  ;;  %3421 = vmatprep.subr.bf16.mxu0 %v3983_v28  ;;  %v348_v43 = vld [vmem:[#allocation4 + $0x230] sm:$0xff]  ;;  %p3892_p2 = scmp.ne.s32.totalorder %s3023_s8, %s3891_s9  ;;  %p3897_p4 = scmp.lt.s32.totalorder %s3891_s9, %s3891_s9 }
  0x2e   :  { %6184 = vst [vmem:[#allocation18_spill] sm:$0xff] %v3983_v28  ;;  %6185 = vst [vmem:[#allocation19_spill] sm:$0xff] %v3985_v29  ;;  %3039 = vmatpush1.bf16.msra.mxu1 %v3987_v30  ;;  %v418_v38 = vand.u32 4294901760, %v285_v25  ;;  %v1698_v39 = vand.u32 4294901760, %v347_v26  ;;  %v1702_v40 = vand.u32 4294901760, %v349_v27  ;;  %v416_v41 = vand.u32 4294901760, %v282_v32 }
  0x2f   :  { %6186 = vst [vmem:[#allocation20_spill] sm:$0xff] %v3987_v30  ;;  %6187 = vst [vmem:[#allocation21_spill] sm:$0xff] %v3989_v31  ;;  %v3996_v44 = vpack.c.bf16 %v1696_v35, %v1692_v34  ;;  %v3998_v45 = vsub.f32 %v342_v17, %v1692_v34  ;;  %v4000_v46 = vsub.f32 %v344_v18, %v1696_v35  ;;  %v287_v48 = vld [vmem:[#allocation4 + $0x48] sm:$0xff]  ;;  %v289_v49 = vld [vmem:[#allocation4 + $0x58] sm:$0xff]  ;;  %v420_v57 = vand.u32 4294901760, %v284_v37  ;;  %p3898_p5 = por %p3897_p4, %p3896_p3 }
  0x30   :  { %6188 = vst [vmem:[#allocation22_spill] sm:$0xff] %v3992_v33  ;;  %v4002_v47 = vsub.f32 %v283_v19, %v414_v36  ;;  %v351_v50 = vld [vmem:[#allocation4 + $0x248] sm:$0xff]  ;;  %v4004_v51 = vpack.c.bf16 %v418_v38, %v414_v36  ;;  %v4006_v52 = vsub.f32 %v285_v25, %v418_v38  ;;  %v4008_v53 = vpack.c.bf16 %v1702_v40, %v1698_v39  ;;  %v353_v55 = vld [vmem:[#allocation4 + $0x258] sm:$0xff]  ;;  %v286_v0 = vld [vmem:[#allocation4 + $0x40] sm:$0xff] }
  0x31   :  { %6189 = vst [vmem:[#allocation23_spill] sm:$0xff] %v3996_v44  ;;  %6190 = vst [vmem:[#allocation24_spill] sm:$0xff] %v3998_v45  ;;  %v4010_v54 = vsub.f32 %v347_v26, %v1698_v39  ;;  %3423 = vmatpush1.bf16.msra.mxu0 %v3996_v44  ;;  %v4013_v56 = vsub.f32 %v349_v27, %v1702_v40  ;;  %v4015_v58 = vsub.f32 %v282_v32, %v416_v41  ;;  %v288_v1 = vld [vmem:[#allocation4 + $0x50] sm:$0xff]  ;;  %v350_v8 = vld [vmem:[#allocation4 + $0x240] sm:$0xff]  ;;  %vm136_vm2 = vcmask 1043459   ;;  %p3899_p6 = pnand %p3898_p5, %p3892_p2 }
  0x32   :  { %6191 = vst [vmem:[#allocation25_spill] sm:$0xff] %v4000_v46  ;;  %6192 = vst [vmem:[#allocation26_spill] sm:$0xff] %v4002_v47  ;;  %v1700_v59 = vand.u32 4294901760, %v346_v42  ;;  %3041 = vmatprep.subr.bf16.mxu1 %v4004_v51  ;;  %3425 = vmatprep.subr.bf16.mxu0 %v4008_v53  ;;  %v1704_v60 = vand.u32 4294901760, %v348_v43  ;;  %v422_v61 = vand.u32 4294901760, %v287_v48  ;;  %v426_v62 = vand.u32 4294901760, %v289_v49 }
  0x33   :  { %6193 = vst [vmem:[#allocation27_spill] sm:$0xff] %v4004_v51  ;;  %6194 = vst [vmem:[#allocation28_spill] sm:$0xff] %v4006_v52  ;;  %v1706_v63 = vand.u32 4294901760, %v351_v50  ;;  %v4019_v3 = vpack.c.bf16 %v420_v57, %v416_v41  ;;  %v4021_v5 = vsub.f32 %v284_v37, %v420_v57  ;;  %v1710_v7 = vand.u32 4294901760, %v353_v55  ;;  %v352_v9 = vld [vmem:[#allocation4 + $0x250] sm:$0xff]  ;;  %v291_v10 = vld [vmem:[#allocation4 + $0x68] sm:$0xff] }
  0x34   :  { %6195 = vst [vmem:[#allocation29_spill] sm:$0xff] %v4008_v53  ;;  %6196 = vst [vmem:[#allocation30_spill] sm:$0xff] %v4010_v54  ;;  %v4023_v6 = vsub.f32 %v346_v42, %v1700_v59  ;;  %v4025_v11 = vpack.c.bf16 %v1704_v60, %v1700_v59  ;;  %v4027_v12 = vsub.f32 %v348_v43, %v1704_v60  ;;  %v293_v15 = vld [vmem:[#allocation4 + $0x78] sm:$0xff]  ;;  %v355_v16 = vld [vmem:[#allocation4 + $0x268] sm:$0xff]  ;;  %v424_v27 = vand.u32 4294901760, %v286_v0 }
  0x35   :  { %6197 = vst [vmem:[#allocation31_spill] sm:$0xff] %v4013_v56  ;;  %6198 = vst [vmem:[#allocation32_spill] sm:$0xff] %v4015_v58  ;;  %v4029_v13 = vpack.c.bf16 %v426_v62, %v422_v61  ;;  %v4031_v14 = vsub.f32 %v287_v48, %v422_v61  ;;  %v357_v17 = vld [vmem:[#allocation4 + $0x278] sm:$0xff]  ;;  %3043 = vmatpush1.bf16.msra.mxu1 %v4019_v3  ;;  %v4034_v18 = vsub.f32 %v289_v49, %v426_v62  ;;  %v290_v40 = vld [vmem:[#allocation4 + $0x60] sm:$0xff]  ;;  %vm138_vm3 = vcmask 1045509  }
  0x36   :  { %6199 = vst [vmem:[#allocation33_spill] sm:$0xff] %v4019_v3  ;;  %6200 = vst [vmem:[#allocation34_spill] sm:$0xff] %v4021_v5  ;;  %v4036_v19 = vpack.c.bf16 %v1710_v7, %v1706_v63  ;;  %v4038_v25 = vsub.f32 %v351_v50, %v1706_v63  ;;  %v4040_v26 = vsub.f32 %v353_v55, %v1710_v7  ;;  %3427 = vmatpush1.bf16.msra.mxu0 %v4025_v11  ;;  %v292_v49 = vld [vmem:[#allocation4 + $0x70] sm:$0xff]  ;;  %v354_v50 = vld [vmem:[#allocation4 + $0x260] sm:$0xff]  ;;  %vm140_vm4 = vcmask 1047559  }
  0x37   :  { %6201 = vst [vmem:[#allocation35_spill] sm:$0xff] %v4023_v6  ;;  %6202 = vst [vmem:[#allocation36_spill] sm:$0xff] %v4025_v11  ;;  %3045 = vmatprep.subr.bf16.mxu1 %v4029_v13  ;;  %v428_v32 = vand.u32 4294901760, %v288_v1  ;;  %v1708_v34 = vand.u32 4294901760, %v350_v8  ;;  %v1712_v35 = vand.u32 4294901760, %v352_v9  ;;  %v430_v36 = vand.u32 4294901760, %v291_v10 }
  0x38   :  { %6203 = vst [vmem:[#allocation37_spill] sm:$0xff] %v4027_v12  ;;  %6204 = vst [vmem:[#allocation38_spill] sm:$0xff] %v4029_v13  ;;  %3429 = vmatprep.subr.bf16.mxu0 %v4036_v19  ;;  %v434_v37 = vand.u32 4294901760, %v293_v15  ;;  %v1714_v38 = vand.u32 4294901760, %v355_v16  ;;  %v1718_v39 = vand.u32 4294901760, %v357_v17  ;;  %v4047_v42 = vsub.f32 %v286_v0, %v424_v27  ;;  %v356_v55 = vld [vmem:[#allocation4 + $0x270] sm:$0xff] }
  0x39   :  { %6205 = vst [vmem:[#allocation39_spill] sm:$0xff] %v4031_v14  ;;  %6206 = vst [vmem:[#allocation40_spill] sm:$0xff] %v4034_v18  ;;  %v4045_v41 = vpack.c.bf16 %v428_v32, %v424_v27  ;;  %v4049_v43 = vsub.f32 %v288_v1, %v428_v32  ;;  %v4051_v48 = vpack.c.bf16 %v1712_v35, %v1708_v34  ;;  %v295_v62 = vld [vmem:[#allocation4 + $0x88] sm:$0xff]  ;;  %v297_v63 = vld [vmem:[#allocation4 + $0x98] sm:$0xff]  ;;  %v1716_v32 = vand.u32 4294901760, %v354_v50 }
  0x3a   :  { %6207 = vst [vmem:[#allocation41_spill] sm:$0xff] %v4036_v19  ;;  %6208 = vst [vmem:[#allocation42_spill] sm:$0xff] %v4038_v25  ;;  %v4053_v57 = vsub.f32 %v350_v8, %v1708_v34  ;;  %v4055_v59 = vsub.f32 %v352_v9, %v1712_v35  ;;  %v4057_v60 = vpack.c.bf16 %v434_v37, %v430_v36  ;;  %v359_v7 = vld [vmem:[#allocation4 + $0x288] sm:$0xff]  ;;  %v432_v8 = vand.u32 4294901760, %v290_v40  ;;  %v361_v35 = vld [vmem:[#allocation4 + $0x298] sm:$0xff] }
  0x3b   :  { %6209 = vst [vmem:[#allocation43_spill] sm:$0xff] %v4040_v26  ;;  %6210 = vst [vmem:[#allocation44_spill] sm:$0xff] %v4045_v41  ;;  %v4059_v61 = vsub.f32 %v291_v10, %v430_v36  ;;  %3047 = vmatpush1.bf16.msra.mxu1 %v4045_v41  ;;  %3431 = vmatpush1.bf16.msra.mxu0 %v4051_v48  ;;  %v4063_v0 = vsub.f32 %v293_v15, %v434_v37  ;;  %v436_v10 = vand.u32 4294901760, %v292_v49  ;;  %v294_v4 = vld [vmem:[#allocation4 + $0x80] sm:$0xff]  ;;  %v299_v41 = vld [vmem:[#allocation4 + $0xa8] sm:$0xff]  ;;  %vm273_vm5 = vcmask 1041408  }
  0x3c   :  { %6211 = vst [vmem:[#allocation45_spill] sm:$0xff] %v4047_v42  ;;  %6212 = vst [vmem:[#allocation46_spill] sm:$0xff] %v4049_v43  ;;  %v4065_v1 = vpack.c.bf16 %v1718_v39, %v1714_v38  ;;  %v4067_v27 = vsub.f32 %v355_v16, %v1714_v38  ;;  %3049 = vmatprep.subr.bf16.mxu1 %v4057_v60  ;;  %v4070_v9 = vsub.f32 %v357_v17, %v1718_v39  ;;  %v358_v16 = vld [vmem:[#allocation4 + $0x280] sm:$0xff]  ;;  %v301_v11 = vld [vmem:[#allocation4 + $0xb8] sm:$0xff] }
  0x3d   :  { %6213 = vst [vmem:[#allocation47_spill] sm:$0xff] %v4051_v48  ;;  %6214 = vst [vmem:[#allocation48_spill] sm:$0xff] %v4053_v57  ;;  %v1720_v34 = vand.u32 4294901760, %v356_v55  ;;  %v4073_v36 = vsub.f32 %v290_v40, %v432_v8  ;;  %v438_v2 = vand.u32 4294901760, %v295_v62  ;;  %v442_v15 = vand.u32 4294901760, %v297_v63  ;;  %v296_v48 = vld [vmem:[#allocation4 + $0x90] sm:$0xff] }
  0x3e   :  { %6215 = vst [vmem:[#allocation49_spill] sm:$0xff] %v4055_v59  ;;  %6216 = vst [vmem:[#allocation50_spill] sm:$0xff] %v4057_v60  ;;  %3433 = vmatprep.subr.bf16.mxu0 %v4065_v1  ;;  %v1722_v37 = vand.u32 4294901760, %v359_v7  ;;  %v4075_v38 = vpack.c.bf16 %v436_v10, %v432_v8  ;;  %v4077_v19 = vsub.f32 %v292_v49, %v436_v10  ;;  %v360_v60 = vld [vmem:[#allocation4 + $0x290] sm:$0xff]  ;;  %v1726_v49 = vand.u32 4294901760, %v361_v35  ;;  %v363_v44 = vld [vmem:[#allocation4 + $0x2a8] sm:$0xff] }
  0x3f   :  { %6217 = vst [vmem:[#allocation51_spill] sm:$0xff] %v4059_v61  ;;  %6218 = vst [vmem:[#allocation52_spill] sm:$0xff] %v4063_v0  ;;  %v4079_v17 = vpack.c.bf16 %v1720_v34, %v1716_v32  ;;  %v4081_v39 = vsub.f32 %v354_v50, %v1716_v32  ;;  %v4085_v40 = vpack.c.bf16 %v442_v15, %v438_v2  ;;  %v440_v50 = vand.u32 4294901760, %v294_v4  ;;  %v362_v51 = vld [vmem:[#allocation4 + $0x2a0] sm:$0xff] }
  0x40   :  { %6219 = vst [vmem:[#allocation53_spill] sm:$0xff] %v4065_v1  ;;  %6220 = vst [vmem:[#allocation54_spill] sm:$0xff] %v4067_v27  ;;  %v4083_v1 = vsub.f32 %v356_v55, %v1720_v34  ;;  %v4087_v13 = vsub.f32 %v295_v62, %v438_v2  ;;  %v4089_v53 = vsub.f32 %v297_v63, %v442_v15  ;;  %3051 = vmatpush1.bf16.msra.mxu1 %v4075_v38  ;;  %v365_v2 = vld [vmem:[#allocation4 + $0x2b8] sm:$0xff] }
  0x41   :  { %6221 = vst [vmem:[#allocation55_spill] sm:$0xff] %v4070_v9  ;;  %6222 = vst [vmem:[#allocation56_spill] sm:$0xff] %v4073_v36  ;;  %3435 = vmatpush1.bf16.msra.mxu0 %v4079_v17  ;;  %v4093_v8 = vsub.f32 %v359_v7, %v1722_v37  ;;  %v444_v10 = vand.u32 4294901760, %v296_v48  ;;  %3053 = vmatprep.subr.bf16.mxu1 %v4085_v40  ;;  %v1724_v32 = vand.u32 4294901760, %v358_v16  ;;  %v1728_v55 = vand.u32 4294901760, %v360_v60  ;;  %v298_v7 = vld [vmem:[#allocation4 + $0xa0] sm:$0xff] }
  0x42   :  { %6223 = vst [vmem:[#allocation57_spill] sm:$0xff] %v4075_v38  ;;  %6224 = vst [vmem:[#allocation58_spill] sm:$0xff] %v4077_v19  ;;  %v446_v34 = vand.u32 4294901760, %v299_v41  ;;  %v450_v3 = vand.u32 4294901760, %v301_v11  ;;  %v4096_v62 = vpack.c.bf16 %v1726_v49, %v1722_v37  ;;  %v4098_v63 = vsub.f32 %v361_v35, %v1726_v49  ;;  %v300_v38 = vld [vmem:[#allocation4 + $0xb0] sm:$0xff]  ;;  %v303_v37 = vld [vmem:[#allocation4 + $0xc8] sm:$0xff] }
  0x43   :  { %6225 = vst [vmem:[#allocation59_spill] sm:$0xff] %v4079_v17  ;;  %6226 = vst [vmem:[#allocation60_spill] sm:$0xff] %v4081_v39  ;;  %v4100_v15 = vpack.c.bf16 %v444_v10, %v440_v50  ;;  %v4102_v17 = vsub.f32 %v294_v4, %v440_v50  ;;  %v4104_v28 = vsub.f32 %v296_v48, %v444_v10  ;;  %v1730_v48 = vand.u32 4294901760, %v363_v44 }
  0x44   :  { %6227 = vst [vmem:[#allocation61_spill] sm:$0xff] %v4083_v1  ;;  %6228 = vst [vmem:[#allocation62_spill] sm:$0xff] %v4085_v40  ;;  %v4106_v40 = vpack.c.bf16 %v1728_v55, %v1724_v32  ;;  %v4108_v30 = vsub.f32 %v358_v16, %v1724_v32  ;;  %v4110_v21 = vsub.f32 %v360_v60, %v1728_v55  ;;  %3437 = vmatprep.subr.bf16.mxu0 %v4096_v62 }
  0x45   :  { %6229 = vst [vmem:[#allocation63_spill] sm:$0xff] %v4087_v13  ;;  %6230 = vst [vmem:[#allocation64_spill] sm:$0xff] %v4089_v53  ;;  %v305_v53 = vld [vmem:[#allocation4 + $0xd8] sm:$0xff]  ;;  %3055 = vmatpush1.bf16.msra.mxu1 %v4100_v15  ;;  %v4114_v4 = vpack.c.bf16 %v450_v3, %v446_v34  ;;  %v4116_v35 = vsub.f32 %v299_v41, %v446_v34  ;;  %v4118_v49 = vsub.f32 %v301_v11, %v450_v3 }
  0x46   :  { %6231 = vst [vmem:[#allocation65_spill] sm:$0xff] %v4093_v8  ;;  %6232 = vst [vmem:[#allocation66_spill] sm:$0xff] %v4096_v62  ;;  %v364_v8 = vld [vmem:[#allocation4 + $0x2b0] sm:$0xff]  ;;  %3439 = vmatpush1.bf16.msra.mxu0 %v4106_v40  ;;  %v1734_v16 = vand.u32 4294901760, %v365_v2  ;;  %v448_v50 = vand.u32 4294901760, %v298_v7  ;;  %v452_v60 = vand.u32 4294901760, %v300_v38  ;;  %v4122_v32 = vsub.f32 %v363_v44, %v1730_v48 }
  0x47   :  { %6233 = vst [vmem:[#allocation67_spill] sm:$0xff] %v4098_v63  ;;  %6234 = vst [vmem:[#allocation68_spill] sm:$0xff] %v4100_v15  ;;  %v1732_v10 = vand.u32 4294901760, %v362_v51  ;;  %3057 = vmatprep.subr.bf16.mxu1 %v4114_v4  ;;  %v1736_v55 = vand.u32 4294901760, %v364_v8  ;;  %v454_v62 = vand.u32 4294901760, %v303_v37  ;;  %v458_v15 = vand.u32 4294901760, %v305_v53 }
  0x48   :  { %6235 = vst [vmem:[#allocation69_spill] sm:$0xff] %v4102_v17  ;;  %6236 = vst [vmem:[#allocation70_spill] sm:$0xff] %v4104_v28  ;;  %v4124_v41 = vpack.c.bf16 %v1734_v16, %v1730_v48  ;;  %v4126_v3 = vsub.f32 %v365_v2, %v1734_v16  ;;  %v4128_v11 = vpack.c.bf16 %v452_v60, %v448_v50  ;;  %v368_v17 = vld [vmem:[#allocation4 + $0x2d0] sm:$0xff]  ;;  %v307_v48 = vld [vmem:[#allocation4 + $0xe8] sm:$0xff] }
  0x49   :  { %6237 = vst [vmem:[#allocation71_spill] sm:$0xff] %v4106_v40  ;;  %6238 = vst [vmem:[#allocation72_spill] sm:$0xff] %v4108_v30  ;;  %v369_v30 = vld [vmem:[#allocation4 + $0x2d8] sm:$0xff]  ;;  %v4130_v34 = vsub.f32 %v298_v7, %v448_v50  ;;  %v302_v40 = vld [vmem:[#allocation4 + $0xc0] sm:$0xff]  ;;  %v4132_v28 = vsub.f32 %v300_v38, %v452_v60  ;;  %v4134_v44 = vpack.c.bf16 %v1736_v55, %v1732_v10 }
  0x4a   :  { %6239 = vst [vmem:[#allocation73_spill] sm:$0xff] %v4110_v21  ;;  %6240 = vst [vmem:[#allocation74_spill] sm:$0xff] %v4114_v4  ;;  %v367_v21 = vld [vmem:[#allocation4 + $0x2c8] sm:$0xff]  ;;  %v4136_v4 = vsub.f32 %v362_v51, %v1732_v10  ;;  %v309_v63 = vld [vmem:[#allocation4 + $0xf8] sm:$0xff]  ;;  %3441 = vmatprep.subr.bf16.mxu0 %v4124_v41  ;;  %3059 = vmatpush1.bf16.msra.mxu1 %v4128_v11  ;;  %v4142_v2 = vpack.c.bf16 %v458_v15, %v454_v62  ;;  %v1742_v51 = vand.u32 4294901760, %v369_v30 }
  0x4b   :  { %6241 = vst [vmem:[#allocation75_spill] sm:$0xff] %v4116_v35  ;;  %6242 = vst [vmem:[#allocation76_spill] sm:$0xff] %v4118_v49  ;;  %v304_v49 = vld [vmem:[#allocation4 + $0xd0] sm:$0xff]  ;;  %v366_v35 = vld [vmem:[#allocation4 + $0x2c0] sm:$0xff]  ;;  %v4144_v7 = vsub.f32 %v303_v37, %v454_v62  ;;  %v4146_v16 = vsub.f32 %v305_v53, %v458_v15  ;;  %v1738_v38 = vand.u32 4294901760, %v367_v21  ;;  %3443 = vmatpush1.bf16.msra.mxu0 %v4134_v44  ;;  %v456_v50 = vand.u32 4294901760, %v302_v40 }
  0x4c   :  { %6243 = vst [vmem:[#allocation77_spill] sm:$0xff] %v4122_v32  ;;  %6244 = vst [vmem:[#allocation78_spill] sm:$0xff] %v4124_v41  ;;  %v4138_v32 = vsub.f32 %v364_v8, %v1736_v55  ;;  %v460_v8 = vand.u32 4294901760, %v304_v49  ;;  %v1740_v60 = vand.u32 4294901760, %v366_v35  ;;  %3061 = vmatprep.subr.bf16.mxu1 %v4142_v2  ;;  %v1744_v55 = vand.u32 4294901760, %v368_v17 }
  0x4d   :  { %6245 = vst [vmem:[#allocation79_spill] sm:$0xff] %v4126_v3  ;;  %6246 = vst [vmem:[#allocation80_spill] sm:$0xff] %v4128_v11  ;;  %v4150_v10 = vsub.f32 %v367_v21, %v1738_v38  ;;  %v462_v41 = vand.u32 4294901760, %v307_v48  ;;  %v466_v11 = vand.u32 4294901760, %v309_v63  ;;  %v4152_v62 = vpack.c.bf16 %v1742_v51, %v1738_v38  ;;  %v311_v38 = vld [vmem:[#allocation4 + $0x108] sm:$0xff]  ;;  %v313_v3 = vld [vmem:[#allocation4 + $0x118] sm:$0xff] }
  0x4e   :  { %6247 = vst [vmem:[#allocation81_spill] sm:$0xff] %v4130_v34  ;;  %6248 = vst [vmem:[#allocation82_spill] sm:$0xff] %v4132_v28  ;;  %v4154_v53 = vsub.f32 %v369_v30, %v1742_v51  ;;  %v4156_v15 = vpack.c.bf16 %v460_v8, %v456_v50  ;;  %v4158_v37 = vsub.f32 %v302_v40, %v456_v50  ;;  %v372_v34 = vld [vmem:[#allocation4 + $0x2f0] sm:$0xff] }
  0x4f   :  { %6249 = vst [vmem:[#allocation83_spill] sm:$0xff] %v4134_v44  ;;  %6250 = vst [vmem:[#allocation84_spill] sm:$0xff] %v4136_v4  ;;  %v373_v4 = vld [vmem:[#allocation4 + $0x2f8] sm:$0xff]  ;;  %v306_v44 = vld [vmem:[#allocation4 + $0xe0] sm:$0xff]  ;;  %v4160_v28 = vsub.f32 %v304_v49, %v460_v8  ;;  %v4162_v21 = vpack.c.bf16 %v1744_v55, %v1740_v60  ;;  %3445 = vmatprep.subr.bf16.mxu0 %v4152_v62  ;;  %v4170_v30 = vpack.c.bf16 %v466_v11, %v462_v41 }
  0x50   :  { %6251 = vst [vmem:[#allocation85_spill] sm:$0xff] %v4138_v32  ;;  %6252 = vst [vmem:[#allocation86_spill] sm:$0xff] %v4142_v2  ;;  %v371_v32 = vld [vmem:[#allocation4 + $0x2e8] sm:$0xff]  ;;  %v4164_v2 = vsub.f32 %v366_v35, %v1740_v60  ;;  %3063 = vmatpush1.bf16.msra.mxu1 %v4156_v15  ;;  %v4172_v40 = vsub.f32 %v307_v48, %v462_v41  ;;  %v4174_v51 = vsub.f32 %v309_v63, %v466_v11 }
  0x51   :  { %6253 = vst [vmem:[#allocation87_spill] sm:$0xff] %v4144_v7  ;;  %6254 = vst [vmem:[#allocation88_spill] sm:$0xff] %v4146_v16  ;;  %v308_v16 = vld [vmem:[#allocation4 + $0xf0] sm:$0xff]  ;;  %v370_v7 = vld [vmem:[#allocation4 + $0x2e0] sm:$0xff]  ;;  %v1746_v49 = vand.u32 4294901760, %v371_v32  ;;  %3447 = vmatpush1.bf16.msra.mxu0 %v4162_v21  ;;  %v1750_v35 = vand.u32 4294901760, %v373_v4  ;;  %3065 = vmatprep.subr.bf16.mxu1 %v4170_v30 }
  0x52   :  { %6255 = vst [vmem:[#allocation89_spill] sm:$0xff] %v4150_v10  ;;  %6256 = vst [vmem:[#allocation90_spill] sm:$0xff] %v4152_v62  ;;  %v4166_v10 = vsub.f32 %v368_v17, %v1744_v55  ;;  %v464_v50 = vand.u32 4294901760, %v306_v44  ;;  %v468_v17 = vand.u32 4294901760, %v308_v16  ;;  %v1748_v8 = vand.u32 4294901760, %v370_v7 }
  0x53   :  { %6257 = vst [vmem:[#allocation91_spill] sm:$0xff] %v4154_v53  ;;  %6258 = vst [vmem:[#allocation92_spill] sm:$0xff] %v4156_v15  ;;  %v4178_v60 = vsub.f32 %v371_v32, %v1746_v49  ;;  %v1752_v55 = vand.u32 4294901760, %v372_v34  ;;  %v470_v62 = vand.u32 4294901760, %v311_v38  ;;  %v474_v15 = vand.u32 4294901760, %v313_v3  ;;  %v317_v53 = vld [vmem:[#allocation4 + $0x138] sm:$0xff] }
  0x54   :  { %6259 = vst [vmem:[#allocation93_spill] sm:$0xff] %v4158_v37  ;;  %6260 = vst [vmem:[#allocation94_spill] sm:$0xff] %v4160_v28  ;;  %v4180_v41 = vpack.c.bf16 %v1750_v35, %v1746_v49  ;;  %v4182_v63 = vsub.f32 %v373_v4, %v1750_v35  ;;  %v4184_v11 = vpack.c.bf16 %v468_v17, %v464_v50  ;;  %v376_v37 = vld [vmem:[#allocation4 + $0x310] sm:$0xff]  ;;  %v315_v49 = vld [vmem:[#allocation4 + $0x128] sm:$0xff] }
  0x55   :  { %6261 = vst [vmem:[#allocation95_spill] sm:$0xff] %v4162_v21  ;;  %6262 = vst [vmem:[#allocation96_spill] sm:$0xff] %v4164_v2  ;;  %v377_v2 = vld [vmem:[#allocation4 + $0x318] sm:$0xff]  ;;  %v4186_v48 = vsub.f32 %v306_v44, %v464_v50  ;;  %v310_v21 = vld [vmem:[#allocation4 + $0x100] sm:$0xff]  ;;  %v4188_v28 = vsub.f32 %v308_v16, %v468_v17  ;;  %v4190_v32 = vpack.c.bf16 %v1752_v55, %v1748_v8 }
  0x56   :  { %6263 = vst [vmem:[#allocation97_spill] sm:$0xff] %v4166_v10  ;;  %6264 = vst [vmem:[#allocation98_spill] sm:$0xff] %v4170_v30  ;;  %v375_v10 = vld [vmem:[#allocation4 + $0x308] sm:$0xff]  ;;  %v4192_v30 = vsub.f32 %v370_v7, %v1748_v8  ;;  %3449 = vmatprep.subr.bf16.mxu0 %v4180_v41  ;;  %3067 = vmatpush1.bf16.msra.mxu1 %v4184_v11  ;;  %v4198_v4 = vpack.c.bf16 %v474_v15, %v470_v62  ;;  %v1758_v7 = vand.u32 4294901760, %v377_v2 }
  0x57   :  { %6265 = vst [vmem:[#allocation99_spill] sm:$0xff] %v4172_v40  ;;  %6266 = vst [vmem:[#allocation100_spill] sm:$0xff] %v4174_v51  ;;  %v312_v51 = vld [vmem:[#allocation4 + $0x110] sm:$0xff]  ;;  %v374_v40 = vld [vmem:[#allocation4 + $0x300] sm:$0xff]  ;;  %v4200_v44 = vsub.f32 %v311_v38, %v470_v62  ;;  %v4202_v35 = vsub.f32 %v313_v3, %v474_v15  ;;  %v1754_v16 = vand.u32 4294901760, %v375_v10  ;;  %3451 = vmatpush1.bf16.msra.mxu0 %v4190_v32  ;;  %v472_v50 = vand.u32 4294901760, %v310_v21 }
  0x58   :  { %6267 = vst [vmem:[#allocation101_spill] sm:$0xff] %v4178_v60  ;;  %6268 = vst [vmem:[#allocation102_spill] sm:$0xff] %v4180_v41  ;;  %v4194_v60 = vsub.f32 %v372_v34, %v1752_v55  ;;  %v476_v34 = vand.u32 4294901760, %v312_v51  ;;  %v1756_v17 = vand.u32 4294901760, %v374_v40  ;;  %3069 = vmatprep.subr.bf16.mxu1 %v4198_v4  ;;  %v1760_v55 = vand.u32 4294901760, %v376_v37 }
  0x59   :  { %6269 = vst [vmem:[#allocation103_spill] sm:$0xff] %v4182_v63  ;;  %6270 = vst [vmem:[#allocation104_spill] sm:$0xff] %v4184_v11  ;;  %v4206_v8 = vsub.f32 %v375_v10, %v1754_v16  ;;  %v478_v41 = vand.u32 4294901760, %v315_v49  ;;  %v482_v11 = vand.u32 4294901760, %v317_v53  ;;  %v4208_v62 = vpack.c.bf16 %v1758_v7, %v1754_v16  ;;  %v319_v16 = vld [vmem:[#allocation4 + $0x148] sm:$0xff]  ;;  %v321_v63 = vld [vmem:[#allocation4 + $0x158] sm:$0xff] }
  0x5a   :  { %6271 = vst [vmem:[#allocation105_spill] sm:$0xff] %v4186_v48  ;;  %6272 = vst [vmem:[#allocation106_spill] sm:$0xff] %v4188_v28  ;;  %v4210_v3 = vsub.f32 %v377_v2, %v1758_v7  ;;  %v4212_v15 = vpack.c.bf16 %v476_v34, %v472_v50  ;;  %v4214_v38 = vsub.f32 %v310_v21, %v472_v50  ;;  %v380_v48 = vld [vmem:[#allocation4 + $0x330] sm:$0xff] }
  0x5b   :  { %6273 = vst [vmem:[#allocation107_spill] sm:$0xff] %v4190_v32  ;;  %6274 = vst [vmem:[#allocation108_spill] sm:$0xff] %v4192_v30  ;;  %v381_v30 = vld [vmem:[#allocation4 + $0x338] sm:$0xff]  ;;  %v314_v32 = vld [vmem:[#allocation4 + $0x120] sm:$0xff]  ;;  %v4216_v28 = vsub.f32 %v312_v51, %v476_v34  ;;  %v4218_v10 = vpack.c.bf16 %v1760_v55, %v1756_v17  ;;  %3453 = vmatprep.subr.bf16.mxu0 %v4208_v62  ;;  %v4226_v2 = vpack.c.bf16 %v482_v11, %v478_v41 }
  0x5c   :  { %6275 = vst [vmem:[#allocation109_spill] sm:$0xff] %v4194_v60  ;;  %6276 = vst [vmem:[#allocation110_spill] sm:$0xff] %v4198_v4  ;;  %v379_v60 = vld [vmem:[#allocation4 + $0x328] sm:$0xff]  ;;  %v4220_v4 = vsub.f32 %v374_v40, %v1756_v17  ;;  %3071 = vmatpush1.bf16.msra.mxu1 %v4212_v15  ;;  %v4228_v21 = vsub.f32 %v315_v49, %v478_v41  ;;  %v4230_v7 = vsub.f32 %v317_v53, %v482_v11 }
  0x5d   :  { %6277 = vst [vmem:[#allocation111_spill] sm:$0xff] %v4200_v44  ;;  %6278 = vst [vmem:[#allocation112_spill] sm:$0xff] %v4202_v35  ;;  %v316_v35 = vld [vmem:[#allocation4 + $0x130] sm:$0xff]  ;;  %v378_v44 = vld [vmem:[#allocation4 + $0x320] sm:$0xff]  ;;  %v1762_v51 = vand.u32 4294901760, %v379_v60  ;;  %3455 = vmatpush1.bf16.msra.mxu0 %v4218_v10  ;;  %v1766_v40 = vand.u32 4294901760, %v381_v30  ;;  %3073 = vmatprep.subr.bf16.mxu1 %v4226_v2 }
  0x5e   :  { %6279 = vst [vmem:[#allocation113_spill] sm:$0xff] %v4206_v8  ;;  %6280 = vst [vmem:[#allocation114_spill] sm:$0xff] %v4208_v62  ;;  %v4222_v8 = vsub.f32 %v376_v37, %v1760_v55  ;;  %v480_v50 = vand.u32 4294901760, %v314_v32  ;;  %v484_v37 = vand.u32 4294901760, %v316_v35  ;;  %v1764_v34 = vand.u32 4294901760, %v378_v44 }
  0x5f   :  { %6281 = vst [vmem:[#allocation115_spill] sm:$0xff] %v4210_v3  ;;  %6282 = vst [vmem:[#allocation116_spill] sm:$0xff] %v4212_v15  ;;  %v4234_v17 = vsub.f32 %v379_v60, %v1762_v51  ;;  %v1768_v55 = vand.u32 4294901760, %v380_v48  ;;  %v486_v62 = vand.u32 4294901760, %v319_v16  ;;  %v490_v15 = vand.u32 4294901760, %v321_v63  ;;  %v325_v3 = vld [vmem:[#allocation4 + $0x178] sm:$0xff] }
  0x60   :  { %6283 = vst [vmem:[#allocation117_spill] sm:$0xff] %v4214_v38  ;;  %6284 = vst [vmem:[#allocation118_spill] sm:$0xff] %v4216_v28  ;;  %v4236_v41 = vpack.c.bf16 %v1766_v40, %v1762_v51  ;;  %v4238_v53 = vsub.f32 %v381_v30, %v1766_v40  ;;  %v4240_v11 = vpack.c.bf16 %v484_v37, %v480_v50  ;;  %v384_v38 = vld [vmem:[#allocation4 + $0x350] sm:$0xff]  ;;  %v323_v51 = vld [vmem:[#allocation4 + $0x168] sm:$0xff] }
  0x61   :  { %6285 = vst [vmem:[#allocation119_spill] sm:$0xff] %v4218_v10  ;;  %6286 = vst [vmem:[#allocation120_spill] sm:$0xff] %v4220_v4  ;;  %v385_v4 = vld [vmem:[#allocation4 + $0x358] sm:$0xff]  ;;  %v4242_v49 = vsub.f32 %v314_v32, %v480_v50  ;;  %v318_v10 = vld [vmem:[#allocation4 + $0x140] sm:$0xff]  ;;  %v4244_v28 = vsub.f32 %v316_v35, %v484_v37  ;;  %v4246_v60 = vpack.c.bf16 %v1768_v55, %v1764_v34 }
  0x62   :  { %6287 = vst [vmem:[#allocation121_spill] sm:$0xff] %v4222_v8  ;;  %6288 = vst [vmem:[#allocation122_spill] sm:$0xff] %v4226_v2  ;;  %v383_v8 = vld [vmem:[#allocation4 + $0x348] sm:$0xff]  ;;  %v4248_v2 = vsub.f32 %v378_v44, %v1764_v34  ;;  %3457 = vmatprep.subr.bf16.mxu0 %v4236_v41  ;;  %3075 = vmatpush1.bf16.msra.mxu1 %v4240_v11  ;;  %v4254_v30 = vpack.c.bf16 %v490_v15, %v486_v62  ;;  %v1774_v44 = vand.u32 4294901760, %v385_v4 }
  0x63   :  { %6289 = vst [vmem:[#allocation123_spill] sm:$0xff] %v4228_v21  ;;  %6290 = vst [vmem:[#allocation124_spill] sm:$0xff] %v4230_v7  ;;  %v320_v7 = vld [vmem:[#allocation4 + $0x150] sm:$0xff]  ;;  %v382_v21 = vld [vmem:[#allocation4 + $0x340] sm:$0xff]  ;;  %v4256_v32 = vsub.f32 %v319_v16, %v486_v62  ;;  %v4258_v40 = vsub.f32 %v321_v63, %v490_v15  ;;  %v1770_v35 = vand.u32 4294901760, %v383_v8  ;;  %3459 = vmatpush1.bf16.msra.mxu0 %v4246_v60  ;;  %v488_v50 = vand.u32 4294901760, %v318_v10 }
  0x64   :  { %6291 = vst [vmem:[#allocation125_spill] sm:$0xff] %v4234_v17  ;;  %6292 = vst [vmem:[#allocation126_spill] sm:$0xff] %v4236_v41  ;;  %v4250_v17 = vsub.f32 %v380_v48, %v1768_v55  ;;  %v492_v48 = vand.u32 4294901760, %v320_v7  ;;  %v1772_v37 = vand.u32 4294901760, %v382_v21  ;;  %3077 = vmatprep.subr.bf16.mxu1 %v4254_v30  ;;  %v1776_v55 = vand.u32 4294901760, %v384_v38 }
  0x65   :  { %6293 = vst [vmem:[#allocation127_spill] sm:$0xff] %v4238_v53  ;;  %6294 = vst [vmem:[#allocation128_spill] sm:$0xff] %v4240_v11  ;;  %v4262_v34 = vsub.f32 %v383_v8, %v1770_v35  ;;  %v494_v41 = vand.u32 4294901760, %v323_v51  ;;  %v498_v11 = vand.u32 4294901760, %v325_v3  ;;  %v4264_v62 = vpack.c.bf16 %v1774_v44, %v1770_v35  ;;  %v327_v35 = vld [vmem:[#allocation4 + $0x188] sm:$0xff]  ;;  %v329_v53 = vld [vmem:[#allocation4 + $0x198] sm:$0xff] }
  0x66   :  { %6295 = vst [vmem:[#allocation129_spill] sm:$0xff] %v4242_v49  ;;  %6296 = vst [vmem:[#allocation130_spill] sm:$0xff] %v4244_v28  ;;  %v4266_v63 = vsub.f32 %v385_v4, %v1774_v44  ;;  %v4268_v15 = vpack.c.bf16 %v492_v48, %v488_v50  ;;  %v4270_v16 = vsub.f32 %v318_v10, %v488_v50  ;;  %v388_v49 = vld [vmem:[#allocation4 + $0x370] sm:$0xff] }
  0x67   :  { %6297 = vst [vmem:[#allocation131_spill] sm:$0xff] %v4246_v60  ;;  %6298 = vst [vmem:[#allocation132_spill] sm:$0xff] %v4248_v2  ;;  %v389_v2 = vld [vmem:[#allocation4 + $0x378] sm:$0xff]  ;;  %v322_v60 = vld [vmem:[#allocation4 + $0x160] sm:$0xff]  ;;  %v4272_v28 = vsub.f32 %v320_v7, %v492_v48  ;;  %v4274_v8 = vpack.c.bf16 %v1776_v55, %v1772_v37  ;;  %3461 = vmatprep.subr.bf16.mxu0 %v4264_v62  ;;  %v4282_v4 = vpack.c.bf16 %v498_v11, %v494_v41 }
  0x68   :  { %6299 = vst [vmem:[#allocation133_spill] sm:$0xff] %v4250_v17  ;;  %6300 = vst [vmem:[#allocation134_spill] sm:$0xff] %v4254_v30  ;;  %v387_v17 = vld [vmem:[#allocation4 + $0x368] sm:$0xff]  ;;  %v4276_v30 = vsub.f32 %v382_v21, %v1772_v37  ;;  %3079 = vmatpush1.bf16.msra.mxu1 %v4268_v15  ;;  %v4284_v10 = vsub.f32 %v323_v51, %v494_v41  ;;  %v4286_v44 = vsub.f32 %v325_v3, %v498_v11 }
  0x69   :  { %6301 = vst [vmem:[#allocation135_spill] sm:$0xff] %v4256_v32  ;;  %6302 = vst [vmem:[#allocation136_spill] sm:$0xff] %v4258_v40  ;;  %v324_v40 = vld [vmem:[#allocation4 + $0x170] sm:$0xff]  ;;  %v386_v32 = vld [vmem:[#allocation4 + $0x360] sm:$0xff]  ;;  %v1778_v7 = vand.u32 4294901760, %v387_v17  ;;  %3463 = vmatpush1.bf16.msra.mxu0 %v4274_v8  ;;  %v1782_v21 = vand.u32 4294901760, %v389_v2  ;;  %3081 = vmatprep.subr.bf16.mxu1 %v4282_v4 }
  0x6a   :  { %6303 = vst [vmem:[#allocation137_spill] sm:$0xff] %v4262_v34  ;;  %6304 = vst [vmem:[#allocation138_spill] sm:$0xff] %v4264_v62  ;;  %v4278_v34 = vsub.f32 %v384_v38, %v1776_v55  ;;  %v496_v50 = vand.u32 4294901760, %v322_v60  ;;  %v500_v38 = vand.u32 4294901760, %v324_v40  ;;  %v1780_v48 = vand.u32 4294901760, %v386_v32 }
  0x6b   :  { %6305 = vst [vmem:[#allocation139_spill] sm:$0xff] %v4266_v63  ;;  %6306 = vst [vmem:[#allocation140_spill] sm:$0xff] %v4268_v15  ;;  %v4290_v37 = vsub.f32 %v387_v17, %v1778_v7  ;;  %v1784_v55 = vand.u32 4294901760, %v388_v49  ;;  %v502_v62 = vand.u32 4294901760, %v327_v35  ;;  %v506_v15 = vand.u32 4294901760, %v329_v53  ;;  %v333_v63 = vld [vmem:[#allocation4 + $0x1b8] sm:$0xff] }
  0x6c   :  { %6307 = vst [vmem:[#allocation141_spill] sm:$0xff] %v4270_v16  ;;  %6308 = vst [vmem:[#allocation142_spill] sm:$0xff] %v4272_v28  ;;  %v4292_v41 = vpack.c.bf16 %v1782_v21, %v1778_v7  ;;  %v4294_v3 = vsub.f32 %v389_v2, %v1782_v21  ;;  %v4296_v11 = vpack.c.bf16 %v500_v38, %v496_v50  ;;  %v392_v16 = vld [vmem:[#allocation4 + $0x390] sm:$0xff]  ;;  %v331_v7 = vld [vmem:[#allocation4 + $0x1a8] sm:$0xff] }
  0x6d   :  { %6309 = vst [vmem:[#allocation143_spill] sm:$0xff] %v4274_v8  ;;  %6310 = vst [vmem:[#allocation144_spill] sm:$0xff] %v4276_v30  ;;  %v393_v30 = vld [vmem:[#allocation4 + $0x398] sm:$0xff]  ;;  %v4298_v51 = vsub.f32 %v322_v60, %v496_v50  ;;  %v326_v8 = vld [vmem:[#allocation4 + $0x180] sm:$0xff]  ;;  %v4300_v28 = vsub.f32 %v324_v40, %v500_v38  ;;  %v4302_v17 = vpack.c.bf16 %v1784_v55, %v1780_v48 }
  0x6e   :  { %6311 = vst [vmem:[#allocation145_spill] sm:$0xff] %v4278_v34  ;;  %6312 = vst [vmem:[#allocation146_spill] sm:$0xff] %v4282_v4  ;;  %v391_v34 = vld [vmem:[#allocation4 + $0x388] sm:$0xff]  ;;  %v4304_v4 = vsub.f32 %v386_v32, %v1780_v48  ;;  %3465 = vmatprep.subr.bf16.mxu0 %v4292_v41  ;;  %3083 = vmatpush1.bf16.msra.mxu1 %v4296_v11  ;;  %v4310_v2 = vpack.c.bf16 %v506_v15, %v502_v62  ;;  %v1790_v32 = vand.u32 4294901760, %v393_v30 }
  0x6f   :  { %6313 = vst [vmem:[#allocation147_spill] sm:$0xff] %v4284_v10  ;;  %6314 = vst [vmem:[#allocation148_spill] sm:$0xff] %v4286_v44  ;;  %v328_v44 = vld [vmem:[#allocation4 + $0x190] sm:$0xff]  ;;  %v390_v10 = vld [vmem:[#allocation4 + $0x380] sm:$0xff]  ;;  %v4312_v60 = vsub.f32 %v327_v35, %v502_v62  ;;  %v4314_v21 = vsub.f32 %v329_v53, %v506_v15  ;;  %v1786_v40 = vand.u32 4294901760, %v391_v34  ;;  %3467 = vmatpush1.bf16.msra.mxu0 %v4302_v17  ;;  %v504_v50 = vand.u32 4294901760, %v326_v8 }
  0x70   :  { %6315 = vst [vmem:[#allocation149_spill] sm:$0xff] %v4290_v37  ;;  %6316 = vst [vmem:[#allocation150_spill] sm:$0xff] %v4292_v41  ;;  %v4306_v37 = vsub.f32 %v388_v49, %v1784_v55  ;;  %v508_v49 = vand.u32 4294901760, %v328_v44  ;;  %v1788_v38 = vand.u32 4294901760, %v390_v10  ;;  %3085 = vmatprep.subr.bf16.mxu1 %v4310_v2  ;;  %v1792_v55 = vand.u32 4294901760, %v392_v16 }
  0x71   :  { %6317 = vst [vmem:[#allocation151_spill] sm:$0xff] %v4294_v3  ;;  %6318 = vst [vmem:[#allocation152_spill] sm:$0xff] %v4296_v11  ;;  %v4318_v48 = vsub.f32 %v391_v34, %v1786_v40  ;;  %v510_v41 = vand.u32 4294901760, %v331_v7  ;;  %v514_v11 = vand.u32 4294901760, %v333_v63  ;;  %v4320_v62 = vpack.c.bf16 %v1790_v32, %v1786_v40  ;;  %v335_v40 = vld [vmem:[#allocation4 + $0x1c8] sm:$0xff]  ;;  %v337_v3 = vld [vmem:[#allocation4 + $0x1d8] sm:$0xff] }
  0x72   :  { %6319 = vst [vmem:[#allocation153_spill] sm:$0xff] %v4298_v51  ;;  %6320 = vst [vmem:[#allocation154_spill] sm:$0xff] %v4300_v28  ;;  %v4322_v53 = vsub.f32 %v393_v30, %v1790_v32  ;;  %v4324_v15 = vpack.c.bf16 %v508_v49, %v504_v50  ;;  %v4326_v35 = vsub.f32 %v326_v8, %v504_v50  ;;  %v396_v51 = vld [vmem:[#allocation4 + $0x3b0] sm:$0xff] }
  0x73   :  { %6321 = vst [vmem:[#allocation155_spill] sm:$0xff] %v4302_v17  ;;  %6322 = vst [vmem:[#allocation156_spill] sm:$0xff] %v4304_v4  ;;  %v397_v4 = vld [vmem:[#allocation4 + $0x3b8] sm:$0xff]  ;;  %v330_v17 = vld [vmem:[#allocation4 + $0x1a0] sm:$0xff]  ;;  %v4328_v28 = vsub.f32 %v328_v44, %v508_v49  ;;  %v4330_v34 = vpack.c.bf16 %v1792_v55, %v1788_v38  ;;  %3469 = vmatprep.subr.bf16.mxu0 %v4320_v62  ;;  %v4338_v30 = vpack.c.bf16 %v514_v11, %v510_v41 }
  0x74   :  { %6323 = vst [vmem:[#allocation157_spill] sm:$0xff] %v4306_v37  ;;  %6324 = vst [vmem:[#allocation158_spill] sm:$0xff] %v4310_v2  ;;  %v395_v37 = vld [vmem:[#allocation4 + $0x3a8] sm:$0xff]  ;;  %v4332_v2 = vsub.f32 %v390_v10, %v1788_v38  ;;  %3087 = vmatpush1.bf16.msra.mxu1 %v4324_v15  ;;  %v4340_v8 = vsub.f32 %v331_v7, %v510_v41  ;;  %v4342_v32 = vsub.f32 %v333_v63, %v514_v11 }
  0x75   :  { %6325 = vst [vmem:[#allocation159_spill] sm:$0xff] %v4312_v60  ;;  %6326 = vst [vmem:[#allocation160_spill] sm:$0xff] %v4314_v21  ;;  %v332_v21 = vld [vmem:[#allocation4 + $0x1b0] sm:$0xff]  ;;  %v394_v60 = vld [vmem:[#allocation4 + $0x3a0] sm:$0xff]  ;;  %v1794_v44 = vand.u32 4294901760, %v395_v37  ;;  %3471 = vmatpush1.bf16.msra.mxu0 %v4330_v34  ;;  %v1798_v10 = vand.u32 4294901760, %v397_v4  ;;  %3089 = vmatprep.subr.bf16.mxu1 %v4338_v30 }
  0x76   :  { %6327 = vst [vmem:[#allocation161_spill] sm:$0xff] %v4318_v48  ;;  %6328 = vst [vmem:[#allocation162_spill] sm:$0xff] %v4320_v62  ;;  %v4334_v48 = vsub.f32 %v392_v16, %v1792_v55  ;;  %v512_v50 = vand.u32 4294901760, %v330_v17  ;;  %v516_v16 = vand.u32 4294901760, %v332_v21  ;;  %v1796_v49 = vand.u32 4294901760, %v394_v60 }
  0x77   :  { %6329 = vst [vmem:[#allocation163_spill] sm:$0xff] %v4322_v53  ;;  %6330 = vst [vmem:[#allocation164_spill] sm:$0xff] %v4324_v15  ;;  %v4346_v38 = vsub.f32 %v395_v37, %v1794_v44  ;;  %v1800_v55 = vand.u32 4294901760, %v396_v51  ;;  %v518_v62 = vand.u32 4294901760, %v335_v40  ;;  %v522_v15 = vand.u32 4294901760, %v337_v3  ;;  %v341_v53 = vld [vmem:[#allocation4 + $0x1f8] sm:$0xff] }
  0x78   :  { %6331 = vst [vmem:[#allocation165_spill] sm:$0xff] %v4326_v35  ;;  %6332 = vst [vmem:[#allocation166_spill] sm:$0xff] %v4328_v28  ;;  %v4348_v41 = vpack.c.bf16 %v1798_v10, %v1794_v44  ;;  %v4350_v63 = vsub.f32 %v397_v4, %v1798_v10  ;;  %v4352_v11 = vpack.c.bf16 %v516_v16, %v512_v50  ;;  %v400_v35 = vld [vmem:[#allocation4 + $0x3d0] sm:$0xff]  ;;  %v339_v44 = vld [vmem:[#allocation4 + $0x1e8] sm:$0xff] }
  0x79   :  { %6333 = vst [vmem:[#allocation167_spill] sm:$0xff] %v4330_v34  ;;  %6334 = vst [vmem:[#allocation168_spill] sm:$0xff] %v4332_v2  ;;  %v401_v2 = vld [vmem:[#allocation4 + $0x3d8] sm:$0xff]  ;;  %v4354_v7 = vsub.f32 %v330_v17, %v512_v50  ;;  %v334_v34 = vld [vmem:[#allocation4 + $0x1c0] sm:$0xff]  ;;  %v4356_v28 = vsub.f32 %v332_v21, %v516_v16  ;;  %v4358_v37 = vpack.c.bf16 %v1800_v55, %v1796_v49 }
  0x7a   :  { %6335 = vst [vmem:[#allocation169_spill] sm:$0xff] %v4334_v48  ;;  %6336 = vst [vmem:[#allocation170_spill] sm:$0xff] %v4338_v30  ;;  %v399_v48 = vld [vmem:[#allocation4 + $0x3c8] sm:$0xff]  ;;  %v4360_v30 = vsub.f32 %v394_v60, %v1796_v49  ;;  %3473 = vmatprep.subr.bf16.mxu0 %v4348_v41  ;;  %3091 = vmatpush1.bf16.msra.mxu1 %v4352_v11  ;;  %v4366_v4 = vpack.c.bf16 %v522_v15, %v518_v62  ;;  %v1806_v60 = vand.u32 4294901760, %v401_v2 }
  0x7b   :  { %6337 = vst [vmem:[#allocation171_spill] sm:$0xff] %v4340_v8  ;;  %6338 = vst [vmem:[#allocation172_spill] sm:$0xff] %v4342_v32  ;;  %v336_v32 = vld [vmem:[#allocation4 + $0x1d0] sm:$0xff]  ;;  %v398_v8 = vld [vmem:[#allocation4 + $0x3c0] sm:$0xff]  ;;  %v4368_v17 = vsub.f32 %v335_v40, %v518_v62  ;;  %v4370_v21 = vsub.f32 %v337_v3, %v522_v15  ;;  %v1802_v10 = vand.u32 4294901760, %v399_v48  ;;  %3475 = vmatpush1.bf16.msra.mxu0 %v4358_v37 }
  0x7c   :  { %6339 = vst [vmem:[#allocation173_spill] sm:$0xff] %v4346_v38  ;;  %6340 = vst [vmem:[#allocation174_spill] sm:$0xff] %v4348_v41  ;;  %v4362_v38 = vsub.f32 %v396_v51, %v1800_v55  ;;  %v520_v51 = vand.u32 4294901760, %v334_v34  ;;  %v524_v50 = vand.u32 4294901760, %v336_v32  ;;  %v1804_v16 = vand.u32 4294901760, %v398_v8  ;;  %3093 = vmatprep.subr.bf16.mxu1 %v4366_v4 }
  0x7d   :  { %6341 = vst [vmem:[#allocation175_spill] sm:$0xff] %v4350_v63  ;;  %6342 = vst [vmem:[#allocation176_spill] sm:$0xff] %v4352_v11  ;;  %v4374_v49 = vsub.f32 %v399_v48, %v1802_v10  ;;  %v1808_v55 = vand.u32 4294901760, %v400_v35  ;;  %v526_v41 = vand.u32 4294901760, %v339_v44  ;;  %v530_v11 = vand.u32 4294901760, %v341_v53  ;;  %v41_v63 = vld [vmem:[#allocation7 + $0x8] sm:$0xff] }
  0x7e   :  { %6343 = vst [vmem:[#allocation177_spill] sm:$0xff] %v4354_v7  ;;  %6344 = vst [vmem:[#allocation178_spill] sm:$0xff] %v4356_v28  ;;  %v4376_v62 = vpack.c.bf16 %v1806_v60, %v1802_v10  ;;  %v4378_v3 = vsub.f32 %v401_v2, %v1806_v60  ;;  %v4380_v15 = vpack.c.bf16 %v524_v50, %v520_v51  ;;  %v404_v7 = vld [vmem:[#allocation4 + $0x3f0] sm:$0xff]  ;;  %v40_v10 = vld [vmem:[#allocation7] sm:$0xff] }
  0x7f   :  { %6345 = vst [vmem:[#allocation179_spill] sm:$0xff] %v4358_v37  ;;  %6346 = vst [vmem:[#allocation180_spill] sm:$0xff] %v4360_v30  ;;  %v405_v30 = vld [vmem:[#allocation4 + $0x3f8] sm:$0xff]  ;;  %v4382_v40 = vsub.f32 %v334_v34, %v520_v51  ;;  %v338_v37 = vld [vmem:[#allocation4 + $0x1e0] sm:$0xff]  ;;  %v4384_v28 = vsub.f32 %v336_v32, %v524_v50  ;;  %v4386_v48 = vpack.c.bf16 %v1808_v55, %v1804_v16 }
  0x80   :  { %6347 = vst [vmem:[#allocation181_spill] sm:$0xff] %v4362_v38  ;;  %6348 = vst [vmem:[#allocation182_spill] sm:$0xff] %v4366_v4  ;;  %v403_v38 = vld [vmem:[#allocation4 + $0x3e8] sm:$0xff]  ;;  %v4388_v4 = vsub.f32 %v398_v8, %v1804_v16  ;;  %3477 = vmatprep.subr.bf16.mxu0 %v4376_v62  ;;  %3095 = vmatpush1.bf16.msra.mxu1 %v4380_v15  ;;  %v4394_v2 = vpack.c.bf16 %v530_v11, %v526_v41  ;;  %v1814_v8 = vand.u32 4294901760, %v405_v30 }
  0x81   :  { %6349 = vst [vmem:[#allocation183_spill] sm:$0xff] %v4368_v17  ;;  %6350 = vst [vmem:[#allocation184_spill] sm:$0xff] %v4370_v21  ;;  %v340_v21 = vld [vmem:[#allocation4 + $0x1f0] sm:$0xff]  ;;  %v402_v17 = vld [vmem:[#allocation4 + $0x3e0] sm:$0xff]  ;;  %v4396_v34 = vsub.f32 %v339_v44, %v526_v41  ;;  %v4398_v60 = vsub.f32 %v341_v53, %v530_v11  ;;  %v1810_v32 = vand.u32 4294901760, %v403_v38  ;;  %3479 = vmatpush1.bf16.msra.mxu0 %v4386_v48  ;;  %v528_v51 = vand.u32 4294901760, %v338_v37 }
  0x82   :  { %6351 = vst [vmem:[#allocation185_spill] sm:$0xff] %v4374_v49  ;;  %6352 = vst [vmem:[#allocation186_spill] sm:$0xff] %v4376_v62  ;;  %v4390_v49 = vsub.f32 %v400_v35, %v1808_v55  ;;  %v532_v35 = vand.u32 4294901760, %v340_v21  ;;  %v1812_v50 = vand.u32 4294901760, %v402_v17  ;;  %3097 = vmatprep.subr.bf16.mxu1 %v4394_v2  ;;  %v1816_v55 = vand.u32 4294901760, %v404_v7 }
  0x83   :  { %6353 = vst [vmem:[#allocation187_spill] sm:$0xff] %v4378_v3  ;;  %6354 = vst [vmem:[#allocation188_spill] sm:$0xff] %v4380_v15  ;;  %v4402_v16 = vsub.f32 %v403_v38, %v1810_v32  ;;  %v44_v62 = vcombine.high %v40_v10, %v40_v10  ;;  %v45_v15 = vcombine.high %v41_v63, %v41_v63  ;;  %v49_v38 = vsel %vm48_vm0, %v40_v10, 0.0 }
  0x84   :  { %6355 = vst [vmem:[#allocation189_spill] sm:$0xff] %v4382_v40  ;;  %6356 = vst [vmem:[#allocation190_spill] sm:$0xff] %v4384_v28  ;;  %v4406_v41 = vsub.f32 %v405_v30, %v1814_v8  ;;  %v4408_v53 = vpack.c.bf16 %v532_v35, %v528_v51  ;;  %v4410_v11 = vsub.f32 %v338_v37, %v528_v51 }
  0x85   :  { %6357 = vst [vmem:[#allocation191_spill] sm:$0xff] %v4386_v48  ;;  %6358 = vst [vmem:[#allocation192_spill] sm:$0xff] %v4388_v4  ;;  %v4412_v44 = vsub.f32 %v340_v21, %v532_v35  ;;  %v4414_v48 = vpack.c.bf16 %v1816_v55, %v1812_v50  ;;  %v56_v30 = vsel %vm48_vm0, %v44_v62, 0.0  ;;  %v70_v37 = vsel %vm48_vm0, %v45_v15, 0.0 }
  0x86   :  { %6359 = vst [vmem:[#allocation193_spill] sm:$0xff] %v4390_v49  ;;  %6360 = vst [vmem:[#allocation194_spill] sm:$0xff] %v4394_v2  ;;  %v4404_v49 = vpack.c.bf16 %v1814_v8, %v1810_v32  ;;  %v4418_v2 = vsub.f32 %v404_v7, %v1816_v55  ;;  %3099 = vmatpush1.bf16.msra.mxu1 %v4408_v53  ;;  %v63_v32 = vsel %vm48_vm0, %v41_v63, 0.0  ;;  %v50_v21 = vrot.slane %v49_v38, 4 }
  0x87   :  { %6361 = vst [vmem:[#allocation195_spill] sm:$0xff] %v4396_v34  ;;  %6362 = vst [vmem:[#allocation196_spill] sm:$0xff] %v4398_v60  ;;  %v4416_v60 = vsub.f32 %v402_v17, %v1812_v50  ;;  %v57_v8 = vrot.slane %v56_v30, 4  ;;  %v64_v17 = vrot.slane %v63_v32, 4  ;;  %v71_v51 = vrot.slane %v70_v37, 4 }
  0x88   :  { %6363 = vst [vmem:[#allocation197_spill] sm:$0xff] %v4402_v16  ;;  %6364 = vst [vmem:[#allocation198_spill] sm:$0xff] %v4404_v49  ;;  %3481 = vmatprep.subr.bf16.mxu0 %v4404_v49  ;;  %v77_v7 = vsel %vm48_vm0, %v40_v10, -inf  ;;  %v84_v35 = vsel %vm48_vm0, %v44_v62, -inf  ;;  %v91_v50 = vsel %vm48_vm0, %v41_v63, -inf  ;;  %v98_v55 = vsel %vm48_vm0, %v45_v15, -inf }
  0x89   :  { %6365 = vst [vmem:[#allocation199_spill] sm:$0xff] %v4406_v41  ;;  %6366 = vst [vmem:[#allocation200_spill] sm:$0xff] %v4408_v53  ;;  %3483 = vmatpush1.bf16.msra.mxu0 %v4414_v48  ;;  %v51_v49 = vadd.f32 %v50_v21, %v49_v38  ;;  %v58_v53 = vadd.f32 %v57_v8, %v56_v30  ;;  %v92_v41 = vrot.slane %v91_v50, 4 }
  0x8a   :  { %6367 = vst [vmem:[#allocation201_spill] sm:$0xff] %v4410_v11  ;;  %6368 = vst [vmem:[#allocation202_spill] sm:$0xff] %v4412_v44  ;;  %v78_v44 = vrot.slane %v77_v7, 4  ;;  %v85_v11 = vrot.slane %v84_v35, 4 }
  0x8b   :  { %6369 = vst [vmem:[#allocation203_spill] sm:$0xff] %v4414_v48  ;;  %6370 = vst [vmem:[#allocation204_spill] sm:$0xff] %v4416_v60  ;;  %v72_v60 = vadd.f32 %v71_v51, %v70_v37  ;;  %v99_v48 = vrot.slane %v98_v55, 4  ;;  %v52_v16 = vrot.slane %v51_v49, 2  ;;  %v59_v34 = vrot.slane %v58_v53, 2 }
  0x8c   :  { %6371 = vst [vmem:[#allocation205_spill] sm:$0xff] %v4418_v2  ;;  %v65_v2 = vadd.f32 %v64_v17, %v63_v32  ;;  %v79_v40 = vmax.f32 %v77_v7, %v78_v44  ;;  %v86_v10 = vmax.f32 %v84_v35, %v85_v11  ;;  %v93_v3 = vmax.f32 %v91_v50, %v92_v41 }
  0x8d   :  { %v73_v28 = vrot.slane %v72_v60, 2  ;;  %v100_v62 = vmax.f32 %v98_v55, %v99_v48  ;;  %v53_v13 = vadd.f32 %v52_v16, %v51_v49  ;;  %v60_v63 = vadd.f32 %v59_v34, %v58_v53 }
  0x8e   :  { %v66_v4 = vrot.slane %v65_v2, 2  ;;  %v80_v38 = vrot.slane %v79_v40, 2  ;;  %v87_v30 = vrot.slane %v86_v10, 2  ;;  %v94_v32 = vrot.slane %v93_v3, 2 }
  0x8f   :  { %v74_v15 = vadd.f32 %v73_v28, %v72_v60  ;;  %v101_v37 = vrot.slane %v100_v62, 2  ;;  %v54_v21 = vrot.slane %v53_v13, 1  ;;  %v61_v8 = vrot.slane %v60_v63, 1 }
  0x90   :  { %v67_v1 = vadd.f32 %v66_v4, %v65_v2  ;;  %v81_v39 = vmax.f32 %v79_v40, %v80_v38  ;;  %v88_v19 = vmax.f32 %v86_v10, %v87_v30  ;;  %v95_v44 = vmax.f32 %v93_v3, %v94_v32 }
  0x91   :  { %v75_v51 = vrot.slane %v74_v15, 1  ;;  %v102_v11 = vmax.f32 %v100_v62, %v101_v37  ;;  %v55_v48 = vadd.f32 %v54_v21, %v53_v13  ;;  %v62_v49 = vadd.f32 %v61_v8, %v60_v63 }
  0x92   :  { %v68_v17 = vrot.slane %v67_v1, 1  ;;  %v82_v28 = vrot.slane %v81_v39, 1  ;;  %v89_v2 = vrot.slane %v88_v19, 1  ;;  %v96_v60 = vrot.slane %v95_v44, 1 }
  0x93   :  { %v76_v4 = vadd.f32 %v75_v51, %v74_v15  ;;  %v103_v16 = vrot.slane %v102_v11, 1  ;;  %v113_v41 = vcombine.low %v55_v48, %v62_v49  ;;  %v5916_v7 = vand.u32 4294901760, %v3977_v22 }
  0x94   :  { %v69_v34 = vadd.f32 %v68_v17, %v67_v1  ;;  %v5913_v35 = vand.u32 4294901760, %v3979_v23  ;;  %v83_v40 = vmax.f32 %v81_v39, %v82_v28  ;;  %v90_v50 = vmax.f32 %v88_v19, %v89_v2 }
  0x95   :  { %v97_v3 = vmax.f32 %v95_v44, %v96_v60  ;;  %v104_v55 = vmax.f32 %v102_v11, %v103_v16  ;;  %v120_v13 = vrot.slane %v113_v41, %v3973_v20  ;;  %v554_v10 = vsub.f32 %v3977_v22, %v5916_v7 }
  0x96   :  { %v121_v53 = vcombine.low %v69_v34, %v76_v4  ;;  %v566_v62 = vsub.f32 %v3979_v23, %v5913_v35  ;;  %v148_v63 = vcombine.low %v83_v40, %v90_v50  ;;  %v5909_v38 = vand.u32 4294901760, %v3981_v24 }
  0x97   :  { %v156_v15 = vcombine.low %v97_v3, %v104_v55  ;;  %v5906_v19 = vand.u32 4294901760, %v3985_v29  ;;  %v555_v30 = vand.u32 4294901760, %v554_v10  ;;  %v5912_v37 = vand.u32 4294901760, %v3989_v31 }
  0x98   :  { %v128_v1 = vrot.slane %v121_v53, %v3973_v20  ;;  %v567_v32 = vand.u32 4294901760, %v566_v62  ;;  %v155_v21 = vrot.slane %v148_v63, %v3973_v20  ;;  %v1838_v17 = vsub.f32 %v3981_v24, %v5909_v38 }
  0x99   :  { %v163_v8 = vrot.slane %v156_v15, %v3973_v20  ;;  %v1850_v51 = vsub.f32 %v3985_v29, %v5906_v19  ;;  %v560_v48 = vsub.f32 %v3989_v31, %v5912_v37  ;;  %v5910_v49 = vand.u32 4294901760, %v3992_v33 }
  0x9a   :  { %v133_v39 = vrot.slane %v128_v1, 7  ;;  %v3100_v11 = vpack.c.bf16 %v567_v32, %v555_v30  ;;  %v1839_v28 = vand.u32 4294901760, %v1838_v17  ;;  %v5902_v53 = vand.u32 4294901760, %v3998_v45 }
  0x9b   :  { %v166_v4 = vrot.slane %v163_v8, 7  ;;  %v1851_v2 = vand.u32 4294901760, %v1850_v51  ;;  %v561_v16 = vand.u32 4294901760, %v560_v48  ;;  %v572_v41 = vsub.f32 %v3992_v33, %v5910_v49 }
  0x9c   :  { %v135_v44 = vsel %vm134_vm1, %v133_v39, %v120_v13  ;;  %3101 = vmatprep.subr.bf16.mxu1 %v3100_v11  ;;  %v5901_v55 = vand.u32 4294901760, %v4000_v46  ;;  %v1844_v10 = vsub.f32 %v3998_v45, %v5902_v53  ;;  %v5905_v62 = vand.u32 4294901760, %v4002_v47 }
  0x9d   :  { %v137_v34 = vsel %vm136_vm2, %v133_v39, %v135_v44  ;;  %v167_v50 = vsel %vm134_vm1, %v166_v4, %v155_v21  ;;  %v3484_v3 = vpack.c.bf16 %v1851_v2, %v1839_v28  ;;  %v573_v1 = vand.u32 4294901760, %v572_v41 }
  0x9e   :  { %v139_v60 = vsel %vm138_vm3, %v133_v39, %v137_v34  ;;  %v168_v13 = vsel %vm136_vm2, %v166_v4, %v167_v50  ;;  %v1856_v15 = vsub.f32 %v4000_v46, %v5901_v55  ;;  %v5895_v30 = vand.u32 4294901760, %v4010_v54 }
  0x9f   :  { %v141_v40 = vsel %vm140_vm4, %v133_v39, %v139_v60  ;;  %v169_v63 = vsel %vm138_vm3, %v166_v4, %v168_v13  ;;  %3485 = vmatprep.subr.bf16.mxu0 %v3484_v3  ;;  %v5904_v39 = vand.u32 4294901760, %v4006_v52  ;;  %v4478_v21 = vpack.c.bf16 %v573_v1, %v561_v16 }
  0xa0   :  { %143 = vst [vmem:[#allocation2] sm:$0xf] %v141_v40  ;;  %v170_v32 = vsel %vm140_vm4, %v166_v4, %v169_v63  ;;  %v1845_v8 = vand.u32 4294901760, %v1844_v10  ;;  %v578_v17 = vsub.f32 %v4002_v47, %v5905_v62  ;;  %v1857_v51 = vand.u32 4294901760, %v1856_v15 }
  0xa1   :  { %172 = vst [vmem:[#allocation3] sm:$0xf] %v170_v32  ;;  %v590_v44 = vsub.f32 %v4006_v52, %v5904_v39  ;;  %v1862_v11 = vsub.f32 %v4010_v54, %v5895_v30  ;;  %v5892_v48 = vand.u32 4294901760, %v4013_v56  ;;  %v5898_v4 = vand.u32 4294901760, %v4015_v58 }
  0xa2   :  { %v579_v34 = vand.u32 4294901760, %v578_v17  ;;  %v5896_v28 = vand.u32 4294901760, %v4021_v5  ;;  %v5893_v2 = vand.u32 4294901760, %v4023_v6  ;;  %v4493_v60 = vpack.c.bf16 %v1857_v51, %v1845_v8 }
  0xa3   :  { %v591_v16 = vand.u32 4294901760, %v590_v44  ;;  %v1863_v41 = vand.u32 4294901760, %v1862_v11  ;;  %v1874_v40 = vsub.f32 %v4013_v56, %v5892_v48  ;;  %v584_v50 = vsub.f32 %v4015_v58, %v5898_v4 }
  0xa4   :  { %v596_v3 = vsub.f32 %v4021_v5, %v5896_v28  ;;  %v1868_v13 = vsub.f32 %v4023_v6, %v5893_v2  ;;  %v5894_v1 = vand.u32 4294901760, %v4027_v12  ;;  %v5897_v32 = vand.u32 4294901760, %v4031_v14 }
  0xa5   :  { %v4508_v63 = vpack.c.bf16 %v591_v16, %v579_v34  ;;  %v1875_v15 = vand.u32 4294901760, %v1874_v40  ;;  %v5899_v8 = vand.u32 4294901760, %v4034_v18  ;;  %v585_v51 = vand.u32 4294901760, %v584_v50 }
  0xa6   :  { %v597_v44 = vand.u32 4294901760, %v596_v3  ;;  %v1869_v11 = vand.u32 4294901760, %v1868_v13  ;;  %v1880_v2 = vsub.f32 %v4027_v12, %v5894_v1  ;;  %v602_v34 = vsub.f32 %v4031_v14, %v5897_v32 }
  0xa7   :  { %v248_v10 = vld [vmem:[#allocation2] sm:$0xf]  ;;  %v4512_v48 = vpack.c.bf16 %v1875_v15, %v1863_v41  ;;  %v614_v16 = vsub.f32 %v4034_v18, %v5899_v8  ;;  %v5900_v41 = vand.u32 4294901760, %v4038_v25  ;;  %v5903_v3 = vand.u32 4294901760, %v4040_v26 }
  0xa8   :  { %v249_v17 = vmul.f32 0.25, %v248_v10  ;;  %v3035_v10 = vld.sshfl [vmem:[#allocation3] sm:$0x33 pattern:$0x76325410]  ;;  %v4524_v50 = vpack.c.bf16 %v597_v44, %v585_v51  ;;  %v1881_v1 = vand.u32 4294901760, %v1880_v2 }
  0xa9   :  { %v270_v13 = vcombine.high %v3035_v10, %v3035_v10  ;;  %v276_v15 = vsel %vm273_vm5, %v3035_v10, 0.0  ;;  %v603_v30 = vand.u32 4294901760, %v602_v34  ;;  %v615_v8 = vand.u32 4294901760, %v614_v16 }
  0xaa   :  { %v258_v40 = vrot.slane %v249_v17, %v3973_v20  ;;  %v4530_v4 = vand.u32 4294901760, %v276_v15  ;;  %v4535_v51 = vpack.c.bf16 %v1881_v1, %v1869_v11  ;;  %v1886_v44 = vsub.f32 %v4038_v25, %v5900_v41 }
  0xab   :  { %v277_v20 = vsel %vm273_vm5, %v270_v13, 0.0  ;;  %v1898_v11 = vsub.f32 %v4040_v26, %v5903_v3  ;;  %v5922_v7 = vand.u32 4294901760, %v4063_v0 }
  0xac   :  { %v259_v28 = vcombine.high %v258_v40, %v258_v40  ;;  %v274_v32 = vsel %vm273_vm5, %v258_v40, 0.0  ;;  %6372 = vst [vmem:[#allocation206_spill] sm:$0xff] %v4530_v4  ;;  %v4541_v2 = vand.u32 4294901760, %v277_v20  ;;  %v4544_v34 = vsub.f32 %v276_v15, %v4530_v4 }
  0xad   :  { %v4533_v17 = vand.u32 4294901760, %v274_v32  ;;  %v4546_v40 = vpack.c.bf16 %v615_v8, %v603_v30  ;;  %v1887_v1 = vand.u32 4294901760, %v1886_v44  ;;  %v5908_v15 = vand.u32 4294901760, %v4047_v42 }
  0xae   :  { %v275_v10 = vsel %vm273_vm5, %v259_v28, 0.0  ;;  %6374 = vst [vmem:[#allocation208_spill] sm:$0xff] %v4541_v2  ;;  %6375 = vst [vmem:[#allocation209_spill] sm:$0xff] %v4544_v34  ;;  %v4557_v41 = vsub.f32 %v277_v20, %v4541_v2  ;;  %v5907_v28 = vand.u32 4294901760, %v4544_v34  ;;  %v5911_v30 = vand.u32 4294901760, %v4049_v43 }
  0xaf   :  { %6373 = vst [vmem:[#allocation207_spill] sm:$0xff] %v4533_v17  ;;  %v4548_v16 = vand.u32 4294901760, %v275_v10  ;;  %v4551_v13 = vsub.f32 %v274_v32, %v4533_v17  ;;  %v1899_v55 = vand.u32 4294901760, %v1898_v11  ;;  %v5915_v44 = vand.u32 4294901760, %v4053_v57 }
  0xb0   :  { %6378 = vst [vmem:[#allocation212_spill] sm:$0xff] %v4557_v41  ;;  %v5921_v53 = vand.u32 4294901760, %v4557_v41  ;;  %v1827_v20 = vsub.f32 %v4544_v34, %v5907_v28  ;;  %v608_v3 = vsub.f32 %v4047_v42, %v5908_v15 }
  0xb1   :  { %6376 = vst [vmem:[#allocation210_spill] sm:$0xff] %v4548_v16  ;;  %6377 = vst [vmem:[#allocation211_spill] sm:$0xff] %v4551_v13  ;;  %v4563_v8 = vsub.f32 %v275_v10, %v4548_v16  ;;  %v5914_v32 = vand.u32 4294901760, %v4551_v13  ;;  %v620_v10 = vsub.f32 %v4049_v43, %v5911_v30  ;;  %v3492_v62 = vpack.c.bf16 %v1899_v55, %v1887_v1 }
  0xb2   :  { %v1892_v19 = vsub.f32 %v4053_v57, %v5915_v44  ;;  %v1821_v28 = vsub.f32 %v4557_v41, %v5921_v53  ;;  %v1828_v15 = vand.u32 4294901760, %v1827_v20  ;;  %v609_v38 = vand.u32 4294901760, %v608_v3  ;;  %v6383_v41 = vld [vmem:[#allocation63_spill] sm:$0xff] }
  0xb3   :  { %6379 = vst [vmem:[#allocation213_spill] sm:$0xff] %v4563_v8  ;;  %v5923_v39 = vand.u32 4294901760, %v4563_v8  ;;  %v543_v11 = vsub.f32 %v4551_v13, %v5914_v32  ;;  %v621_v49 = vand.u32 4294901760, %v620_v10  ;;  %v5919_v32 = vand.u32 4294901760, %v4055_v59 }
  0xb4   :  { %v1893_v35 = vand.u32 4294901760, %v1892_v19  ;;  %v1822_v55 = vand.u32 4294901760, %v1821_v28  ;;  %v5920_v44 = vand.u32 4294901760, %v4059_v61  ;;  %v5925_v20 = vand.u32 4294901760, %v4067_v27  ;;  %v6380_v28 = vld [vmem:[#allocation58_spill] sm:$0xff] }
  0xb5   :  { %v537_v30 = vsub.f32 %v4563_v8, %v5923_v39  ;;  %v544_v37 = vand.u32 4294901760, %v543_v11  ;;  %v4591_v1 = vpack.c.bf16 %v621_v49, %v609_v38  ;;  %v1904_v3 = vsub.f32 %v4055_v59, %v5919_v32 }
  0xb6   :  { %v5924_v10 = vand.u32 4294901760, %v4070_v9  ;;  %1823 = vmatprep.mubr.f32.mxu0 %v1822_v55  ;;  %v626_v19 = vsub.f32 %v4059_v61, %v5920_v44  ;;  %v638_v38 = vsub.f32 %v4063_v0, %v5922_v7  ;;  %v5926_v49 = vand.u32 4294901760, %v4073_v36  ;;  %v6381_v44 = vld [vmem:[#allocation60_spill] sm:$0xff] }
  0xb7   :  { %v538_v34 = vand.u32 4294901760, %v537_v30  ;;  %v5929_v30 = vand.u32 4294901760, %v6380_v28  ;;  %1829 = vmatmul.mubr.f32.vlgmr.msra.gmra.mrb[0].mxu0 %v1828_v15  ;;  %v1905_v11 = vand.u32 4294901760, %v1904_v3  ;;  %v1910_v32 = vsub.f32 %v4067_v27, %v5925_v20 }
  0xb8   :  { %v1922_v55 = vsub.f32 %v4070_v9, %v5924_v10  ;;  %v5933_v53 = vand.u32 4294901760, %v6381_v44  ;;  %3487 = vmatpush1.bf16.msra.mxu0 %v4493_v60  ;;  %v627_v7 = vand.u32 4294901760, %v626_v19  ;;  %v639_v39 = vand.u32 4294901760, %v638_v38  ;;  %2220 = vmatprep.mubr.f32.mxu0 %v4541_v2 }
  0xb9   :  { %539 = vmatprep.mubr.f32.mxu1 %v538_v34  ;;  %v632_v34 = vsub.f32 %v4073_v36, %v5926_v49  ;;  %v644_v15 = vsub.f32 %v6380_v28, %v5929_v30  ;;  %3489 = vmatprep.subr.bf16.mxu0 %v4512_v48  ;;  %v3494_v3 = vpack.c.bf16 %v1905_v11, %v1893_v35  ;;  %v1911_v10 = vand.u32 4294901760, %v1910_v32  ;;  %v6382_v49 = vld [vmem:[#allocation61_spill] sm:$0xff]  ;;  %v6384_v35 = vld [vmem:[#allocation64_spill] sm:$0xff] }
  0xba   :  { %545 = vmatmul.mubr.f32.vlgmr.msra.gmra.mrb[0].mxu1 %v544_v37  ;;  %v1923_v20 = vand.u32 4294901760, %v1922_v55  ;;  %v1916_v37 = vsub.f32 %v6381_v44, %v5933_v53  ;;  %v3112_v60 = vpack.c.bf16 %v639_v39, %v627_v7  ;;  %v5932_v13 = vand.u32 4294901760, %v6382_v49  ;;  %v6385_v39 = vld [vmem:[#allocation65_spill] sm:$0xff]  ;;  %v6386_v55 = vld [vmem:[#allocation67_spill] sm:$0xff] }
  0xbb   :  { %3103 = vmatpush1.bf16.msra.mxu1 %v4478_v21  ;;  %v633_v19 = vand.u32 4294901760, %v632_v34  ;;  %v645_v38 = vand.u32 4294901760, %v644_v15  ;;  %936 = vmatprep.mubr.f32.mxu1 %v4548_v16  ;;  %v5934_v48 = vand.u32 4294901760, %v6383_v41  ;;  %v5937_v32 = vand.u32 4294901760, %v6384_v35 }
  0xbc   :  { %3105 = vmatprep.subr.bf16.mxu1 %v4508_v63  ;;  %v3496_v30 = vpack.c.bf16 %v1923_v20, %v1911_v10  ;;  %v1917_v21 = vand.u32 4294901760, %v1916_v37  ;;  %3491 = vmatpush1.bf16.msra.mxu0 %v4535_v51  ;;  %v1928_v7 = vsub.f32 %v6382_v49, %v5932_v13  ;;  %v5940_v63 = vand.u32 4294901760, %v6385_v39  ;;  %v6387_v10 = vld [vmem:[#allocation69_spill] sm:$0xff]  ;;  %v6388_v37 = vld [vmem:[#allocation70_spill] sm:$0xff]  ;;  %v6389_v13 = vld [vmem:[#allocation72_spill] sm:$0xff] }
  0xbd   :  { %v3114_v11 = vpack.c.bf16 %v645_v38, %v633_v19  ;;  %v5941_v34 = vand.u32 4294901760, %v6386_v55  ;;  %3493 = vmatprep.subr.bf16.mxu0 %v3492_v62  ;;  %v650_v20 = vsub.f32 %v6383_v41, %v5934_v48  ;;  %v662_v51 = vsub.f32 %v6384_v35, %v5937_v32 }
  0xbe   :  { %v5944_v15 = vand.u32 4294901760, %v6387_v10  ;;  %v5947_v19 = vand.u32 4294901760, %v6388_v37  ;;  %v1929_v38 = vand.u32 4294901760, %v1928_v7  ;;  %v5948_v53 = vand.u32 4294901760, %v6389_v13 }
  0xbf   :  { %3107 = vmatpush1.bf16.msra.mxu1 %v4524_v50  ;;  %v1934_v50 = vsub.f32 %v6385_v39, %v5940_v63  ;;  %v1946_v62 = vsub.f32 %v6386_v55, %v5941_v34  ;;  %v651_v48 = vand.u32 4294901760, %v650_v20  ;;  %v663_v2 = vand.u32 4294901760, %v662_v51  ;;  %v6390_v39 = vld [vmem:[#allocation73_spill] sm:$0xff] }
  0xc0   :  { %3109 = vmatprep.subr.bf16.mxu1 %v4546_v40  ;;  %v656_v32 = vsub.f32 %v6387_v10, %v5944_v15  ;;  %v668_v40 = vsub.f32 %v6388_v37, %v5947_v19  ;;  %3495 = vmatpush1.bf16.msra.mxu0 %v3494_v3  ;;  %v3498_v7 = vpack.c.bf16 %v1929_v38, %v1917_v21  ;;  %v5949_v15 = vand.u32 4294901760, %v6390_v39  ;;  %v6391_v19 = vld [vmem:[#allocation75_spill] sm:$0xff]  ;;  %v6392_v21 = vld [vmem:[#allocation76_spill] sm:$0xff] }
  0xc1   :  { %v1935_v16 = vand.u32 4294901760, %v1934_v50  ;;  %v1947_v63 = vand.u32 4294901760, %v1946_v62  ;;  %v1940_v34 = vsub.f32 %v6389_v13, %v5948_v53  ;;  %3497 = vmatprep.subr.bf16.mxu0 %v3496_v30  ;;  %v3116_v20 = vpack.c.bf16 %v663_v2, %v651_v48  ;;  %v6393_v53 = vld [vmem:[#allocation77_spill] sm:$0xff]  ;;  %v6394_v30 = vld [vmem:[#allocation79_spill] sm:$0xff] }
  0xc2   :  { %v657_v51 = vand.u32 4294901760, %v656_v32  ;;  %v669_v55 = vand.u32 4294901760, %v668_v40  ;;  %v5950_v3 = vand.u32 4294901760, %v6391_v19  ;;  %v5951_v38 = vand.u32 4294901760, %v6392_v21  ;;  %v6395_v48 = vld [vmem:[#allocation81_spill] sm:$0xff] }
  0xc3   :  { %3111 = vmatpush1.bf16.msra.mxu1 %v4591_v1  ;;  %v3500_v10 = vpack.c.bf16 %v1947_v63, %v1935_v16  ;;  %v1941_v49 = vand.u32 4294901760, %v1940_v34  ;;  %v1952_v62 = vsub.f32 %v6390_v39, %v5949_v15  ;;  %v5953_v1 = vand.u32 4294901760, %v6393_v53  ;;  %v6396_v63 = vld [vmem:[#allocation82_spill] sm:$0xff] }
  0xc4   :  { %3113 = vmatprep.subr.bf16.mxu1 %v3112_v60  ;;  %v3118_v50 = vpack.c.bf16 %v669_v55, %v657_v51  ;;  %v5954_v2 = vand.u32 4294901760, %v6394_v30  ;;  %3499 = vmatpush1.bf16.msra.mxu0 %v3498_v7  ;;  %v674_v60 = vsub.f32 %v6391_v19, %v5950_v3  ;;  %v686_v16 = vsub.f32 %v6392_v21, %v5951_v38  ;;  %v6397_v51 = vld [vmem:[#allocation84_spill] sm:$0xff] }
  0xc5   :  { %v5958_v32 = vand.u32 4294901760, %v6395_v48  ;;  %3501 = vmatprep.subr.bf16.mxu0 %v3500_v10  ;;  %v1953_v34 = vand.u32 4294901760, %v1952_v62  ;;  %v1958_v40 = vsub.f32 %v6393_v53, %v5953_v1  ;;  %v5963_v15 = vand.u32 4294901760, %v6397_v51  ;;  %v6401_v19 = vld [vmem:[#allocation88_spill] sm:$0xff] }
  0xc6   :  { %v1970_v7 = vsub.f32 %v6394_v30, %v5954_v2  ;;  %v675_v3 = vand.u32 4294901760, %v674_v60  ;;  %v687_v38 = vand.u32 4294901760, %v686_v16  ;;  %v6399_v60 = vld [vmem:[#allocation85_spill] sm:$0xff] }
  0xc7   :  { %3115 = vmatpush1.bf16.msra.mxu1 %v3114_v11  ;;  %v680_v55 = vsub.f32 %v6395_v48, %v5958_v32  ;;  %v6398_v11 = vand.u32 4294901760, %v6396_v63  ;;  %v3502_v62 = vpack.c.bf16 %v1953_v34, %v1941_v49  ;;  %v1959_v39 = vand.u32 4294901760, %v1958_v40  ;;  %v6400_v48 = vld [vmem:[#allocation87_spill] sm:$0xff]  ;;  %v6402_v40 = vld [vmem:[#allocation89_spill] sm:$0xff] }
  0xc8   :  { %3117 = vmatprep.subr.bf16.mxu1 %v3116_v20  ;;  %v1971_v1 = vand.u32 4294901760, %v1970_v7  ;;  %v1964_v2 = vsub.f32 %v6397_v51, %v5963_v15  ;;  %v3120_v30 = vpack.c.bf16 %v687_v38, %v675_v3  ;;  %v5962_v16 = vand.u32 4294901760, %v6399_v60  ;;  %v6403_v38 = vld [vmem:[#allocation91_spill] sm:$0xff] }
  0xc9   :  { %v692_v10 = vsub.f32 %v6396_v63, %v6398_v11  ;;  %v681_v53 = vand.u32 4294901760, %v680_v55  ;;  %3503 = vmatpush1.bf16.msra.mxu0 %v3502_v62  ;;  %v5965_v21 = vand.u32 4294901760, %v6400_v48  ;;  %v5964_v11 = vand.u32 4294901760, %v6401_v19  ;;  %v6406_v62 = vld [vmem:[#allocation96_spill] sm:$0xff] }
  0xca   :  { %v3504_v13 = vpack.c.bf16 %v1971_v1, %v1959_v39  ;;  %v1965_v32 = vand.u32 4294901760, %v1964_v2  ;;  %v1976_v34 = vsub.f32 %v6399_v60, %v5962_v16  ;;  %v5967_v3 = vand.u32 4294901760, %v6402_v40  ;;  %v6404_v1 = vld [vmem:[#allocation93_spill] sm:$0xff] }
  0xcb   :  { %v693_v20 = vand.u32 4294901760, %v692_v10  ;;  %3119 = vmatpush1.bf16.msra.mxu1 %v3118_v50  ;;  %v5968_v55 = vand.u32 4294901760, %v6403_v38  ;;  %v698_v39 = vsub.f32 %v6400_v48, %v5965_v21  ;;  %v710_v50 = vsub.f32 %v6401_v19, %v5964_v11  ;;  %v6409_v48 = vld [vmem:[#allocation100_spill] sm:$0xff] }
  0xcc   :  { %3121 = vmatprep.subr.bf16.mxu1 %v3120_v30  ;;  %3505 = vmatprep.subr.bf16.mxu0 %v3504_v13  ;;  %v5973_v30 = vand.u32 4294901760, %v6404_v1  ;;  %v1977_v7 = vand.u32 4294901760, %v1976_v34  ;;  %v1982_v10 = vsub.f32 %v6402_v40, %v5967_v3  ;;  %v5980_v63 = vand.u32 4294901760, %v6409_v48 }
  0xcd   :  { %v3122_v49 = vpack.c.bf16 %v693_v20, %v681_v53  ;;  %v6405_v53 = vld [vmem:[#allocation94_spill] sm:$0xff]  ;;  %v1994_v13 = vsub.f32 %v6403_v38, %v5968_v55  ;;  %v5978_v20 = vand.u32 4294901760, %v6406_v62  ;;  %v699_v16 = vand.u32 4294901760, %v698_v39  ;;  %v6407_v39 = vld [vmem:[#allocation97_spill] sm:$0xff] }
  0xce   :  { %v5981_v2 = vand.u32 4294901760, %v6405_v53  ;;  %v711_v15 = vand.u32 4294901760, %v710_v50  ;;  %v704_v11 = vsub.f32 %v6404_v1, %v5973_v30  ;;  %v3506_v21 = vpack.c.bf16 %v1977_v7, %v1965_v32  ;;  %v6408_v30 = vld [vmem:[#allocation99_spill] sm:$0xff] }
  0xcf   :  { %3123 = vmatpush1.bf16.msra.mxu1 %v3122_v49  ;;  %v1983_v60 = vand.u32 4294901760, %v1982_v10  ;;  %v1995_v3 = vand.u32 4294901760, %v1994_v13  ;;  %v1988_v55 = vsub.f32 %v6406_v62, %v5978_v20  ;;  %v5977_v50 = vand.u32 4294901760, %v6407_v39  ;;  %v6410_v10 = vld [vmem:[#allocation101_spill] sm:$0xff] }
  0xd0   :  { %v716_v34 = vsub.f32 %v6405_v53, %v5981_v2  ;;  %v3124_v38 = vpack.c.bf16 %v711_v15, %v699_v16  ;;  %v705_v40 = vand.u32 4294901760, %v704_v11  ;;  %3507 = vmatpush1.bf16.msra.mxu0 %v3506_v21  ;;  %v5979_v1 = vand.u32 4294901760, %v6408_v30  ;;  %v6411_v15 = vld [vmem:[#allocation103_spill] sm:$0xff]  ;;  %v6412_v11 = vld [vmem:[#allocation105_spill] sm:$0xff] }
  0xd1   :  { %v3508_v51 = vpack.c.bf16 %v1995_v3, %v1983_v60  ;;  %v1989_v19 = vand.u32 4294901760, %v1988_v55  ;;  %v2000_v7 = vsub.f32 %v6407_v39, %v5977_v50  ;;  %v5983_v13 = vand.u32 4294901760, %v6410_v10 }
  0xd2   :  { %v717_v49 = vand.u32 4294901760, %v716_v34  ;;  %3125 = vmatprep.subr.bf16.mxu1 %v3124_v38  ;;  %v5984_v16 = vand.u32 4294901760, %v6411_v15  ;;  %v722_v21 = vsub.f32 %v6408_v30, %v5979_v1  ;;  %v734_v60 = vsub.f32 %v6409_v48, %v5980_v63  ;;  %v6417_v30 = vld [vmem:[#allocation112_spill] sm:$0xff] }
  0xd3   :  { %3509 = vmatprep.subr.bf16.mxu0 %v3508_v51  ;;  %v5989_v3 = vand.u32 4294901760, %v6412_v11  ;;  %v2001_v55 = vand.u32 4294901760, %v2000_v7  ;;  %v2006_v34 = vsub.f32 %v6410_v10, %v5983_v13  ;;  %v5996_v53 = vand.u32 4294901760, %v6417_v30 }
  0xd4   :  { %v3126_v32 = vpack.c.bf16 %v717_v49, %v705_v40  ;;  %v6413_v40 = vld [vmem:[#allocation106_spill] sm:$0xff]  ;;  %v2018_v51 = vsub.f32 %v6411_v15, %v5984_v16  ;;  %v6414_v49 = vld [vmem:[#allocation108_spill] sm:$0xff]  ;;  %v723_v20 = vand.u32 4294901760, %v722_v21  ;;  %v735_v1 = vand.u32 4294901760, %v734_v60  ;;  %v6415_v21 = vld [vmem:[#allocation109_spill] sm:$0xff] }
  0xd5   :  { %v5997_v38 = vand.u32 4294901760, %v6413_v40  ;;  %v5994_v50 = vand.u32 4294901760, %v6414_v49  ;;  %v728_v63 = vsub.f32 %v6412_v11, %v5989_v3  ;;  %v3510_v7 = vpack.c.bf16 %v2001_v55, %v1989_v19  ;;  %v6416_v3 = vld [vmem:[#allocation111_spill] sm:$0xff] }
  0xd6   :  { %3127 = vmatpush1.bf16.msra.mxu1 %v3126_v32  ;;  %v2007_v2 = vand.u32 4294901760, %v2006_v34  ;;  %v2019_v39 = vand.u32 4294901760, %v2018_v51  ;;  %v3128_v16 = vpack.c.bf16 %v735_v1, %v723_v20  ;;  %v5993_v60 = vand.u32 4294901760, %v6415_v21  ;;  %v6418_v34 = vld [vmem:[#allocation113_spill] sm:$0xff]  ;;  %v6419_v1 = vld [vmem:[#allocation115_spill] sm:$0xff] }
  0xd7   :  { %v740_v32 = vsub.f32 %v6413_v40, %v5997_v38  ;;  %v2012_v13 = vsub.f32 %v6414_v49, %v5994_v50  ;;  %v729_v15 = vand.u32 4294901760, %v728_v63  ;;  %3511 = vmatpush1.bf16.msra.mxu0 %v3510_v7  ;;  %v5995_v11 = vand.u32 4294901760, %v6416_v3  ;;  %v6422_v7 = vld [vmem:[#allocation120_spill] sm:$0xff] }
  0xd8   :  { %v3512_v62 = vpack.c.bf16 %v2019_v39, %v2007_v2  ;;  %3129 = vmatprep.subr.bf16.mxu1 %v3128_v16  ;;  %v2024_v55 = vsub.f32 %v6415_v21, %v5993_v60  ;;  %v5999_v51 = vand.u32 4294901760, %v6418_v34  ;;  %v6000_v63 = vand.u32 4294901760, %v6419_v1  ;;  %v6420_v39 = vld [vmem:[#allocation117_spill] sm:$0xff]  ;;  %v6425_v40 = vld [vmem:[#allocation124_spill] sm:$0xff] }
  0xd9   :  { %v741_v10 = vand.u32 4294901760, %v740_v32  ;;  %v2013_v48 = vand.u32 4294901760, %v2012_v13  ;;  %v746_v2 = vsub.f32 %v6416_v3, %v5995_v11  ;;  %v758_v20 = vsub.f32 %v6417_v30, %v5996_v53 }
  0xda   :  { %3513 = vmatprep.subr.bf16.mxu0 %v3512_v62  ;;  %v6005_v13 = vand.u32 4294901760, %v6420_v39  ;;  %v2025_v16 = vand.u32 4294901760, %v2024_v55  ;;  %v2030_v32 = vsub.f32 %v6418_v34, %v5999_v51  ;;  %v2042_v62 = vsub.f32 %v6419_v1, %v6000_v63 }
  0xdb   :  { %v3130_v19 = vpack.c.bf16 %v741_v10, %v729_v15  ;;  %v6421_v10 = vld [vmem:[#allocation118_spill] sm:$0xff]  ;;  %v6010_v60 = vand.u32 4294901760, %v6422_v7  ;;  %v747_v50 = vand.u32 4294901760, %v746_v2  ;;  %v759_v11 = vand.u32 4294901760, %v758_v20  ;;  %v6423_v2 = vld [vmem:[#allocation121_spill] sm:$0xff] }
  0xdc   :  { %v6013_v15 = vand.u32 4294901760, %v6421_v10  ;;  %v752_v53 = vsub.f32 %v6420_v39, %v6005_v13  ;;  %v3514_v55 = vpack.c.bf16 %v2025_v16, %v2013_v48  ;;  %v2031_v38 = vand.u32 4294901760, %v2030_v32  ;;  %v6424_v13 = vld [vmem:[#allocation123_spill] sm:$0xff]  ;;  %v6426_v32 = vld [vmem:[#allocation125_spill] sm:$0xff] }
  0xdd   :  { %3131 = vmatpush1.bf16.msra.mxu1 %v3130_v19  ;;  %v2043_v21 = vand.u32 4294901760, %v2042_v62  ;;  %v2036_v51 = vsub.f32 %v6422_v7, %v6010_v60  ;;  %v3132_v63 = vpack.c.bf16 %v759_v11, %v747_v50  ;;  %v6009_v20 = vand.u32 4294901760, %v6423_v2  ;;  %v6427_v50 = vld [vmem:[#allocation127_spill] sm:$0xff] }
  0xde   :  { %v764_v19 = vsub.f32 %v6421_v10, %v6013_v15  ;;  %v753_v1 = vand.u32 4294901760, %v752_v53  ;;  %3515 = vmatpush1.bf16.msra.mxu0 %v3514_v55  ;;  %v6011_v3 = vand.u32 4294901760, %v6424_v13  ;;  %v6012_v37 = vand.u32 4294901760, %v6425_v40  ;;  %v6430_v55 = vld [vmem:[#allocation132_spill] sm:$0xff] }
  0xdf   :  { %v3516_v49 = vpack.c.bf16 %v2043_v21, %v2031_v38  ;;  %v2037_v30 = vand.u32 4294901760, %v2036_v51  ;;  %3133 = vmatprep.subr.bf16.mxu1 %v3132_v63  ;;  %v2048_v16 = vsub.f32 %v6423_v2, %v6009_v20  ;;  %v6015_v62 = vand.u32 4294901760, %v6426_v32  ;;  %v6428_v21 = vld [vmem:[#allocation129_spill] sm:$0xff]  ;;  %v6433_v2 = vld [vmem:[#allocation136_spill] sm:$0xff] }
  0xe0   :  { %v765_v34 = vand.u32 4294901760, %v764_v19  ;;  %v6016_v53 = vand.u32 4294901760, %v6427_v50  ;;  %v770_v11 = vsub.f32 %v6424_v13, %v6011_v3  ;;  %v782_v38 = vsub.f32 %v6425_v40, %v6012_v37 }
  0xe1   :  { %3517 = vmatprep.subr.bf16.mxu0 %v3516_v49  ;;  %v6021_v51 = vand.u32 4294901760, %v6428_v21  ;;  %v2049_v63 = vand.u32 4294901760, %v2048_v16  ;;  %v2054_v19 = vsub.f32 %v6426_v32, %v6015_v62  ;;  %v6026_v20 = vand.u32 4294901760, %v6430_v55 }
  0xe2   :  { %v3134_v48 = vpack.c.bf16 %v765_v34, %v753_v1  ;;  %v6429_v34 = vld [vmem:[#allocation130_spill] sm:$0xff]  ;;  %v2066_v49 = vsub.f32 %v6427_v50, %v6016_v53  ;;  %v771_v60 = vand.u32 4294901760, %v770_v11  ;;  %v783_v3 = vand.u32 4294901760, %v782_v38  ;;  %v6431_v11 = vld [vmem:[#allocation133_spill] sm:$0xff] }
  0xe3   :  { %v6029_v1 = vand.u32 4294901760, %v6429_v34  ;;  %v776_v37 = vsub.f32 %v6428_v21, %v6021_v51  ;;  %v3518_v16 = vpack.c.bf16 %v2049_v63, %v2037_v30  ;;  %v2055_v15 = vand.u32 4294901760, %v2054_v19  ;;  %v6432_v51 = vld [vmem:[#allocation135_spill] sm:$0xff]  ;;  %v6434_v19 = vld [vmem:[#allocation137_spill] sm:$0xff] }
  0xe4   :  { %3135 = vmatpush1.bf16.msra.mxu1 %v3134_v48  ;;  %v2067_v44 = vand.u32 4294901760, %v2066_v49  ;;  %v2060_v62 = vsub.f32 %v6430_v55, %v6026_v20  ;;  %v3136_v53 = vpack.c.bf16 %v783_v3, %v771_v60  ;;  %v6025_v38 = vand.u32 4294901760, %v6431_v11  ;;  %v6435_v3 = vld [vmem:[#allocation139_spill] sm:$0xff]  ;;  %v6441_v55 = vld [vmem:[#allocation148_spill] sm:$0xff] }
  0xe5   :  { %v788_v48 = vsub.f32 %v6429_v34, %v6029_v1  ;;  %v777_v50 = vand.u32 4294901760, %v776_v37  ;;  %3519 = vmatpush1.bf16.msra.mxu0 %v3518_v16  ;;  %v6027_v21 = vand.u32 4294901760, %v6432_v51  ;;  %v6028_v7 = vand.u32 4294901760, %v6433_v2  ;;  %v6438_v16 = vld [vmem:[#allocation144_spill] sm:$0xff] }
  0xe6   :  { %v3520_v40 = vpack.c.bf16 %v2067_v44, %v2055_v15  ;;  %v2061_v13 = vand.u32 4294901760, %v2060_v62  ;;  %3137 = vmatprep.subr.bf16.mxu1 %v3136_v53  ;;  %v2072_v63 = vsub.f32 %v6431_v11, %v6025_v38  ;;  %v6031_v49 = vand.u32 4294901760, %v6434_v19  ;;  %v6436_v15 = vld [vmem:[#allocation141_spill] sm:$0xff] }
  0xe7   :  { %v789_v32 = vand.u32 4294901760, %v788_v48  ;;  %v6032_v37 = vand.u32 4294901760, %v6435_v3  ;;  %v794_v44 = vsub.f32 %v6432_v51, %v6027_v21  ;;  %v806_v60 = vsub.f32 %v6433_v2, %v6028_v7 }
  0xe8   :  { %3521 = vmatprep.subr.bf16.mxu0 %v3520_v40  ;;  %v6037_v62 = vand.u32 4294901760, %v6436_v15  ;;  %v2073_v53 = vand.u32 4294901760, %v2072_v63  ;;  %v2078_v48 = vsub.f32 %v6434_v19, %v6031_v49  ;;  %v6042_v38 = vand.u32 4294901760, %v6438_v16 }
  0xe9   :  { %v3138_v30 = vpack.c.bf16 %v789_v32, %v777_v50  ;;  %v6437_v32 = vld [vmem:[#allocation142_spill] sm:$0xff]  ;;  %v2090_v40 = vsub.f32 %v6435_v3, %v6032_v37  ;;  %v795_v20 = vand.u32 4294901760, %v794_v44  ;;  %v807_v21 = vand.u32 4294901760, %v806_v60  ;;  %v6439_v44 = vld [vmem:[#allocation145_spill] sm:$0xff] }
  0xea   :  { %v6045_v50 = vand.u32 4294901760, %v6437_v32  ;;  %v800_v7 = vsub.f32 %v6436_v15, %v6037_v62  ;;  %v3522_v63 = vpack.c.bf16 %v2073_v53, %v2061_v13  ;;  %v2079_v1 = vand.u32 4294901760, %v2078_v48  ;;  %v6440_v62 = vld [vmem:[#allocation147_spill] sm:$0xff]  ;;  %v6442_v48 = vld [vmem:[#allocation149_spill] sm:$0xff] }
  0xeb   :  { %3139 = vmatpush1.bf16.msra.mxu1 %v3138_v30  ;;  %v2091_v2 = vand.u32 4294901760, %v2090_v40  ;;  %v2084_v49 = vsub.f32 %v6438_v16, %v6042_v38  ;;  %v3140_v37 = vpack.c.bf16 %v807_v21, %v795_v20  ;;  %v6041_v60 = vand.u32 4294901760, %v6439_v44  ;;  %v6443_v20 = vld [vmem:[#allocation151_spill] sm:$0xff]  ;;  %v6449_v16 = vld [vmem:[#allocation160_spill] sm:$0xff] }
  0xec   :  { %v812_v30 = vsub.f32 %v6437_v32, %v6045_v50  ;;  %v801_v3 = vand.u32 4294901760, %v800_v7  ;;  %3523 = vmatpush1.bf16.msra.mxu0 %v3522_v63  ;;  %v6043_v15 = vand.u32 4294901760, %v6440_v62  ;;  %v6044_v34 = vand.u32 4294901760, %v6441_v55  ;;  %v6446_v63 = vld [vmem:[#allocation156_spill] sm:$0xff] }
  0xed   :  { %v3524_v51 = vpack.c.bf16 %v2091_v2, %v2079_v1  ;;  %v2085_v11 = vand.u32 4294901760, %v2084_v49  ;;  %3141 = vmatprep.subr.bf16.mxu1 %v3140_v37  ;;  %v2096_v53 = vsub.f32 %v6439_v44, %v6041_v60  ;;  %v6047_v40 = vand.u32 4294901760, %v6442_v48  ;;  %v6444_v1 = vld [vmem:[#allocation153_spill] sm:$0xff] }
  0xee   :  { %v813_v19 = vand.u32 4294901760, %v812_v30  ;;  %v6048_v7 = vand.u32 4294901760, %v6443_v20  ;;  %v818_v2 = vsub.f32 %v6440_v62, %v6043_v15  ;;  %v830_v21 = vsub.f32 %v6441_v55, %v6044_v34 }
  0xef   :  { %3525 = vmatprep.subr.bf16.mxu0 %v3524_v51  ;;  %v6053_v49 = vand.u32 4294901760, %v6444_v1  ;;  %v2097_v37 = vand.u32 4294901760, %v2096_v53  ;;  %v2102_v30 = vsub.f32 %v6442_v48, %v6047_v40  ;;  %v6058_v60 = vand.u32 4294901760, %v6446_v63 }
  0xf0   :  { %v3142_v13 = vpack.c.bf16 %v813_v19, %v801_v3  ;;  %v6445_v19 = vld [vmem:[#allocation154_spill] sm:$0xff]  ;;  %v2114_v51 = vsub.f32 %v6443_v20, %v6048_v7  ;;  %v819_v38 = vand.u32 4294901760, %v818_v2  ;;  %v831_v15 = vand.u32 4294901760, %v830_v21  ;;  %v6447_v2 = vld [vmem:[#allocation157_spill] sm:$0xff] }
  0xf1   :  { %v6061_v3 = vand.u32 4294901760, %v6445_v19  ;;  %v824_v34 = vsub.f32 %v6444_v1, %v6053_v49  ;;  %v3526_v53 = vpack.c.bf16 %v2097_v37, %v2085_v11  ;;  %v2103_v50 = vand.u32 4294901760, %v2102_v30  ;;  %v6448_v49 = vld [vmem:[#allocation159_spill] sm:$0xff]  ;;  %v6450_v30 = vld [vmem:[#allocation161_spill] sm:$0xff] }
  0xf2   :  { %3143 = vmatpush1.bf16.msra.mxu1 %v3142_v13  ;;  %v2115_v55 = vand.u32 4294901760, %v2114_v51  ;;  %v2108_v40 = vsub.f32 %v6446_v63, %v6058_v60  ;;  %v3144_v7 = vpack.c.bf16 %v831_v15, %v819_v38  ;;  %v6057_v21 = vand.u32 4294901760, %v6447_v2  ;;  %v6451_v38 = vld [vmem:[#allocation163_spill] sm:$0xff]  ;;  %v6457_v63 = vld [vmem:[#allocation172_spill] sm:$0xff] }
  0xf3   :  { %v836_v13 = vsub.f32 %v6445_v19, %v6061_v3  ;;  %v825_v20 = vand.u32 4294901760, %v824_v34  ;;  %3527 = vmatpush1.bf16.msra.mxu0 %v3526_v53  ;;  %v6059_v1 = vand.u32 4294901760, %v6448_v49  ;;  %v6060_v32 = vand.u32 4294901760, %v6449_v16  ;;  %v6454_v53 = vld [vmem:[#allocation168_spill] sm:$0xff] }
  0xf4   :  { %v3528_v62 = vpack.c.bf16 %v2115_v55, %v2103_v50  ;;  %v2109_v44 = vand.u32 4294901760, %v2108_v40  ;;  %3145 = vmatprep.subr.bf16.mxu1 %v3144_v7  ;;  %v2120_v37 = vsub.f32 %v6447_v2, %v6057_v21  ;;  %v6063_v51 = vand.u32 4294901760, %v6450_v30  ;;  %v6452_v50 = vld [vmem:[#allocation165_spill] sm:$0xff] }
  0xf5   :  { %v837_v48 = vand.u32 4294901760, %v836_v13  ;;  %v6064_v34 = vand.u32 4294901760, %v6451_v38  ;;  %v842_v55 = vsub.f32 %v6448_v49, %v6059_v1  ;;  %v854_v15 = vsub.f32 %v6449_v16, %v6060_v32 }
  0xf6   :  { %3529 = vmatprep.subr.bf16.mxu0 %v3528_v62  ;;  %v6069_v40 = vand.u32 4294901760, %v6452_v50  ;;  %v2121_v7 = vand.u32 4294901760, %v2120_v37  ;;  %v2126_v13 = vsub.f32 %v6450_v30, %v6063_v51  ;;  %v6074_v21 = vand.u32 4294901760, %v6454_v53 }
  0xf7   :  { %v3146_v11 = vpack.c.bf16 %v837_v48, %v825_v20  ;;  %v6453_v48 = vld [vmem:[#allocation166_spill] sm:$0xff]  ;;  %v2138_v62 = vsub.f32 %v6451_v38, %v6064_v34  ;;  %v843_v60 = vand.u32 4294901760, %v842_v55  ;;  %v855_v1 = vand.u32 4294901760, %v854_v15  ;;  %v6455_v55 = vld [vmem:[#allocation169_spill] sm:$0xff] }
  0xf8   :  { %v6077_v20 = vand.u32 4294901760, %v6453_v48  ;;  %v848_v32 = vsub.f32 %v6452_v50, %v6069_v40  ;;  %v3530_v37 = vpack.c.bf16 %v2121_v7, %v2109_v44  ;;  %v2127_v3 = vand.u32 4294901760, %v2126_v13  ;;  %v6456_v40 = vld [vmem:[#allocation171_spill] sm:$0xff]  ;;  %v6458_v13 = vld [vmem:[#allocation173_spill] sm:$0xff] }
  0xf9   :  { %3147 = vmatpush1.bf16.msra.mxu1 %v3146_v11  ;;  %v2139_v16 = vand.u32 4294901760, %v2138_v62  ;;  %v2132_v51 = vsub.f32 %v6454_v53, %v6074_v21  ;;  %v3148_v34 = vpack.c.bf16 %v855_v1, %v843_v60  ;;  %v6073_v15 = vand.u32 4294901760, %v6455_v55  ;;  %v6459_v60 = vld [vmem:[#allocation175_spill] sm:$0xff]  ;;  %v6465_v53 = vld [vmem:[#allocation184_spill] sm:$0xff] }
  0xfa   :  { %v860_v11 = vsub.f32 %v6453_v48, %v6077_v20  ;;  %v849_v38 = vand.u32 4294901760, %v848_v32  ;;  %3531 = vmatpush1.bf16.msra.mxu0 %v3530_v37  ;;  %v6075_v50 = vand.u32 4294901760, %v6456_v40  ;;  %v6076_v19 = vand.u32 4294901760, %v6457_v63  ;;  %v6462_v37 = vld [vmem:[#allocation180_spill] sm:$0xff] }
  0xfb   :  { %v3532_v49 = vpack.c.bf16 %v2139_v16, %v2127_v3  ;;  %v2133_v2 = vand.u32 4294901760, %v2132_v51  ;;  %3149 = vmatprep.subr.bf16.mxu1 %v3148_v34  ;;  %v2144_v7 = vsub.f32 %v6455_v55, %v6073_v15  ;;  %v6079_v62 = vand.u32 4294901760, %v6458_v13  ;;  %v6460_v3 = vld [vmem:[#allocation177_spill] sm:$0xff] }
  0xfc   :  { %v861_v30 = vand.u32 4294901760, %v860_v11  ;;  %v6080_v32 = vand.u32 4294901760, %v6459_v60  ;;  %v866_v16 = vsub.f32 %v6456_v40, %v6075_v50  ;;  %v878_v1 = vsub.f32 %v6457_v63, %v6076_v19 }
  0xfd   :  { %3533 = vmatprep.subr.bf16.mxu0 %v3532_v49  ;;  %v6085_v51 = vand.u32 4294901760, %v6460_v3  ;;  %v2145_v34 = vand.u32 4294901760, %v2144_v7  ;;  %v2150_v11 = vsub.f32 %v6458_v13, %v6079_v62  ;;  %v6090_v15 = vand.u32 4294901760, %v6462_v37 }
  0xfe   :  { %v3150_v44 = vpack.c.bf16 %v861_v30, %v849_v38  ;;  %v6461_v30 = vld [vmem:[#allocation178_spill] sm:$0xff]  ;;  %v2162_v49 = vsub.f32 %v6459_v60, %v6080_v32  ;;  %v867_v21 = vand.u32 4294901760, %v866_v16  ;;  %v879_v50 = vand.u32 4294901760, %v878_v1  ;;  %v6463_v16 = vld [vmem:[#allocation181_spill] sm:$0xff] }
  0xff   :  { %v6093_v38 = vand.u32 4294901760, %v6461_v30  ;;  %v872_v19 = vsub.f32 %v6460_v3, %v6085_v51  ;;  %v3534_v7 = vpack.c.bf16 %v2145_v34, %v2133_v2  ;;  %v2151_v20 = vand.u32 4294901760, %v2150_v11  ;;  %v6464_v51 = vld [vmem:[#allocation183_spill] sm:$0xff]  ;;  %v6466_v11 = vld [vmem:[#allocation185_spill] sm:$0xff] }
 0x100   :  { %3151 = vmatpush1.bf16.msra.mxu1 %v3150_v44  ;;  %v2163_v63 = vand.u32 4294901760, %v2162_v49  ;;  %v2156_v62 = vsub.f32 %v6462_v37, %v6090_v15  ;;  %v3152_v32 = vpack.c.bf16 %v879_v50, %v867_v21  ;;  %v6089_v1 = vand.u32 4294901760, %v6463_v16  ;;  %v6467_v21 = vld [vmem:[#allocation187_spill] sm:$0xff]  ;;  %v6473_v37 = vld [vmem:[#allocation196_spill] sm:$0xff] }
 0x101   :  { %v884_v44 = vsub.f32 %v6461_v30, %v6093_v38  ;;  %v873_v60 = vand.u32 4294901760, %v872_v19  ;;  %3535 = vmatpush1.bf16.msra.mxu0 %v3534_v7  ;;  %v6091_v3 = vand.u32 4294901760, %v6464_v51  ;;  %v6092_v48 = vand.u32 4294901760, %v6465_v53  ;;  %v6470_v7 = vld [vmem:[#allocation192_spill] sm:$0xff] }
 0x102   :  { %v3536_v40 = vpack.c.bf16 %v2163_v63, %v2151_v20  ;;  %v2157_v55 = vand.u32 4294901760, %v2156_v62  ;;  %3153 = vmatprep.subr.bf16.mxu1 %v3152_v32  ;;  %v2168_v34 = vsub.f32 %v6463_v16, %v6089_v1  ;;  %v6095_v49 = vand.u32 4294901760, %v6466_v11  ;;  %v6468_v20 = vld [vmem:[#allocation189_spill] sm:$0xff] }
 0x103   :  { %v885_v13 = vand.u32 4294901760, %v884_v44  ;;  %v6096_v19 = vand.u32 4294901760, %v6467_v21  ;;  %v890_v63 = vsub.f32 %v6464_v51, %v6091_v3  ;;  %v902_v50 = vsub.f32 %v6465_v53, %v6092_v48 }
 0x104   :  { %3537 = vmatprep.subr.bf16.mxu0 %v3536_v40  ;;  %v6101_v62 = vand.u32 4294901760, %v6468_v20  ;;  %v2169_v32 = vand.u32 4294901760, %v2168_v34  ;;  %v2174_v44 = vsub.f32 %v6466_v11, %v6095_v49  ;;  %v6106_v1 = vand.u32 4294901760, %v6470_v7 }
 0x105   :  { %v3154_v2 = vpack.c.bf16 %v885_v13, %v873_v60  ;;  %v6469_v13 = vld [vmem:[#allocation190_spill] sm:$0xff]  ;;  %v2186_v40 = vsub.f32 %v6467_v21, %v6096_v19  ;;  %v891_v15 = vand.u32 4294901760, %v890_v63  ;;  %v903_v3 = vand.u32 4294901760, %v902_v50  ;;  %v6471_v63 = vld [vmem:[#allocation193_spill] sm:$0xff] }
 0x106   :  { %v6109_v60 = vand.u32 4294901760, %v6469_v13  ;;  %v896_v48 = vsub.f32 %v6468_v20, %v6101_v62  ;;  %v3538_v34 = vpack.c.bf16 %v2169_v32, %v2157_v55  ;;  %v2175_v38 = vand.u32 4294901760, %v2174_v44  ;;  %v6472_v62 = vld [vmem:[#allocation195_spill] sm:$0xff]  ;;  %v6474_v44 = vld [vmem:[#allocation197_spill] sm:$0xff] }
 0x107   :  { %3155 = vmatpush1.bf16.msra.mxu1 %v3154_v2  ;;  %v2187_v53 = vand.u32 4294901760, %v2186_v40  ;;  %v2180_v49 = vsub.f32 %v6470_v7, %v6106_v1  ;;  %v3156_v19 = vpack.c.bf16 %v903_v3, %v891_v15  ;;  %v6105_v50 = vand.u32 4294901760, %v6471_v63  ;;  %v6475_v15 = vld [vmem:[#allocation199_spill] sm:$0xff] }
 0x108   :  { %v908_v2 = vsub.f32 %v6469_v13, %v6109_v60  ;;  %v897_v21 = vand.u32 4294901760, %v896_v48  ;;  %3539 = vmatpush1.bf16.msra.mxu0 %v3538_v34  ;;  %v6107_v20 = vand.u32 4294901760, %v6472_v62  ;;  %v6108_v30 = vand.u32 4294901760, %v6473_v37  ;;  %v6478_v34 = vld [vmem:[#allocation204_spill] sm:$0xff]  ;;  %v6538_v7 = vld [vmem:[#allocation67_spill] sm:$0xff] }
 0x109   :  { %v3540_v51 = vpack.c.bf16 %v2187_v53, %v2175_v38  ;;  %v2181_v16 = vand.u32 4294901760, %v2180_v49  ;;  %3157 = vmatprep.subr.bf16.mxu1 %v3156_v19  ;;  %v2192_v32 = vsub.f32 %v6471_v63, %v6105_v50  ;;  %v6111_v40 = vand.u32 4294901760, %v6474_v44  ;;  %v6476_v38 = vld [vmem:[#allocation201_spill] sm:$0xff] }
 0x10a   :  { %v909_v11 = vand.u32 4294901760, %v908_v2  ;;  %v6112_v48 = vand.u32 4294901760, %v6475_v15  ;;  %v914_v53 = vsub.f32 %v6472_v62, %v6107_v20  ;;  %v926_v3 = vsub.f32 %v6473_v37, %v6108_v30 }
 0x10b   :  { %3541 = vmatprep.subr.bf16.mxu0 %v3540_v51  ;;  %v6116_v49 = vand.u32 4294901760, %v6476_v38  ;;  %v2193_v19 = vand.u32 4294901760, %v2192_v32  ;;  %v2198_v2 = vsub.f32 %v6474_v44, %v6111_v40  ;;  %v6120_v50 = vand.u32 4294901760, %v6478_v34 }
 0x10c   :  { %v3158_v55 = vpack.c.bf16 %v909_v11, %v897_v21  ;;  %v6477_v11 = vld [vmem:[#allocation202_spill] sm:$0xff]  ;;  %v2210_v51 = vsub.f32 %v6475_v15, %v6112_v48  ;;  %v915_v1 = vand.u32 4294901760, %v914_v53  ;;  %v927_v20 = vand.u32 4294901760, %v926_v3  ;;  %v6479_v53 = vld [vmem:[#allocation205_spill] sm:$0xff] }
 0x10d   :  { %v6118_v21 = vand.u32 4294901760, %v6477_v11  ;;  %v920_v30 = vsub.f32 %v6476_v38, %v6116_v49  ;;  %v3542_v32 = vpack.c.bf16 %v2193_v19, %v2181_v16  ;;  %v2199_v60 = vand.u32 4294901760, %v2198_v2 }
 0x10e   :  { %3159 = vmatpush1.bf16.msra.mxu1 %v3158_v55  ;;  %v2211_v37 = vand.u32 4294901760, %v2210_v51  ;;  %v2204_v40 = vsub.f32 %v6478_v34, %v6120_v50  ;;  %v3160_v48 = vpack.c.bf16 %v927_v20, %v915_v1  ;;  %v6119_v3 = vand.u32 4294901760, %v6479_v53  ;;  %v6485_v50 = vld [vmem:[#allocation127_spill] sm:$0xff]  ;;  %v6544_v34 = vld [vmem:[#allocation82_spill] sm:$0xff] }
 0x10f   :  { %v932_v55 = vsub.f32 %v6477_v11, %v6118_v21  ;;  %v921_v15 = vand.u32 4294901760, %v920_v30  ;;  %3543 = vmatpush1.bf16.msra.mxu0 %v3542_v32  ;;  %v3164_v49 = vpack.c.bf16 %v3979_v23, %v3977_v22  ;;  %v3166_v30 = vpack.c.bf16 %v3992_v33, %v3989_v31  ;;  %v6490_v32 = vld [vmem:[#allocation135_spill] sm:$0xff]  ;;  %v6529_v31 = vld [vmem:[#allocation196_spill] sm:$0xff]  ;;  %v6532_v23 = vld [vmem:[#allocation201_spill] sm:$0xff] }
 0x110   :  { %v3544_v62 = vpack.c.bf16 %v2211_v37, %v2199_v60  ;;  %3161 = vmatprep.subr.bf16.mxu1 %v3160_v48  ;;  %v2205_v21 = vand.u32 4294901760, %v2204_v40  ;;  %v2216_v16 = vsub.f32 %v6479_v53, %v6119_v3  ;;  %v3548_v37 = vpack.c.bf16 %v3985_v29, %v3981_v24  ;;  %v6484_v3 = vld [vmem:[#allocation125_spill] sm:$0xff]  ;;  %v6515_v29 = vld [vmem:[#allocation171_spill] sm:$0xff]  ;;  %v6516_v24 = vld [vmem:[#allocation172_spill] sm:$0xff] }
 0x111   :  { %v933_v44 = vand.u32 4294901760, %v932_v55  ;;  %v3168_v1 = vpack.c.bf16 %v4006_v52, %v4002_v47  ;;  %v3552_v60 = vpack.c.bf16 %v4013_v56, %v4010_v54  ;;  %v3554_v40 = vpack.c.bf16 %v4027_v12, %v4023_v6  ;;  %v6502_v12 = vld [vmem:[#allocation212_spill] sm:$0xff]  ;;  %v6504_v6 = vld [vmem:[#allocation154_spill] sm:$0xff]  ;;  %v6507_v56 = vld [vmem:[#allocation159_spill] sm:$0xff] }
 0x112   :  { %3545 = vmatprep.subr.bf16.mxu0 %v3544_v62  ;;  %v2217_v19 = vand.u32 4294901760, %v2216_v16  ;;  %v3550_v62 = vpack.c.bf16 %v4000_v46, %v3998_v45  ;;  %v3556_v48 = vpack.c.bf16 %v4040_v26, %v4038_v25  ;;  %v3560_v2 = vpack.c.bf16 %v4070_v9, %v4067_v27  ;;  %v6480_v16 = vld [vmem:[#allocation120_spill] sm:$0xff]  ;;  %v6487_v9 = vld [vmem:[#allocation130_spill] sm:$0xff]  ;;  %v6497_v26 = vld [vmem:[#allocation145_spill] sm:$0xff] }
 0x113   :  { %v3162_v38 = vpack.c.bf16 %v933_v44, %v921_v15  ;;  %v3170_v44 = vpack.c.bf16 %v4021_v5, %v4015_v58  ;;  %v3172_v15 = vpack.c.bf16 %v4034_v18, %v4031_v14  ;;  %v3178_v51 = vpack.c.bf16 %v6380_v28, %v4073_v36  ;;  %v6491_v36 = vld [vmem:[#allocation136_spill] sm:$0xff]  ;;  %v6498_v25 = vld [vmem:[#allocation147_spill] sm:$0xff]  ;;  %v6503_v28 = vld [vmem:[#allocation153_spill] sm:$0xff] }
 0x114   :  { %v3546_v20 = vpack.c.bf16 %v2217_v19, %v2205_v21  ;;  %v3176_v21 = vpack.c.bf16 %v4063_v0, %v4059_v61  ;;  %v3180_v55 = vpack.c.bf16 %v6384_v35, %v6383_v41  ;;  %v6481_v19 = vld [vmem:[#allocation121_spill] sm:$0xff]  ;;  %v6488_v35 = vld [vmem:[#allocation132_spill] sm:$0xff]  ;;  %v6495_v0 = vld [vmem:[#allocation142_spill] sm:$0xff] }
 0x115   :  { %3163 = vmatpush1.bf16.msra.mxu1 %v3162_v38  ;;  %v3174_v38 = vpack.c.bf16 %v4049_v43, %v4047_v42  ;;  %v6489_v41 = vld [vmem:[#allocation133_spill] sm:$0xff]  ;;  %v6496_v61 = vld [vmem:[#allocation144_spill] sm:$0xff]  ;;  %v6512_v46 = vld [vmem:[#allocation166_spill] sm:$0xff] }
 0x116   :  { %3165 = vmatprep.subr.bf16.mxu1 %v3164_v49  ;;  %3547 = vmatpush1.bf16.msra.mxu0 %v3546_v20  ;;  %v3558_v49 = vpack.c.bf16 %v4055_v59, %v4053_v57  ;;  %v6494_v57 = vld [vmem:[#allocation141_spill] sm:$0xff]  ;;  %v6499_v43 = vld [vmem:[#allocation148_spill] sm:$0xff]  ;;  %v6536_v42 = vld [vmem:[#allocation70_spill] sm:$0xff] }
 0x117   :  { %3549 = vmatprep.subr.bf16.mxu0 %v3548_v37  ;;  %v6482_v37 = vld [vmem:[#allocation123_spill] sm:$0xff]  ;;  %v6505_v18 = vld [vmem:[#allocation156_spill] sm:$0xff]  ;;  %v6506_v14 = vld [vmem:[#allocation157_spill] sm:$0xff] }
 0x118   :  { %938 = vmatmul.mubr.f32.vlgmr.msra.gmra.mrb[0].mxu1 %v4533_v17  ;;  %v6486_v17 = vld [vmem:[#allocation129_spill] sm:$0xff]  ;;  %v6508_v54 = vld [vmem:[#allocation160_spill] sm:$0xff]  ;;  %v6539_v20 = vld [vmem:[#allocation75_spill] sm:$0xff] }
 0x119   :  { %3167 = vmatpush1.bf16.msra.mxu1 %v3166_v30  ;;  %1138 = vmatprep.mubr.f32.mxu1 %v4563_v8  ;;  %v6492_v30 = vld [vmem:[#allocation137_spill] sm:$0xff]  ;;  %v6524_v8 = vld [vmem:[#allocation184_spill] sm:$0xff] }
 0x11a   :  { %3169 = vmatprep.subr.bf16.mxu1 %v3168_v1  ;;  %2222 = vmatmul.mubr.f32.vlgmr.msra.gmra.mrb[0].mxu0 %v4530_v4  ;;  %v6483_v1 = vld [vmem:[#allocation124_spill] sm:$0xff]  ;;  %v6511_v27 = vld [vmem:[#allocation165_spill] sm:$0xff] }
 0x11b   :  { %3551 = vmatpush1.bf16.msra.mxu0 %v3550_v62  ;;  %v6493_v62 = vld [vmem:[#allocation139_spill] sm:$0xff]  ;;  %2422 = vmatprep.mubr.f32.mxu0 %v6502_v12  ;;  %v6514_v52 = vld [vmem:[#allocation169_spill] sm:$0xff]  ;;  %v6521_v4 = vld [vmem:[#allocation180_spill] sm:$0xff] }
 0x11c   :  { %3553 = vmatprep.subr.bf16.mxu0 %v3552_v60  ;;  %v6500_v60 = vld [vmem:[#allocation149_spill] sm:$0xff]  ;;  %v6523_v12 = vld [vmem:[#allocation183_spill] sm:$0xff]  ;;  %v6533_v47 = vld [vmem:[#allocation60_spill] sm:$0xff] }
 0x11d   :  { %3171 = vmatpush1.bf16.msra.mxu1 %v3170_v44  ;;  %v6534_v5 = vld [vmem:[#allocation61_spill] sm:$0xff]  ;;  %v6540_v33 = vld [vmem:[#allocation76_spill] sm:$0xff] }
 0x11e   :  { %3173 = vmatprep.subr.bf16.mxu1 %v3172_v15  ;;  %v6501_v15 = vld [vmem:[#allocation151_spill] sm:$0xff]  ;;  %v3562_v59 = vpack.c.bf16 %v6534_v5, %v6533_v47  ;;  %v6535_v58 = vld [vmem:[#allocation69_spill] sm:$0xff]  ;;  %v3184_v22 = vpack.c.bf16 %v6540_v33, %v6539_v20  ;;  %v6552_v20 = vld [vmem:[#allocation94_spill] sm:$0xff] }
 0x11f   :  { %3555 = vmatpush1.bf16.msra.mxu0 %v3554_v40  ;;  %v6522_v40 = vld [vmem:[#allocation181_spill] sm:$0xff] }
 0x120   :  { %3557 = vmatprep.subr.bf16.mxu0 %v3556_v48  ;;  %v3182_v48 = vpack.c.bf16 %v6536_v42, %v6535_v58  ;;  %v6537_v44 = vld [vmem:[#allocation65_spill] sm:$0xff]  ;;  %v6546_v42 = vld [vmem:[#allocation79_spill] sm:$0xff]  ;;  %v6548_v58 = vld [vmem:[#allocation88_spill] sm:$0xff] }
 0x121   :  { %3175 = vmatpush1.bf16.msra.mxu1 %v3174_v38  ;;  %v3564_v63 = vpack.c.bf16 %v6538_v7, %v6537_v44  ;;  %v6541_v38 = vld [vmem:[#allocation72_spill] sm:$0xff]  ;;  %v6542_v45 = vld [vmem:[#allocation73_spill] sm:$0xff] }
 0x122   :  { %3177 = vmatprep.subr.bf16.mxu1 %v3176_v21  ;;  %v6528_v21 = vld [vmem:[#allocation195_spill] sm:$0xff]  ;;  %v6545_v5 = vld [vmem:[#allocation77_spill] sm:$0xff]  ;;  %v6549_v7 = vld [vmem:[#allocation84_spill] sm:$0xff] }
 0x123   :  { %3559 = vmatpush1.bf16.msra.mxu0 %v3558_v49  ;;  %v3566_v49 = vpack.c.bf16 %v6542_v45, %v6541_v38  ;;  %v6550_v33 = vld [vmem:[#allocation85_spill] sm:$0xff] }
 0x124   :  { %3561 = vmatprep.subr.bf16.mxu0 %v3560_v2  ;;  %v3568_v2 = vpack.c.bf16 %v6546_v42, %v6545_v5  ;;  %v6553_v45 = vld [vmem:[#allocation89_spill] sm:$0xff]  ;;  %v6557_v42 = vld [vmem:[#allocation96_spill] sm:$0xff] }
 0x125   :  { %3179 = vmatpush1.bf16.msra.mxu1 %v3178_v51  ;;  %v6543_v51 = vld [vmem:[#allocation81_spill] sm:$0xff] }
 0x126   :  { %3181 = vmatprep.subr.bf16.mxu1 %v3180_v55  ;;  %v3186_v53 = vpack.c.bf16 %v6544_v34, %v6543_v51  ;;  %v6547_v55 = vld [vmem:[#allocation87_spill] sm:$0xff]  ;;  %v6556_v51 = vld [vmem:[#allocation100_spill] sm:$0xff] }
 0x127   :  { %3563 = vmatpush1.bf16.msra.mxu0 %v3562_v59  ;;  %v3188_v47 = vpack.c.bf16 %v6548_v58, %v6547_v55  ;;  %v3570_v59 = vpack.c.bf16 %v6550_v33, %v6549_v7  ;;  %v6554_v34 = vld [vmem:[#allocation91_spill] sm:$0xff]  ;;  %v6558_v58 = vld [vmem:[#allocation97_spill] sm:$0xff]  ;;  %v6560_v55 = vld [vmem:[#allocation106_spill] sm:$0xff] }
 0x128   :  { %3565 = vmatprep.subr.bf16.mxu0 %v3564_v63  ;;  %v3572_v63 = vpack.c.bf16 %v6554_v34, %v6553_v45  ;;  %v6561_v33 = vld [vmem:[#allocation101_spill] sm:$0xff]  ;;  %v6565_v34 = vld [vmem:[#allocation108_spill] sm:$0xff] }
 0x129   :  { %3183 = vmatpush1.bf16.msra.mxu1 %v3182_v48  ;;  %v6551_v48 = vld [vmem:[#allocation93_spill] sm:$0xff] }
 0x12a   :  { %3185 = vmatprep.subr.bf16.mxu1 %v3184_v22  ;;  %v3190_v44 = vpack.c.bf16 %v6552_v20, %v6551_v48  ;;  %v6555_v22 = vld [vmem:[#allocation99_spill] sm:$0xff]  ;;  %v6564_v48 = vld [vmem:[#allocation112_spill] sm:$0xff] }
 0x12b   :  { %3567 = vmatpush1.bf16.msra.mxu0 %v3566_v49  ;;  %v3192_v38 = vpack.c.bf16 %v6556_v51, %v6555_v22  ;;  %v3574_v49 = vpack.c.bf16 %v6558_v58, %v6557_v42  ;;  %v6562_v20 = vld [vmem:[#allocation103_spill] sm:$0xff]  ;;  %v6566_v51 = vld [vmem:[#allocation109_spill] sm:$0xff] }
 0x12c   :  { %3569 = vmatprep.subr.bf16.mxu0 %v3568_v2  ;;  %v3576_v2 = vpack.c.bf16 %v6562_v20, %v6561_v33  ;;  %v6568_v58 = vld [vmem:[#allocation115_spill] sm:$0xff] }
 0x12d   :  { %3187 = vmatpush1.bf16.msra.mxu1 %v3186_v53  ;;  %v6559_v53 = vld [vmem:[#allocation105_spill] sm:$0xff] }
 0x12e   :  { %3189 = vmatprep.subr.bf16.mxu1 %v3188_v47  ;;  %v3194_v5 = vpack.c.bf16 %v6560_v55, %v6559_v53  ;;  %v6563_v47 = vld [vmem:[#allocation111_spill] sm:$0xff] }
 0x12f   :  { %3571 = vmatpush1.bf16.msra.mxu0 %v3570_v59  ;;  %v3196_v7 = vpack.c.bf16 %v6564_v48, %v6563_v47  ;;  %v3578_v59 = vpack.c.bf16 %v6566_v51, %v6565_v34 }
 0x130   :  { %3573 = vmatprep.subr.bf16.mxu0 %v3572_v63  ;;  %v6570_v63 = vpack.c.bf16 %v6483_v1, %v6482_v37 }
 0x131   :  { %3191 = vmatpush1.bf16.msra.mxu1 %v3190_v44  ;;  %v6567_v44 = vld [vmem:[#allocation113_spill] sm:$0xff] }
 0x132   :  { %3193 = vmatprep.subr.bf16.mxu1 %v3192_v38  ;;  %v3580_v42 = vpack.c.bf16 %v6568_v58, %v6567_v44  ;;  %v6569_v38 = vpack.c.bf16 %v6421_v10, %v6420_v39 }
 0x133   :  { %3575 = vmatpush1.bf16.msra.mxu0 %v3574_v49  ;;  %v6573_v49 = vpack.c.bf16 %v6485_v50, %v6484_v3 }
 0x134   :  { %3577 = vmatprep.subr.bf16.mxu0 %v3576_v2  ;;  %v6574_v2 = vpack.c.bf16 %v6491_v36, %v6490_v32 }
 0x135   :  { %3195 = vmatpush1.bf16.msra.mxu1 %v3194_v5  ;;  %v6571_v5 = vpack.c.bf16 %v6481_v19, %v6480_v16 }
 0x136   :  { %3197 = vmatprep.subr.bf16.mxu1 %v3196_v7  ;;  %v6572_v7 = vpack.c.bf16 %v6487_v9, %v6486_v17 }
 0x137   :  { %3579 = vmatpush1.bf16.msra.mxu0 %v3578_v59  ;;  %v6576_v59 = vpack.c.bf16 %v6495_v0, %v6494_v57 }
 0x138   :  { %3581 = vmatprep.subr.bf16.mxu0 %v3580_v42  ;;  %v6575_v42 = vpack.c.bf16 %v6489_v41, %v6488_v35 }
 0x139   :  { %3199 = vmatpush1.bf16.msra.mxu1 %v6569_v38  ;;  %v6577_v38 = vpack.c.bf16 %v6493_v62, %v6492_v30 }
 0x13a   :  { %3201 = vmatprep.subr.bf16.mxu1 %v6570_v63  ;;  %v6578_v63 = vpack.c.bf16 %v6499_v43, %v6498_v25 }
 0x13b   :  { %3583 = vmatpush1.bf16.msra.mxu0 %v6571_v5  ;;  %v6579_v5 = vpack.c.bf16 %v6497_v26, %v6496_v61 }
 0x13c   :  { %3585 = vmatprep.subr.bf16.mxu0 %v6573_v49  ;;  %v6581_v49 = vpack.c.bf16 %v6501_v15, %v6500_v60 }
 0x13d   :  { %3203 = vmatpush1.bf16.msra.mxu1 %v6572_v7  ;;  %v6580_v7 = vpack.c.bf16 %v6504_v6, %v6503_v28 }
 0x13e   :  { %3205 = vmatprep.subr.bf16.mxu1 %v6574_v2  ;;  %v6582_v2 = vpack.c.bf16 %v6508_v54, %v6507_v56  ;;  %v6592_v56 = vld [vmem:[#allocation177_spill] sm:$0xff] }
 0x13f   :  { %3587 = vmatpush1.bf16.msra.mxu0 %v6575_v42  ;;  %v6583_v42 = vpack.c.bf16 %v6506_v14, %v6505_v18  ;;  %v6595_v18 = vld [vmem:[#allocation173_spill] sm:$0xff] }
 0x140   :  { %3589 = vmatprep.subr.bf16.mxu0 %v6577_v38  ;;  %v6585_v38 = vld [vmem:[#allocation163_spill] sm:$0xff] }
 0x141   :  { %3207 = vmatpush1.bf16.msra.mxu1 %v6576_v59  ;;  %v6584_v59 = vpack.c.bf16 %v6512_v46, %v6511_v27 }
 0x142   :  { %3209 = vmatprep.subr.bf16.mxu1 %v6578_v63  ;;  %v6586_v63 = vld [vmem:[#allocation161_spill] sm:$0xff] }
 0x143   :  { %3591 = vmatpush1.bf16.msra.mxu0 %v6579_v5  ;;  %v6587_v5 = vpack.c.bf16 %v6585_v38, %v6586_v63 }
 0x144   :  { %3593 = vmatprep.subr.bf16.mxu0 %v6581_v49  ;;  %v6589_v49 = vld [vmem:[#allocation168_spill] sm:$0xff] }
 0x145   :  { %3211 = vmatpush1.bf16.msra.mxu1 %v6580_v7  ;;  %v6588_v7 = vpack.c.bf16 %v6516_v24, %v6515_v29  ;;  %v6590_v54 = vpack.c.bf16 %v6514_v52, %v6589_v49  ;;  %v6602_v49 = vld [vmem:[#allocation185_spill] sm:$0xff]  ;;  %v6718_v29 = vld [vmem:[#allocation210_spill] sm:$0xff] }
 0x146   :  { %3213 = vmatprep.subr.bf16.mxu1 %v6582_v2  ;;  %v6591_v2 = vld [vmem:[#allocation178_spill] sm:$0xff] }
 0x147   :  { %3595 = vmatpush1.bf16.msra.mxu0 %v6583_v42  ;;  %v6593_v14 = vpack.c.bf16 %v6591_v2, %v6592_v56  ;;  %v6594_v42 = vld [vmem:[#allocation175_spill] sm:$0xff] }
 0x148   :  { %3597 = vmatprep.subr.bf16.mxu0 %v6587_v5  ;;  %v6596_v46 = vpack.c.bf16 %v6594_v42, %v6595_v18  ;;  %v6598_v5 = vpack.c.bf16 %v6522_v40, %v6521_v4  ;;  %v6606_v42 = vld [vmem:[#allocation192_spill] sm:$0xff]  ;;  %v6610_v40 = vld [vmem:[#allocation197_spill] sm:$0xff]  ;;  %v6691_v4 = vld [vmem:[#allocation198_spill] sm:$0xff] }
 0x149   :  { %3215 = vmatpush1.bf16.msra.mxu1 %v6584_v59  ;;  %v6597_v59 = vpack.c.bf16 %v6524_v8, %v6523_v12  ;;  %v6696_v18 = vld [vmem:[#allocation26_spill] sm:$0xff] }
 0x14a   :  { %3217 = vmatprep.subr.bf16.mxu1 %v6588_v7  ;;  %v6599_v7 = vld [vmem:[#allocation189_spill] sm:$0xff] }
 0x14b   :  { %3599 = vmatpush1.bf16.msra.mxu0 %v6590_v54  ;;  %v6600_v52 = vpack.c.bf16 %v6469_v13, %v6599_v7  ;;  %v6601_v54 = vld [vmem:[#allocation187_spill] sm:$0xff] }
 0x14c   :  { %3601 = vmatprep.subr.bf16.mxu0 %v6596_v46  ;;  %v6603_v2 = vpack.c.bf16 %v6601_v54, %v6602_v49  ;;  %v6605_v46 = vld [vmem:[#allocation193_spill] sm:$0xff]  ;;  %v6613_v54 = vld [vmem:[#allocation211_spill] sm:$0xff]  ;;  %v6615_v49 = vld [vmem:[#allocation204_spill] sm:$0xff] }
 0x14d   :  { %3219 = vmatpush1.bf16.msra.mxu1 %v6593_v14  ;;  %v6604_v14 = vpack.c.bf16 %v6529_v31, %v6528_v21  ;;  %v6607_v8 = vpack.c.bf16 %v6605_v46, %v6606_v42  ;;  %v6618_v46 = vld [vmem:[#allocation18_spill] sm:$0xff] }
 0x14e   :  { %3221 = vmatprep.subr.bf16.mxu1 %v6597_v59  ;;  %v6608_v59 = vpack.c.bf16 %v6477_v11, %v6532_v23  ;;  %v6620_v11 = vld [vmem:[#allocation213_spill] sm:$0xff] }
 0x14f   :  { %3603 = vmatpush1.bf16.msra.mxu0 %v6598_v5  ;;  %v6609_v5 = vld [vmem:[#allocation199_spill] sm:$0xff]  ;;  %v6622_v23 = vld [vmem:[#allocation209_spill] sm:$0xff] }
 0x150   :  { %3605 = vmatprep.subr.bf16.mxu0 %v6603_v2  ;;  %v6611_v13 = vpack.c.bf16 %v6609_v5, %v6610_v40  ;;  %v6614_v2 = vld [vmem:[#allocation205_spill] sm:$0xff]  ;;  %v6626_v40 = vld [vmem:[#allocation38_spill] sm:$0xff] }
 0x151   :  { %3223 = vmatpush1.bf16.msra.mxu1 %v6600_v52  ;;  %v6612_v52 = vld [vmem:[#allocation14_spill] sm:$0xff]  ;;  %v6616_v31 = vpack.c.bf16 %v6614_v2, %v6615_v49  ;;  %v6625_v5 = vld [vmem:[#allocation29_spill] sm:$0xff]  ;;  %v6683_v49 = vld [vmem:[#allocation16_spill] sm:$0xff] }
 0x152   :  { %3225 = vmatprep.subr.bf16.mxu1 %v6604_v14  ;;  %v6617_v14 = vld [vmem:[#allocation20_spill] sm:$0xff] }
 0x153   :  { %3607 = vmatpush1.bf16.msra.mxu0 %v6607_v8  ;;  %v6619_v8 = vld [vmem:[#allocation27_spill] sm:$0xff] }
 0x154   :  { %3609 = vmatprep.subr.bf16.mxu0 %v6611_v13  ;;  %v6623_v13 = vld [vmem:[#allocation23_spill] sm:$0xff] }
 0x155   :  { %3227 = vmatpush1.bf16.msra.mxu1 %v6608_v59  ;;  %v6621_v59 = vand.u32 4294901760, %v6620_v11  ;;  %v6632_v11 = vld [vmem:[#allocation50_spill] sm:$0xff] }
 0x156   :  { %3229 = vmatprep.subr.bf16.mxu1 %v6612_v52  ;;  %v6624_v52 = vld [vmem:[#allocation33_spill] sm:$0xff] }
 0x157   :  { %3611 = vmatpush1.bf16.msra.mxu0 %v6616_v31  ;;  %v6627_v31 = vld [vmem:[#allocation212_spill] sm:$0xff] }
 0x158   :  { %1141 = vmatmul.mubr.f32.vlgmr.msra.gmra.mrb[0].mxu1 %v6613_v54  ;;  %3613 = vmatprep.subr.bf16.mxu0 %v6618_v46  ;;  %v6628_v2 = vand.u32 4294901760, %v6627_v31  ;;  %v6630_v46 = vld [vmem:[#allocation44_spill] sm:$0xff] }
 0x159   :  { %3231 = vmatpush1.bf16.msra.mxu1 %v6617_v14  ;;  %1278 = vmatprep.mubr.f32.mxu1 %v6621_v59  ;;  %v6629_v14 = vld [vmem:[#allocation36_spill] sm:$0xff]  ;;  %v6633_v59 = vld [vmem:[#allocation47_spill] sm:$0xff] }
 0x15a   :  { %3233 = vmatprep.subr.bf16.mxu1 %v6619_v8  ;;  %2425 = vmatmul.mubr.f32.vlgmr.msra.gmra.mrb[0].mxu0 %v6622_v23  ;;  %v6631_v8 = vld [vmem:[#allocation41_spill] sm:$0xff]  ;;  %v6638_v31 = vld [vmem:[#allocation68_spill] sm:$0xff] }
 0x15b   :  { %3615 = vmatpush1.bf16.msra.mxu0 %v6623_v13  ;;  %2562 = vmatprep.mubr.f32.mxu0 %v6628_v2  ;;  %v6634_v13 = vld [vmem:[#allocation57_spill] sm:$0xff]  ;;  %v6639_v2 = vld [vmem:[#allocation66_spill] sm:$0xff] }
 0x15c   :  { %3617 = vmatprep.subr.bf16.mxu0 %v6625_v5  ;;  %v6636_v5 = vld [vmem:[#allocation62_spill] sm:$0xff] }
 0x15d   :  { %3235 = vmatpush1.bf16.msra.mxu1 %v6624_v52  ;;  %v6635_v52 = vld [vmem:[#allocation53_spill] sm:$0xff] }
 0x15e   :  { %3237 = vmatprep.subr.bf16.mxu1 %v6626_v40  ;;  %v6637_v40 = vld [vmem:[#allocation59_spill] sm:$0xff] }
 0x15f   :  { %3619 = vmatpush1.bf16.msra.mxu0 %v6629_v14  ;;  %v6640_v14 = vld [vmem:[#allocation74_spill] sm:$0xff] }
 0x160   :  { %3621 = vmatprep.subr.bf16.mxu0 %v6631_v8  ;;  %v6642_v8 = vld [vmem:[#allocation80_spill] sm:$0xff] }
 0x161   :  { %3239 = vmatpush1.bf16.msra.mxu1 %v6630_v46  ;;  %v6641_v46 = vld [vmem:[#allocation71_spill] sm:$0xff] }
 0x162   :  { %3241 = vmatprep.subr.bf16.mxu1 %v6632_v11  ;;  %v6643_v11 = vld [vmem:[#allocation78_spill] sm:$0xff] }
 0x163   :  { %3623 = vmatpush1.bf16.msra.mxu0 %v6633_v59  ;;  %v6644_v59 = vld [vmem:[#allocation86_spill] sm:$0xff] }
 0x164   :  { %3625 = vmatprep.subr.bf16.mxu0 %v6635_v52  ;;  %v6646_v52 = vld [vmem:[#allocation92_spill] sm:$0xff] }
 0x165   :  { %3243 = vmatpush1.bf16.msra.mxu1 %v6634_v13  ;;  %v6645_v13 = vld [vmem:[#allocation83_spill] sm:$0xff] }
 0x166   :  { %3245 = vmatprep.subr.bf16.mxu1 %v6636_v5  ;;  %v6647_v5 = vld [vmem:[#allocation90_spill] sm:$0xff] }
 0x167   :  { %3627 = vmatpush1.bf16.msra.mxu0 %v6637_v40  ;;  %v6648_v40 = vld [vmem:[#allocation98_spill] sm:$0xff] }
 0x168   :  { %3629 = vmatprep.subr.bf16.mxu0 %v6639_v2  ;;  %v6650_v2 = vld [vmem:[#allocation104_spill] sm:$0xff] }
 0x169   :  { %3247 = vmatpush1.bf16.msra.mxu1 %v6638_v31  ;;  %v6649_v31 = vld [vmem:[#allocation95_spill] sm:$0xff] }
 0x16a   :  { %3249 = vmatprep.subr.bf16.mxu1 %v6640_v14  ;;  %v6651_v14 = vld [vmem:[#allocation102_spill] sm:$0xff] }
 0x16b   :  { %3631 = vmatpush1.bf16.msra.mxu0 %v6641_v46  ;;  %v6652_v46 = vld [vmem:[#allocation110_spill] sm:$0xff] }
 0x16c   :  { %3633 = vmatprep.subr.bf16.mxu0 %v6643_v11  ;;  %v6654_v11 = vld [vmem:[#allocation116_spill] sm:$0xff] }
 0x16d   :  { %3251 = vmatpush1.bf16.msra.mxu1 %v6642_v8  ;;  %v6653_v8 = vld [vmem:[#allocation107_spill] sm:$0xff] }
 0x16e   :  { %3253 = vmatprep.subr.bf16.mxu1 %v6644_v59  ;;  %v6655_v59 = vld [vmem:[#allocation114_spill] sm:$0xff] }
 0x16f   :  { %3635 = vmatpush1.bf16.msra.mxu0 %v6645_v13  ;;  %v6656_v13 = vld [vmem:[#allocation122_spill] sm:$0xff] }
 0x170   :  { %3637 = vmatprep.subr.bf16.mxu0 %v6647_v5  ;;  %v6658_v5 = vld [vmem:[#allocation128_spill] sm:$0xff] }
 0x171   :  { %3255 = vmatpush1.bf16.msra.mxu1 %v6646_v52  ;;  %v6657_v52 = vld [vmem:[#allocation119_spill] sm:$0xff] }
 0x172   :  { %3257 = vmatprep.subr.bf16.mxu1 %v6648_v40  ;;  %v6659_v40 = vld [vmem:[#allocation126_spill] sm:$0xff] }
 0x173   :  { %3639 = vmatpush1.bf16.msra.mxu0 %v6649_v31  ;;  %v6660_v31 = vld [vmem:[#allocation134_spill] sm:$0xff] }
 0x174   :  { %3641 = vmatprep.subr.bf16.mxu0 %v6651_v14  ;;  %v6662_v14 = vld [vmem:[#allocation140_spill] sm:$0xff] }
 0x175   :  { %3259 = vmatpush1.bf16.msra.mxu1 %v6650_v2  ;;  %v6661_v2 = vld [vmem:[#allocation131_spill] sm:$0xff] }
 0x176   :  { %3261 = vmatprep.subr.bf16.mxu1 %v6652_v46  ;;  %v6663_v46 = vld [vmem:[#allocation138_spill] sm:$0xff] }
 0x177   :  { %3643 = vmatpush1.bf16.msra.mxu0 %v6653_v8  ;;  %v6664_v8 = vld [vmem:[#allocation146_spill] sm:$0xff] }
 0x178   :  { %3645 = vmatprep.subr.bf16.mxu0 %v6655_v59  ;;  %v6666_v59 = vld [vmem:[#allocation152_spill] sm:$0xff] }
 0x179   :  { %3263 = vmatpush1.bf16.msra.mxu1 %v6654_v11  ;;  %v6665_v11 = vld [vmem:[#allocation143_spill] sm:$0xff] }
 0x17a   :  { %3265 = vmatprep.subr.bf16.mxu1 %v6656_v13  ;;  %v6667_v13 = vld [vmem:[#allocation150_spill] sm:$0xff] }
 0x17b   :  { %3647 = vmatpush1.bf16.msra.mxu0 %v6657_v52  ;;  %v6668_v52 = vld [vmem:[#allocation158_spill] sm:$0xff] }
 0x17c   :  { %3649 = vmatprep.subr.bf16.mxu0 %v6659_v40  ;;  %v6670_v40 = vld [vmem:[#allocation164_spill] sm:$0xff] }
 0x17d   :  { %3267 = vmatpush1.bf16.msra.mxu1 %v6658_v5  ;;  %v6669_v5 = vld [vmem:[#allocation155_spill] sm:$0xff] }
 0x17e   :  { %3269 = vmatprep.subr.bf16.mxu1 %v6660_v31  ;;  %v6671_v31 = vld [vmem:[#allocation162_spill] sm:$0xff] }
 0x17f   :  { %3651 = vmatpush1.bf16.msra.mxu0 %v6661_v2  ;;  %v6672_v2 = vld [vmem:[#allocation170_spill] sm:$0xff] }
 0x180   :  { %3653 = vmatprep.subr.bf16.mxu0 %v6663_v46  ;;  %v6674_v46 = vld [vmem:[#allocation176_spill] sm:$0xff] }
 0x181   :  { %3271 = vmatpush1.bf16.msra.mxu1 %v6662_v14  ;;  %v6673_v14 = vld [vmem:[#allocation167_spill] sm:$0xff] }
 0x182   :  { %3273 = vmatprep.subr.bf16.mxu1 %v6664_v8  ;;  %v6675_v8 = vld [vmem:[#allocation174_spill] sm:$0xff] }
 0x183   :  { %3655 = vmatpush1.bf16.msra.mxu0 %v6665_v11  ;;  %v6676_v11 = vld [vmem:[#allocation182_spill] sm:$0xff] }
 0x184   :  { %3657 = vmatprep.subr.bf16.mxu0 %v6667_v13  ;;  %v6678_v13 = vld [vmem:[#allocation188_spill] sm:$0xff] }
 0x185   :  { %3275 = vmatpush1.bf16.msra.mxu1 %v6666_v59  ;;  %v6677_v59 = vld [vmem:[#allocation179_spill] sm:$0xff] }
 0x186   :  { %3277 = vmatprep.subr.bf16.mxu1 %v6668_v52  ;;  %v6679_v52 = vld [vmem:[#allocation186_spill] sm:$0xff] }
 0x187   :  { %3659 = vmatpush1.bf16.msra.mxu0 %v6669_v5  ;;  %v6680_v5 = vld [vmem:[#allocation194_spill] sm:$0xff] }
 0x188   :  { %3661 = vmatprep.subr.bf16.mxu0 %v6671_v31 }
 0x189   :  { %3279 = vmatpush1.bf16.msra.mxu1 %v6670_v40  ;;  %v6681_v40 = vld [vmem:[#allocation15_spill] sm:$0xff] }
 0x18a   :  { %3281 = vmatprep.subr.bf16.mxu1 %v6672_v2  ;;  %v6682_v31 = vand.u32 4294901760, %v6681_v40  ;;  %v6684_v2 = vand.u32 4294901760, %v6683_v49  ;;  %v6697_v49 = vand.u32 4294901760, %v6696_v18  ;;  %v6710_v18 = vld [vmem:[#allocation30_spill] sm:$0xff] }
 0x18b   :  { %3663 = vmatpush1.bf16.msra.mxu0 %v6673_v14  ;;  %v6685_v14 = vld [vmem:[#allocation191_spill] sm:$0xff] }
 0x18c   :  { %3665 = vmatprep.subr.bf16.mxu0 %v6675_v8  ;;  %v3292_v42 = vpack.c.bf16 %v6684_v2, %v6682_v31  ;;  %v6687_v8 = vld [vmem:[#allocation21_spill] sm:$0xff]  ;;  %v6698_v31 = vld [vmem:[#allocation28_spill] sm:$0xff] }
 0x18d   :  { %3283 = vmatpush1.bf16.msra.mxu1 %v6674_v46  ;;  %v6686_v46 = vld [vmem:[#allocation200_spill] sm:$0xff]  ;;  %v6688_v21 = vand.u32 4294901760, %v6687_v8  ;;  %v6699_v2 = vand.u32 4294901760, %v6698_v31  ;;  %v6701_v8 = vld [vmem:[#allocation203_spill] sm:$0xff] }
 0x18e   :  { %3285 = vmatprep.subr.bf16.mxu1 %v6676_v11  ;;  %v6689_v11 = vld [vmem:[#allocation22_spill] sm:$0xff]  ;;  %v6712_v31 = vld [vmem:[#allocation31_spill] sm:$0xff] }
 0x18f   :  { %3667 = vmatpush1.bf16.msra.mxu0 %v6677_v59  ;;  %v6690_v7 = vand.u32 4294901760, %v6689_v11  ;;  %v6704_v11 = vld [vmem:[#allocation25_spill] sm:$0xff] }
 0x190   :  { %3669 = vmatprep.subr.bf16.mxu0 %v6679_v52  ;;  %v6692_v52 = vld [vmem:[#allocation17_spill] sm:$0xff] }
 0x191   :  { %3287 = vmatpush1.bf16.msra.mxu1 %v6678_v13  ;;  %v3294_v59 = vpack.c.bf16 %v6690_v7, %v6688_v21  ;;  %v6693_v13 = vand.u32 4294901760, %v6692_v52  ;;  %v6702_v21 = vld [vmem:[#allocation24_spill] sm:$0xff] }
 0x192   :  { %3289 = vmatprep.subr.bf16.mxu1 %v6680_v5  ;;  %v6694_v5 = vld [vmem:[#allocation19_spill] sm:$0xff]  ;;  %v6703_v7 = vand.u32 4294901760, %v6702_v21  ;;  %v6706_v52 = vld [vmem:[#allocation32_spill] sm:$0xff] }
 0x193   :  { %3671 = vmatpush1.bf16.msra.mxu0 %v6685_v14  ;;  %v6695_v12 = vand.u32 4294901760, %v6694_v5  ;;  %v3296_v14 = vpack.c.bf16 %v6699_v2, %v6697_v49  ;;  %v6707_v56 = vand.u32 4294901760, %v6706_v52  ;;  %v6708_v5 = vld [vmem:[#allocation34_spill] sm:$0xff]  ;;  %v6711_v49 = vand.u32 4294901760, %v6710_v18  ;;  %v6714_v2 = vld [vmem:[#allocation39_spill] sm:$0xff]  ;;  %v6724_v52 = vld [vmem:[#allocation45_spill] sm:$0xff] }
 0x194   :  { %3673 = vmatprep.subr.bf16.mxu0 %v6691_v4 }
 0x195   :  { %3291 = vmatpush1.bf16.msra.mxu1 %v6686_v46  ;;  %v3676_v40 = vpack.c.bf16 %v6695_v12, %v6693_v13  ;;  %v6700_v46 = vand.u32 4294901760, %v6613_v54  ;;  %v6709_v12 = vand.u32 4294901760, %v6708_v5  ;;  %v6713_v54 = vand.u32 4294901760, %v6712_v31  ;;  %v6730_v31 = vld [vmem:[#allocation43_spill] sm:$0xff] }
 0x196   :  { %3293 = vmatprep.subr.bf16.mxu1 %v3292_v42  ;;  %v6705_v42 = vand.u32 4294901760, %v6704_v11  ;;  %v6725_v5 = vand.u32 4294901760, %v6724_v52 }
 0x197   :  { %3675 = vmatpush1.bf16.msra.mxu0 %v6701_v8  ;;  %v3298_v13 = vpack.c.bf16 %v6709_v12, %v6707_v56  ;;  %v6715_v8 = vand.u32 4294901760, %v6714_v2  ;;  %v6720_v56 = vld [vmem:[#allocation35_spill] sm:$0xff]  ;;  %v6726_v12 = vld [vmem:[#allocation46_spill] sm:$0xff] }
 0x198   :  { %1282 = vmatmul.mubr.f32.vlgmr.msra.gmra.mrb[0].mxu1 %v6700_v46  ;;  %v3678_v4 = vpack.c.bf16 %v6705_v42, %v6703_v7  ;;  %3677 = vmatprep.subr.bf16.mxu0 %v3676_v40  ;;  %v3680_v46 = vpack.c.bf16 %v6713_v54, %v6711_v49  ;;  %v6719_v7 = vand.u32 4294901760, %v6622_v23  ;;  %v6721_v40 = vand.u32 4294901760, %v6720_v56  ;;  %v6732_v2 = vld [vmem:[#allocation51_spill] sm:$0xff]  ;;  %v6736_v56 = vld [vmem:[#allocation208_spill] sm:$0xff] }
 0x199   :  { %3295 = vmatpush1.bf16.msra.mxu1 %v3294_v59  ;;  %v6716_v59 = vld [vmem:[#allocation40_spill] sm:$0xff]  ;;  %1545 = vmatprep.mubr.f32.mxu1 %v6718_v29  ;;  %v6727_v18 = vand.u32 4294901760, %v6726_v12  ;;  %v6731_v54 = vand.u32 4294901760, %v6730_v31  ;;  %v6743_v12 = vld [vmem:[#allocation58_spill] sm:$0xff] }
 0x19a   :  { %3297 = vmatprep.subr.bf16.mxu1 %v3296_v14  ;;  %v6717_v24 = vand.u32 4294901760, %v6716_v59  ;;  %2566 = vmatmul.mubr.f32.vlgmr.msra.gmra.mrb[0].mxu0 %v6719_v7  ;;  %v6722_v14 = vld [vmem:[#allocation37_spill] sm:$0xff] }
 0x19b   :  { %3679 = vmatpush1.bf16.msra.mxu0 %v3678_v4  ;;  %v6723_v11 = vand.u32 4294901760, %v6722_v14  ;;  %v3302_v49 = vpack.c.bf16 %v6727_v18, %v6725_v5  ;;  %v6733_v4 = vand.u32 4294901760, %v6732_v2  ;;  %2829 = vmatprep.mubr.f32.mxu0 %v6736_v56  ;;  %v6744_v18 = vand.u32 4294901760, %v6743_v12 }
 0x19c   :  { %v3300_v21 = vpack.c.bf16 %v6717_v24, %v6715_v8  ;;  %3681 = vmatprep.subr.bf16.mxu0 %v3680_v46  ;;  %v6728_v24 = vld [vmem:[#allocation42_spill] sm:$0xff] }
 0x19d   :  { %3299 = vmatpush1.bf16.msra.mxu1 %v3298_v13  ;;  %v3682_v42 = vpack.c.bf16 %v6723_v11, %v6721_v40  ;;  %v6729_v8 = vand.u32 4294901760, %v6728_v24  ;;  %v6734_v13 = vld [vmem:[#allocation52_spill] sm:$0xff]  ;;  %v6739_v11 = vld [vmem:[#allocation49_spill] sm:$0xff] }
 0x19e   :  { %3301 = vmatprep.subr.bf16.mxu1 %v3300_v21  ;;  %v6735_v59 = vand.u32 4294901760, %v6734_v13  ;;  %v6737_v40 = vld [vmem:[#allocation48_spill] sm:$0xff]  ;;  %v6740_v52 = vand.u32 4294901760, %v6739_v11  ;;  %v6749_v13 = vld [vmem:[#allocation63_spill] sm:$0xff] }
 0x19f   :  { %v3684_v23 = vpack.c.bf16 %v6731_v54, %v6729_v8  ;;  %3683 = vmatpush1.bf16.msra.mxu0 %v3682_v42  ;;  %v6738_v14 = vand.u32 4294901760, %v6737_v40  ;;  %v6741_v21 = vld [vmem:[#allocation56_spill] sm:$0xff]  ;;  %v6745_v8 = vld [vmem:[#allocation54_spill] sm:$0xff]  ;;  %v6747_v54 = vld [vmem:[#allocation55_spill] sm:$0xff]  ;;  %v6750_v42 = vand.u32 4294901760, %v6749_v13 }
 0x1a0   :  { %v3304_v7 = vpack.c.bf16 %v6735_v59, %v6733_v4  ;;  %v6742_v5 = vand.u32 4294901760, %v6741_v21  ;;  %v6746_v31 = vand.u32 4294901760, %v6745_v8  ;;  %v6748_v2 = vand.u32 4294901760, %v6747_v54 }
 0x1a1   :  { %3303 = vmatpush1.bf16.msra.mxu1 %v3302_v49  ;;  %v3686_v46 = vpack.c.bf16 %v6740_v52, %v6738_v14  ;;  %3685 = vmatprep.subr.bf16.mxu0 %v3684_v23  ;;  %v6751_v49 = vld [vmem:[#allocation64_spill] sm:$0xff]  ;;  %v6755_v52 = vld [vmem:[#allocation61_spill] sm:$0xff] }
 0x1a2   :  { %v3306_v24 = vpack.c.bf16 %v6744_v18, %v6742_v5  ;;  %3305 = vmatprep.subr.bf16.mxu1 %v3304_v7  ;;  %v3688_v4 = vpack.c.bf16 %v6748_v2, %v6746_v31  ;;  %v6752_v59 = vand.u32 4294901760, %v6751_v49  ;;  %v6753_v14 = vld [vmem:[#allocation60_spill] sm:$0xff]  ;;  %v6756_v21 = vand.u32 4294901760, %v6755_v52  ;;  %v6757_v5 = vld [vmem:[#allocation69_spill] sm:$0xff]  ;;  %v6759_v7 = vld [vmem:[#allocation70_spill] sm:$0xff] }
 0x1a3   :  { %3687 = vmatpush1.bf16.msra.mxu0 %v3686_v46  ;;  %v6754_v11 = vand.u32 4294901760, %v6753_v14  ;;  %v6758_v23 = vand.u32 4294901760, %v6757_v5  ;;  %v6760_v18 = vand.u32 4294901760, %v6759_v7  ;;  %v6761_v31 = vld [vmem:[#allocation65_spill] sm:$0xff]  ;;  %v6763_v2 = vld [vmem:[#allocation67_spill] sm:$0xff] }
 0x1a4   :  { %v3308_v40 = vpack.c.bf16 %v6752_v59, %v6750_v42  ;;  %3689 = vmatprep.subr.bf16.mxu0 %v3688_v4  ;;  %v6762_v54 = vand.u32 4294901760, %v6761_v31  ;;  %v6764_v13 = vand.u32 4294901760, %v6763_v2  ;;  %v6765_v42 = vld [vmem:[#allocation75_spill] sm:$0xff] }
 0x1a5   :  { %3307 = vmatpush1.bf16.msra.mxu1 %v3306_v24  ;;  %v3690_v12 = vpack.c.bf16 %v6756_v21, %v6754_v11  ;;  %v3310_v8 = vpack.c.bf16 %v6760_v18, %v6758_v23  ;;  %v6766_v46 = vand.u32 4294901760, %v6765_v42  ;;  %v6767_v24 = vld [vmem:[#allocation76_spill] sm:$0xff]  ;;  %v6771_v21 = vld [vmem:[#allocation73_spill] sm:$0xff] }
 0x1a6   :  { %3309 = vmatprep.subr.bf16.mxu1 %v3308_v40  ;;  %v3692_v49 = vpack.c.bf16 %v6764_v13, %v6762_v54  ;;  %v6768_v59 = vand.u32 4294901760, %v6767_v24  ;;  %v6769_v11 = vld [vmem:[#allocation72_spill] sm:$0xff]  ;;  %v6772_v5 = vand.u32 4294901760, %v6771_v21  ;;  %v6773_v23 = vld [vmem:[#allocation81_spill] sm:$0xff]  ;;  %v6775_v40 = vld [vmem:[#allocation82_spill] sm:$0xff] }
 0x1a7   :  { %3691 = vmatpush1.bf16.msra.mxu0 %v3690_v12  ;;  %v6770_v52 = vand.u32 4294901760, %v6769_v11  ;;  %v6774_v4 = vand.u32 4294901760, %v6773_v23  ;;  %v6776_v18 = vand.u32 4294901760, %v6775_v40  ;;  %v6777_v54 = vld [vmem:[#allocation77_spill] sm:$0xff]  ;;  %v6779_v13 = vld [vmem:[#allocation79_spill] sm:$0xff] }
 0x1a8   :  { %v3312_v14 = vpack.c.bf16 %v6768_v59, %v6766_v46  ;;  %3693 = vmatprep.subr.bf16.mxu0 %v3692_v49  ;;  %v6778_v2 = vand.u32 4294901760, %v6777_v54  ;;  %v6780_v42 = vand.u32 4294901760, %v6779_v13  ;;  %v6781_v46 = vld [vmem:[#allocation87_spill] sm:$0xff] }
 0x1a9   :  { %3311 = vmatpush1.bf16.msra.mxu1 %v3310_v8  ;;  %v3694_v7 = vpack.c.bf16 %v6772_v5, %v6770_v52  ;;  %v3314_v31 = vpack.c.bf16 %v6776_v18, %v6774_v4  ;;  %v6782_v12 = vand.u32 4294901760, %v6781_v46  ;;  %v6783_v8 = vld [vmem:[#allocation88_spill] sm:$0xff]  ;;  %v6787_v5 = vld [vmem:[#allocation85_spill] sm:$0xff]  ;;  %v6794_v13 = vld [vmem:[#allocation91_spill] sm:$0xff] }
 0x1aa   :  { %3313 = vmatprep.subr.bf16.mxu1 %v3312_v14  ;;  %v3696_v24 = vpack.c.bf16 %v6780_v42, %v6778_v2  ;;  %v6784_v59 = vand.u32 4294901760, %v6783_v8  ;;  %v6785_v52 = vld [vmem:[#allocation84_spill] sm:$0xff]  ;;  %v6788_v23 = vand.u32 4294901760, %v6787_v5  ;;  %v6789_v4 = vld [vmem:[#allocation93_spill] sm:$0xff]  ;;  %v6791_v14 = vld [vmem:[#allocation94_spill] sm:$0xff]  ;;  %v6793_v2 = vand.u32 4294901760, %v6553_v45 }
 0x1ab   :  { %3695 = vmatpush1.bf16.msra.mxu0 %v3694_v7  ;;  %v6786_v21 = vand.u32 4294901760, %v6785_v52  ;;  %v6790_v49 = vand.u32 4294901760, %v6789_v4  ;;  %v6792_v18 = vand.u32 4294901760, %v6791_v14  ;;  %v6795_v42 = vand.u32 4294901760, %v6794_v13 }
 0x1ac   :  { %v3316_v11 = vpack.c.bf16 %v6784_v59, %v6782_v12  ;;  %3697 = vmatprep.subr.bf16.mxu0 %v3696_v24  ;;  %v6796_v7 = vand.u32 4294901760, %v6555_v22  ;;  %v6799_v59 = vld [vmem:[#allocation96_spill] sm:$0xff]  ;;  %v6803_v24 = vand.u32 4294901760, %v6559_v53  ;;  %v6805_v4 = vand.u32 4294901760, %v6561_v33 }
 0x1ad   :  { %3315 = vmatpush1.bf16.msra.mxu1 %v3314_v31  ;;  %v3698_v40 = vpack.c.bf16 %v6788_v23, %v6786_v21  ;;  %v3318_v54 = vpack.c.bf16 %v6792_v18, %v6790_v49  ;;  %v3700_v46 = vpack.c.bf16 %v6795_v42, %v6793_v2  ;;  %v6797_v31 = vld [vmem:[#allocation100_spill] sm:$0xff]  ;;  %v6800_v52 = vand.u32 4294901760, %v6799_v59  ;;  %v6801_v21 = vld [vmem:[#allocation97_spill] sm:$0xff] }
 0x1ae   :  { %3317 = vmatprep.subr.bf16.mxu1 %v3316_v11  ;;  %v6798_v12 = vand.u32 4294901760, %v6797_v31  ;;  %v6802_v5 = vand.u32 4294901760, %v6801_v21  ;;  %v6804_v11 = vand.u32 4294901760, %v6560_v55  ;;  %v6806_v22 = vand.u32 4294901760, %v6562_v20 }
 0x1af   :  { %3699 = vmatpush1.bf16.msra.mxu0 %v3698_v40  ;;  %v6807_v40 = vand.u32 4294901760, %v6563_v47  ;;  %v6808_v14 = vand.u32 4294901760, %v6564_v48  ;;  %v6810_v53 = vand.u32 4294901760, %v6566_v51  ;;  %v6811_v2 = vand.u32 4294901760, %v6420_v39 }
 0x1b0   :  { %v3320_v8 = vpack.c.bf16 %v6798_v12, %v6796_v7  ;;  %v3702_v23 = vpack.c.bf16 %v6802_v5, %v6800_v52  ;;  %v3322_v45 = vpack.c.bf16 %v6804_v11, %v6803_v24  ;;  %3701 = vmatprep.subr.bf16.mxu0 %v3700_v46  ;;  %v3704_v49 = vpack.c.bf16 %v6806_v22, %v6805_v4  ;;  %v6839_v11 = vld [vmem:[#allocation159_spill] sm:$0xff]  ;;  %v6841_v4 = vld [vmem:[#allocation160_spill] sm:$0xff] }
 0x1b1   :  { %3319 = vmatpush1.bf16.msra.mxu1 %v3318_v54  ;;  %v3324_v18 = vpack.c.bf16 %v6808_v14, %v6807_v40  ;;  %v6809_v54 = vand.u32 4294901760, %v6565_v34  ;;  %v6812_v13 = vand.u32 4294901760, %v6421_v10  ;;  %v6813_v20 = vand.u32 4294901760, %v6567_v44 }
 0x1b2   :  { %3321 = vmatprep.subr.bf16.mxu1 %v3320_v8  ;;  %v6814_v47 = vand.u32 4294901760, %v6568_v58  ;;  %v6815_v42 = vand.u32 4294901760, %v6482_v37  ;;  %v6816_v46 = vand.u32 4294901760, %v6483_v1  ;;  %v6817_v51 = vand.u32 4294901760, %v6480_v16 }
 0x1b3   :  { %3703 = vmatpush1.bf16.msra.mxu0 %v3702_v23  ;;  %v3706_v55 = vpack.c.bf16 %v6810_v53, %v6809_v54  ;;  %v3326_v33 = vpack.c.bf16 %v6812_v13, %v6811_v2  ;;  %v6818_v39 = vand.u32 4294901760, %v6481_v19  ;;  %v6819_v7 = vand.u32 4294901760, %v6486_v17  ;;  %v6852_v2 = vld [vmem:[#allocation171_spill] sm:$0xff] }
 0x1b4   :  { %3705 = vmatprep.subr.bf16.mxu0 %v3704_v49  ;;  %v3708_v48 = vpack.c.bf16 %v6814_v47, %v6813_v20  ;;  %v3328_v34 = vpack.c.bf16 %v6816_v46, %v6815_v42  ;;  %v6820_v31 = vand.u32 4294901760, %v6487_v9  ;;  %v6821_v58 = vand.u32 4294901760, %v6484_v3 }
 0x1b5   :  { %3323 = vmatpush1.bf16.msra.mxu1 %v3322_v45  ;;  %v3710_v10 = vpack.c.bf16 %v6818_v39, %v6817_v51  ;;  %v6822_v37 = vand.u32 4294901760, %v6485_v50  ;;  %v6823_v12 = vand.u32 4294901760, %v6490_v32  ;;  %v6824_v8 = vand.u32 4294901760, %v6491_v36  ;;  %v6860_v51 = vld [vmem:[#allocation177_spill] sm:$0xff] }
 0x1b6   :  { %3325 = vmatprep.subr.bf16.mxu1 %v3324_v18  ;;  %v3330_v44 = vpack.c.bf16 %v6820_v31, %v6819_v7  ;;  %v6825_v19 = vand.u32 4294901760, %v6488_v35  ;;  %v6826_v17 = vand.u32 4294901760, %v6489_v41  ;;  %v6827_v59 = vand.u32 4294901760, %v6494_v57  ;;  %v6848_v18 = vld [vmem:[#allocation166_spill] sm:$0xff] }
 0x1b7   :  { %3707 = vmatpush1.bf16.msra.mxu0 %v3706_v55  ;;  %v3712_v1 = vpack.c.bf16 %v6822_v37, %v6821_v58  ;;  %v3332_v16 = vpack.c.bf16 %v6824_v8, %v6823_v12  ;;  %v6828_v52 = vand.u32 4294901760, %v6495_v0  ;;  %v6829_v50 = vand.u32 4294901760, %v6492_v30  ;;  %v6870_v8 = vld [vmem:[#allocation184_spill] sm:$0xff] }
 0x1b8   :  { %3709 = vmatprep.subr.bf16.mxu0 %v3708_v48  ;;  %v3714_v9 = vpack.c.bf16 %v6826_v17, %v6825_v19  ;;  %v6830_v32 = vand.u32 4294901760, %v6493_v62  ;;  %v6831_v21 = vand.u32 4294901760, %v6498_v25  ;;  %v6832_v5 = vand.u32 4294901760, %v6499_v43  ;;  %v6856_v48 = vld [vmem:[#allocation168_spill] sm:$0xff] }
 0x1b9   :  { %3327 = vmatpush1.bf16.msra.mxu1 %v3326_v33  ;;  %v3334_v3 = vpack.c.bf16 %v6828_v52, %v6827_v59  ;;  %v6833_v41 = vand.u32 4294901760, %v6496_v61  ;;  %v6834_v57 = vand.u32 4294901760, %v6497_v26  ;;  %v6835_v23 = vand.u32 4294901760, %v6503_v28  ;;  %v6843_v26 = vld [vmem:[#allocation156_spill] sm:$0xff]  ;;  %v6845_v28 = vld [vmem:[#allocation157_spill] sm:$0xff] }
 0x1ba   :  { %3329 = vmatprep.subr.bf16.mxu1 %v3328_v34  ;;  %v3716_v36 = vpack.c.bf16 %v6830_v32, %v6829_v50  ;;  %v3336_v35 = vpack.c.bf16 %v6832_v5, %v6831_v21  ;;  %v6836_v24 = vand.u32 4294901760, %v6504_v6  ;;  %v6837_v62 = vand.u32 4294901760, %v6500_v60  ;;  %v6854_v33 = vld [vmem:[#allocation172_spill] sm:$0xff]  ;;  %v6874_v59 = vld [vmem:[#allocation181_spill] sm:$0xff] }
 0x1bb   :  { %3711 = vmatpush1.bf16.msra.mxu0 %v3710_v10  ;;  %v3718_v0 = vpack.c.bf16 %v6834_v57, %v6833_v41  ;;  %v6838_v25 = vand.u32 4294901760, %v6501_v15  ;;  %v6840_v45 = vand.u32 4294901760, %v6839_v11  ;;  %v6842_v22 = vand.u32 4294901760, %v6841_v4  ;;  %v6862_v10 = vld [vmem:[#allocation178_spill] sm:$0xff]  ;;  %v6872_v17 = vld [vmem:[#allocation180_spill] sm:$0xff]  ;;  %v6876_v50 = vld [vmem:[#allocation189_spill] sm:$0xff] }
 0x1bc   :  { %3713 = vmatprep.subr.bf16.mxu0 %v3712_v1  ;;  %v3338_v30 = vpack.c.bf16 %v6836_v24, %v6835_v23  ;;  %v6844_v49 = vand.u32 4294901760, %v6843_v26  ;;  %v6846_v40 = vand.u32 4294901760, %v6845_v28  ;;  %v6847_v14 = vand.u32 4294901760, %v6511_v27  ;;  %v6858_v27 = vld [vmem:[#allocation169_spill] sm:$0xff]  ;;  %v6868_v1 = vld [vmem:[#allocation183_spill] sm:$0xff]  ;;  %v6888_v11 = vld [vmem:[#allocation192_spill] sm:$0xff] }
 0x1bd   :  { %3331 = vmatpush1.bf16.msra.mxu1 %v3330_v44  ;;  %v3720_v43 = vpack.c.bf16 %v6838_v25, %v6837_v62  ;;  %v3340_v61 = vpack.c.bf16 %v6842_v22, %v6840_v45  ;;  %v6849_v54 = vand.u32 4294901760, %v6848_v18  ;;  %v6850_v15 = vand.u32 4294901760, %v6586_v63  ;;  %v6866_v44 = vld [vmem:[#allocation175_spill] sm:$0xff]  ;;  %v6886_v62 = vld [vmem:[#allocation196_spill] sm:$0xff]  ;;  %v6890_v4 = vld [vmem:[#allocation193_spill] sm:$0xff] }
 0x1be   :  { %3333 = vmatprep.subr.bf16.mxu1 %v3332_v16  ;;  %v3722_v6 = vpack.c.bf16 %v6846_v40, %v6844_v49  ;;  %v6851_v53 = vand.u32 4294901760, %v6585_v38  ;;  %v6853_v13 = vand.u32 4294901760, %v6852_v2  ;;  %v6855_v20 = vand.u32 4294901760, %v6854_v33  ;;  %v6864_v38 = vld [vmem:[#allocation173_spill] sm:$0xff]  ;;  %v6882_v57 = vld [vmem:[#allocation187_spill] sm:$0xff]  ;;  %v6894_v28 = vld [vmem:[#allocation202_spill] sm:$0xff] }
 0x1bf   :  { %3715 = vmatpush1.bf16.msra.mxu0 %v3714_v9  ;;  %v3342_v60 = vpack.c.bf16 %v6849_v54, %v6847_v14  ;;  %v6857_v42 = vand.u32 4294901760, %v6856_v48  ;;  %v6859_v46 = vand.u32 4294901760, %v6858_v27  ;;  %v6861_v39 = vand.u32 4294901760, %v6860_v51  ;;  %v6884_v24 = vld [vmem:[#allocation195_spill] sm:$0xff]  ;;  %v6892_v26 = vld [vmem:[#allocation201_spill] sm:$0xff]  ;;  %v6906_v48 = vld [vmem:[#allocation20_spill] sm:$0xff] }
 0x1c0   :  { %3717 = vmatprep.subr.bf16.mxu0 %v3716_v36  ;;  %v3724_v55 = vpack.c.bf16 %v6851_v53, %v6850_v15  ;;  %v3344_v47 = vpack.c.bf16 %v6855_v20, %v6853_v13  ;;  %v6863_v7 = vand.u32 4294901760, %v6862_v10  ;;  %v6865_v31 = vand.u32 4294901760, %v6864_v38  ;;  %v6878_v36 = vld [vmem:[#allocation190_spill] sm:$0xff]  ;;  %v6896_v14 = vld [vmem:[#allocation197_spill] sm:$0xff]  ;;  %v6898_v54 = vld [vmem:[#allocation199_spill] sm:$0xff] }
 0x1c1   :  { %3335 = vmatpush1.bf16.msra.mxu1 %v3334_v3  ;;  %v3726_v34 = vpack.c.bf16 %v6859_v46, %v6857_v42  ;;  %v6867_v58 = vand.u32 4294901760, %v6866_v44  ;;  %v6869_v12 = vand.u32 4294901760, %v6868_v1  ;;  %v6871_v16 = vand.u32 4294901760, %v6870_v8  ;;  %v6900_v53 = vld [vmem:[#allocation204_spill] sm:$0xff]  ;;  %v6902_v2 = vld [vmem:[#allocation205_spill] sm:$0xff]  ;;  %v6904_v20 = vld [vmem:[#allocation14_spill] sm:$0xff] }
 0x1c2   :  { %3337 = vmatprep.subr.bf16.mxu1 %v3336_v35  ;;  %v3346_v63 = vpack.c.bf16 %v6863_v7, %v6861_v39  ;;  %v6873_v9 = vand.u32 4294901760, %v6872_v17  ;;  %v6875_v52 = vand.u32 4294901760, %v6874_v59  ;;  %v6877_v32 = vand.u32 4294901760, %v6876_v50  ;;  %v6880_v35 = vld [vmem:[#allocation185_spill] sm:$0xff]  ;;  %v6907_v42 = vld [vmem:[#allocation18_spill] sm:$0xff]  ;;  %v6908_v27 = vld [vmem:[#allocation27_spill] sm:$0xff] }
 0x1c3   :  { %3719 = vmatpush1.bf16.msra.mxu0 %v3718_v0  ;;  %v3728_v37 = vpack.c.bf16 %v6867_v58, %v6865_v31  ;;  %v3348_v19 = vpack.c.bf16 %v6871_v16, %v6869_v12  ;;  %v6879_v21 = vand.u32 4294901760, %v6878_v36  ;;  %v6881_v41 = vand.u32 4294901760, %v6880_v35  ;;  %v6909_v46 = vld [vmem:[#allocation206_spill] sm:$0xff]  ;;  %v6911_v51 = vld [vmem:[#allocation33_spill] sm:$0xff]  ;;  %v6914_v7 = vld [vmem:[#allocation36_spill] sm:$0xff] }
 0x1c4   :  { %3721 = vmatprep.subr.bf16.mxu0 %v3720_v43  ;;  %v3730_v3 = vpack.c.bf16 %v6875_v52, %v6873_v9  ;;  %v6883_v0 = vand.u32 4294901760, %v6882_v57  ;;  %v6887_v25 = vand.u32 4294901760, %v6886_v62  ;;  %v6889_v45 = vand.u32 4294901760, %v6888_v11  ;;  %v6912_v39 = vld [vmem:[#allocation29_spill] sm:$0xff]  ;;  %v6913_v10 = vld [vmem:[#allocation38_spill] sm:$0xff]  ;;  %v6922_v1 = vld [vmem:[#allocation59_spill] sm:$0xff] }
 0x1c5   :  { %3339 = vmatpush1.bf16.msra.mxu1 %v3338_v30  ;;  %v3350_v5 = vpack.c.bf16 %v6879_v21, %v6877_v32  ;;  %v6885_v30 = vand.u32 4294901760, %v6884_v24  ;;  %v6891_v22 = vand.u32 4294901760, %v6890_v4  ;;  %v6893_v49 = vand.u32 4294901760, %v6892_v26  ;;  %v6916_v38 = vld [vmem:[#allocation41_spill] sm:$0xff]  ;;  %v6917_v31 = vld [vmem:[#allocation50_spill] sm:$0xff]  ;;  %v6923_v12 = vld [vmem:[#allocation68_spill] sm:$0xff] }
 0x1c6   :  { %3341 = vmatprep.subr.bf16.mxu1 %v3340_v61  ;;  %v3732_v23 = vpack.c.bf16 %v6883_v0, %v6881_v41  ;;  %v6895_v40 = vand.u32 4294901760, %v6894_v28  ;;  %v6897_v18 = vand.u32 4294901760, %v6896_v14  ;;  %v6903_v13 = vand.u32 4294901760, %v6902_v2  ;;  %v6919_v44 = vld [vmem:[#allocation57_spill] sm:$0xff]  ;;  %v6925_v8 = vld [vmem:[#allocation74_spill] sm:$0xff]  ;;  %v6926_v16 = vld [vmem:[#allocation71_spill] sm:$0xff] }
 0x1c7   :  { %3723 = vmatpush1.bf16.msra.mxu0 %v3722_v6  ;;  %v3352_v43 = vpack.c.bf16 %v6887_v25, %v6885_v30  ;;  %v3734_v61 = vpack.c.bf16 %v6891_v22, %v6889_v45  ;;  %v6920_v58 = vld [vmem:[#allocation53_spill] sm:$0xff]  ;;  %v6928_v17 = vld [vmem:[#allocation78_spill] sm:$0xff]  ;;  %v6930_v59 = vld [vmem:[#allocation83_spill] sm:$0xff] }
 0x1c8   :  { %3725 = vmatprep.subr.bf16.mxu0 %v3724_v55  ;;  %v3354_v6 = vpack.c.bf16 %v6895_v40, %v6893_v49  ;;  %v6901_v55 = vand.u32 4294901760, %v6900_v53  ;;  %v6929_v9 = vld [vmem:[#allocation86_spill] sm:$0xff]  ;;  %v6931_v52 = vld [vmem:[#allocation92_spill] sm:$0xff]  ;;  %v6934_v32 = vld [vmem:[#allocation95_spill] sm:$0xff] }
 0x1c9   :  { %3343 = vmatpush1.bf16.msra.mxu1 %v3342_v60  ;;  %v6899_v60 = vand.u32 4294901760, %v6898_v54  ;;  %v6933_v50 = vld [vmem:[#allocation98_spill] sm:$0xff]  ;;  %v6935_v36 = vld [vmem:[#allocation104_spill] sm:$0xff]  ;;  %v6938_v35 = vld [vmem:[#allocation107_spill] sm:$0xff] }
 0x1ca   :  { %3345 = vmatprep.subr.bf16.mxu1 %v3344_v47  ;;  %v3738_v33 = vpack.c.bf16 %v6903_v13, %v6901_v55  ;;  %v6905_v47 = vld [vmem:[#allocation207_spill] sm:$0xff]  ;;  %v6936_v21 = vld [vmem:[#allocation102_spill] sm:$0xff]  ;;  %v6939_v41 = vld [vmem:[#allocation116_spill] sm:$0xff] }
 0x1cb   :  { %3727 = vmatpush1.bf16.msra.mxu0 %v3726_v34  ;;  %v3736_v15 = vpack.c.bf16 %v6899_v60, %v6897_v18  ;;  %v6910_v34 = vld [vmem:[#allocation23_spill] sm:$0xff]  ;;  %v6940_v57 = vld [vmem:[#allocation114_spill] sm:$0xff]  ;;  %v6943_v24 = vld [vmem:[#allocation128_spill] sm:$0xff] }
 0x1cc   :  { %3729 = vmatprep.subr.bf16.mxu0 %v3728_v37  ;;  %v6921_v37 = vld [vmem:[#allocation62_spill] sm:$0xff]  ;;  %v6946_v25 = vld [vmem:[#allocation131_spill] sm:$0xff]  ;;  %v6951_v22 = vld [vmem:[#allocation152_spill] sm:$0xff] }
 0x1cd   :  { %3347 = vmatpush1.bf16.msra.mxu1 %v3346_v63  ;;  %v6915_v63 = vld [vmem:[#allocation44_spill] sm:$0xff]  ;;  %v6941_v0 = vld [vmem:[#allocation122_spill] sm:$0xff]  ;;  %v6950_v4 = vld [vmem:[#allocation143_spill] sm:$0xff] }
 0x1ce   :  { %3349 = vmatprep.subr.bf16.mxu1 %v3348_v19  ;;  %v6927_v19 = vld [vmem:[#allocation80_spill] sm:$0xff]  ;;  %v6944_v30 = vld [vmem:[#allocation126_spill] sm:$0xff]  ;;  %v6954_v49 = vld [vmem:[#allocation155_spill] sm:$0xff] }
 0x1cf   :  { %3731 = vmatpush1.bf16.msra.mxu0 %v3730_v3  ;;  %v6932_v3 = vld [vmem:[#allocation90_spill] sm:$0xff]  ;;  %v6955_v28 = vld [vmem:[#allocation164_spill] sm:$0xff]  ;;  %v6958_v14 = vld [vmem:[#allocation167_spill] sm:$0xff] }
 0x1d0   :  { %3733 = vmatprep.subr.bf16.mxu0 %v3732_v23  ;;  %v6942_v23 = vld [vmem:[#allocation119_spill] sm:$0xff]  ;;  %v6945_v62 = vld [vmem:[#allocation134_spill] sm:$0xff]  ;;  %v6959_v18 = vld [vmem:[#allocation176_spill] sm:$0xff] }
 0x1d1   :  { %3351 = vmatpush1.bf16.msra.mxu1 %v3350_v5  ;;  %v6937_v5 = vld [vmem:[#allocation110_spill] sm:$0xff]  ;;  %v6963_v53 = vld [vmem:[#allocation188_spill] sm:$0xff]  ;;  %v6966_v13 = vld [vmem:[#allocation191_spill] sm:$0xff] }
 0x1d2   :  { %3353 = vmatprep.subr.bf16.mxu1 %v3352_v43  ;;  %v6947_v43 = vld [vmem:[#allocation140_spill] sm:$0xff]  ;;  %v6948_v11 = vld [vmem:[#allocation138_spill] sm:$0xff] }
 0x1d3   :  { %3735 = vmatpush1.bf16.msra.mxu0 %v3734_v61  ;;  %v6949_v45 = vld [vmem:[#allocation146_spill] sm:$0xff] }
 0x1d4   :  { %3737 = vmatprep.subr.bf16.mxu0 %v3736_v15  ;;  %v6952_v61 = vld [vmem:[#allocation150_spill] sm:$0xff]  ;;  %v6962_v15 = vld [vmem:[#allocation179_spill] sm:$0xff] }
 0x1d5   :  { %3355 = vmatpush1.bf16.msra.mxu1 %v3354_v6  ;;  %v6953_v26 = vld [vmem:[#allocation158_spill] sm:$0xff] }
 0x1d6   :  { %3357 = vmatprep.subr.bf16.mxu1 %v6904_v20  ;;  %v6956_v40 = vld [vmem:[#allocation162_spill] sm:$0xff] }
 0x1d7   :  { %3739 = vmatpush1.bf16.msra.mxu0 %v3738_v33  ;;  %v6957_v6 = vld [vmem:[#allocation170_spill] sm:$0xff]  ;;  %v6967_v33 = vld [vmem:[#allocation200_spill] sm:$0xff] }
 0x1d8   :  { %1547 = vmatmul.mubr.f32.vlgmr.msra.gmra.mrb[0].mxu1 %v6905_v47  ;;  %3741 = vmatprep.subr.bf16.mxu0 %v6907_v42  ;;  %v6960_v54 = vld [vmem:[#allocation174_spill] sm:$0xff] }
 0x1d9   :  { %3359 = vmatpush1.bf16.msra.mxu1 %v6906_v48  ;;  %1682 = vmatprep.mubr.f32.mxu1 %v6718_v29  ;;  %v6918_v29 = vld [vmem:[#allocation47_spill] sm:$0xff]  ;;  %v6961_v60 = vld [vmem:[#allocation182_spill] sm:$0xff] }
 0x1da   :  { %3361 = vmatprep.subr.bf16.mxu1 %v6908_v27  ;;  %2831 = vmatmul.mubr.f32.vlgmr.msra.gmra.mrb[0].mxu0 %v6909_v46  ;;  %v6964_v55 = vld [vmem:[#allocation186_spill] sm:$0xff]  ;;  %v6969_v48 = vld [vmem:[#allocation203_spill] sm:$0xff] }
 0x1db   :  { %3743 = vmatpush1.bf16.msra.mxu0 %v6910_v34  ;;  %2966 = vmatprep.mubr.f32.mxu0 %v6736_v56  ;;  %v6924_v56 = vld [vmem:[#allocation66_spill] sm:$0xff] }
 0x1dc   :  { %3745 = vmatprep.subr.bf16.mxu0 %v6912_v39  ;;  %v6965_v2 = vld [vmem:[#allocation194_spill] sm:$0xff] }
 0x1dd   :  { %3363 = vmatpush1.bf16.msra.mxu1 %v6911_v51  ;;  %v6968_v20 = vld [vmem:[#allocation198_spill] sm:$0xff] }
 0x1de   :  { %3365 = vmatprep.subr.bf16.mxu1 %v6913_v10 }
 0x1df   :  { %3747 = vmatpush1.bf16.msra.mxu0 %v6914_v7 }
 0x1e0   :  { %3749 = vmatprep.subr.bf16.mxu0 %v6916_v38 }
 0x1e1   :  { %3367 = vmatpush1.bf16.msra.mxu1 %v6915_v63 }
 0x1e2   :  { %3369 = vmatprep.subr.bf16.mxu1 %v6917_v31 }
 0x1e3   :  { %3751 = vmatpush1.bf16.msra.mxu0 %v6918_v29 }
 0x1e4   :  { %3753 = vmatprep.subr.bf16.mxu0 %v6920_v58 }
 0x1e5   :  { %3371 = vmatpush1.bf16.msra.mxu1 %v6919_v44 }
 0x1e6   :  { %3373 = vmatprep.subr.bf16.mxu1 %v6921_v37  ;;  %v3926_v37 = vmov 1966171168  }
 0x1e7   :  { %3755 = vmatpush1.bf16.msra.mxu0 %v6922_v1 }
 0x1e8   :  { %3757 = vmatprep.subr.bf16.mxu0 %v6924_v56  ;;  %v6970_v56 = vld [vmem:[#allocation13_spill] sm:$0xff] }
 0x1e9   :  { %3375 = vmatpush1.bf16.msra.mxu1 %v6923_v12 }
 0x1ea   :  { %3377 = vmatprep.subr.bf16.mxu1 %v6925_v8 }
 0x1eb   :  { %3759 = vmatpush1.bf16.msra.mxu0 %v6926_v16 }
 0x1ec   :  { %3761 = vmatprep.subr.bf16.mxu0 %v6928_v17 }
 0x1ed   :  { %3379 = vmatpush1.bf16.msra.mxu1 %v6927_v19 }
 0x1ee   :  { %3381 = vmatprep.subr.bf16.mxu1 %v6929_v9  ;;  %v6971_v9 = vlaneseq }
 0x1ef   :  { %3763 = vmatpush1.bf16.msra.mxu0 %v6930_v59 }
 0x1f0   :  { %3765 = vmatprep.subr.bf16.mxu0 %v6932_v3  ;;  %vm3013_vm6 = vcmp.lt.s32.totalorder %v6971_v9, 256 }
 0x1f1   :  { %3383 = vmatpush1.bf16.msra.mxu1 %v6931_v52 }
 0x1f2   :  { %3385 = vmatprep.subr.bf16.mxu1 %v6933_v50 }
 0x1f3   :  { %3767 = vmatpush1.bf16.msra.mxu0 %v6934_v32 }
 0x1f4   :  { %3769 = vmatprep.subr.bf16.mxu0 %v6936_v21 }
 0x1f5   :  { %3387 = vmatpush1.bf16.msra.mxu1 %v6935_v36 }
 0x1f6   :  { %3389 = vmatprep.subr.bf16.mxu1 %v6937_v5 }
 0x1f7   :  { %3771 = vmatpush1.bf16.msra.mxu0 %v6938_v35 }
 0x1f8   :  { %3773 = vmatprep.subr.bf16.mxu0 %v6940_v57 }
 0x1f9   :  { %3391 = vmatpush1.bf16.msra.mxu1 %v6939_v41 }
 0x1fa   :  { %3393 = vmatprep.subr.bf16.mxu1 %v6941_v0 }
 0x1fb   :  { %3775 = vmatpush1.bf16.msra.mxu0 %v6942_v23 }
 0x1fc   :  { %3777 = vmatprep.subr.bf16.mxu0 %v6944_v30 }
 0x1fd   :  { %3395 = vmatpush1.bf16.msra.mxu1 %v6943_v24 }
 0x1fe   :  { %3397 = vmatprep.subr.bf16.mxu1 %v6945_v62 }
 0x1ff   :  { %3779 = vmatpush1.bf16.msra.mxu0 %v6946_v25 }
 0x200   :  { %3781 = vmatprep.subr.bf16.mxu0 %v6948_v11 }
 0x201   :  { %3399 = vmatpush1.bf16.msra.mxu1 %v6947_v43 }
 0x202   :  { %3401 = vmatprep.subr.bf16.mxu1 %v6949_v45 }
 0x203   :  { %3783 = vmatpush1.bf16.msra.mxu0 %v6950_v4 }
 0x204   :  { %3785 = vmatprep.subr.bf16.mxu0 %v6952_v61 }
 0x205   :  { %3403 = vmatpush1.bf16.msra.mxu1 %v6951_v22 }
 0x206   :  { %3405 = vmatprep.subr.bf16.mxu1 %v6953_v26 }
 0x207   :  { %3787 = vmatpush1.bf16.msra.mxu0 %v6954_v49 }
 0x208   :  { %3789 = vmatprep.subr.bf16.mxu0 %v6956_v40 }
 0x209   :  { %3407 = vmatpush1.bf16.msra.mxu1 %v6955_v28 }
 0x20a   :  { %3409 = vmatprep.subr.bf16.mxu1 %v6957_v6 }
 0x20b   :  { %3791 = vmatpush1.bf16.msra.mxu0 %v6958_v14 }
 0x20c   :  { %3793 = vmatprep.subr.bf16.mxu0 %v6960_v54 }
 0x20d   :  { %3411 = vmatpush1.bf16.msra.mxu1 %v6959_v18 }
 0x20e   :  { %3413 = vmatprep.subr.bf16.mxu1 %v6961_v60 }
 0x20f   :  { %3795 = vmatpush1.bf16.msra.mxu0 %v6962_v15 }
 0x210   :  { %3797 = vmatprep.subr.bf16.mxu0 %v6964_v55 }
 0x211   :  { %3415 = vmatpush1.bf16.msra.mxu1 %v6963_v53 }
 0x212   :  { %3417 = vmatprep.subr.bf16.mxu1 %v6965_v2 }
 0x213   :  { %3799 = vmatpush1.bf16.msra.mxu0 %v6966_v13 }
 0x214   :  { %3801 = vmatprep.subr.bf16.mxu0 %v6968_v20 }
 0x215   :  { %3419 = vmatpush1.bf16.msra.mxu1 %v6967_v33 }
 0x217   :  { %3803 = vmatpush1.bf16.msra.mxu0 %v6969_v48 }
 0x218   :  { %1684 = vmatmul.mubr.f32.vlgmr.msra.gmra.mrb[0].mxu1 %v6905_v47 }
 0x21a   :  { %2968 = vmatmul.mubr.f32.vlgmr.msra.gmra.mrb[0].mxu0 %v6909_v46  ;;  %v2988_v46 = vunpack.c.l.s4 %v3926_v37 }
 0x21c   :  { %v2989_v1 = vunpack.c.0.s8 %v2988_v46 }
 0x21e   :  { %v2992_v8 = vsub.s32 %v2989_v1, %v6970_v56 }
 0x2eb   :  { %v1685_v42 = vpop.f32.mrb[0].mxu1 }
 0x2ec   :  { %v1687_v27 = vpop.f32.mrb[1].mxu1 }
 0x2ed   :  { %v2969_v34 = vpop.f32.mrb[0].mxu0 }
 0x2ee   :  { %v3804_v51 = vadd.f32 %v2969_v34, %v1685_v42  ;;  %v2971_v39 = vpop.f32.mrb[1].mxu0 }
 0x2ef   :  { %v3805_v10 = vadd.f32 %v2971_v39, %v1687_v27 }
 0x2f0   :  { %v2974_v7 = vsub.f32 0.0, %v3804_v51 }
 0x2f1   :  { %v2975_v63 = vsub.f32 0.0, %v3805_v10 }
 0x2f2   :  { %v2976_v38 = vmul.f32 1.442695, %v2974_v7 }
 0x2f3   :  { %v2978_v31 = vmul.f32 1.442695, %v2975_v63 }
 0x2f4   :  { %3839 = vpow2.f32 %v2976_v38 }
 0x2f5   :  { %3841 = vpow2.f32 %v2978_v31 }
 0x2fe   :  { %v3840_v29 = vpop.eup %3839 }
 0x2ff   :  { %v3842_v44 = vpop.eup %3841  ;;  %v2980_v58 = vadd.f32 1.0, %v3840_v29 }
 0x300   :  { %v2981_v47 = vadd.f32 1.0, %v3842_v44 }
 0x301   :  { %3843 = vrcp.f32 %v2980_v58 }
 0x302   :  { %3845 = vrcp.f32 %v2981_v47 }
 0x30b   :  { %v3844_v12 = vpop.eup %3843 }
 0x30c   :  { %v3846_v16 = vpop.eup %3845 }
 0x30d   :  { %v2986_v19 = vcombine.low %v3844_v12, %v3846_v16 }
 0x30f   :  { %v2993_v17 = vrot.slane %v2986_v19, %v2992_v8 }
 0x311   :  { %v2994_v59 = vcombine.high %v2993_v17, %v2993_v17  ;;  %v3001_v52 = vrot.slane %v2993_v17, %v2992_v8 }
 0x313   :  { %v3008_v3 = vrot.slane %v2994_v59, %v2992_v8  ;;  %3015 = vst.msk [vmem:[#allocation9] sm:$0x3] %vm3013_vm6, %v3001_v52 }
 0x315   :  { %3016 = vst.msk [vmem:[#allocation9 + $0x2] sm:$0x3] %vm3013_vm6, %v3008_v3 }
 0x316   :  { %3902 = shalt.err (!%p3899_p6)
}
 0x317   :  { %s3903_s12 = scalar_lea.hbm %s5662_s2, 64 }
 0x318   :  { %p3904_p7 = scmp.ne.s32.totalorder %s5662_s2, %s3903_s12  ;;  %p3907_p8 = scmp.lt.u32.totalorder %s3903_s12, %s5662_s2 }
 0x31a   :  { %p3909_p9 = pnand %p3907_p8, %p3904_p7 }
 0x31c   :  { %3912 = shalt.err (!%p3909_p9)
}
 0x31d   :  { %s3928_s17 = smov 32   ;;  %s3929_s18 = smov 2  }
 0x31e   :  { %3028 = dma.vmem_to_hbm [thread:$0]  %s3023_s8, 64, %s5662_s2, [#allocation6], %s3928_s17, %s3928_s17, %s3929_s18  }
 0x31f   :  { %3917 = dma.done.wait [#allocation6], 64  }
 0x320   :  { %3918 = vsyncadd [#allocation6], 4294967232 }
 0x321   :  { %3032 = vsyncpa [#allocation5], 1 }
 0x322   :  { %3033 = vsyncpa [#allocation8], 1 }
 0x323   :  { %3034 = vsyncpa [#allocation6], 1 }

</bundles_post_ra>
